<compile_context>
chip_gen: v7x
topology: tpu7x:2x2x1
jax: 0.10.0
libtpu: 0.0.40
codegen_flags: <defaults>
</compile_context>

<pallas_src>
import functools
import math

import jax
import jax.numpy as jnp
from jax import lax
from jax.experimental import pallas as pl
from jax.experimental.pallas import tpu as pltpu


# ----------------------------- shared math helpers -----------------------------

def _layernorm(x, gamma, beta, eps=1e-5):
    mu = jnp.mean(x, axis=-1, keepdims=True)
    var = jnp.mean((x - mu) ** 2, axis=-1, keepdims=True)
    return (x - mu) * lax.rsqrt(var + eps) * gamma + beta


def _gelu_exact(x):
    # torch.nn.GELU default = exact erf-based GELU
    return 0.5 * x * (1.0 + lax.erf(x * (1.0 / math.sqrt(2.0))))


def _fast_recip(x):
    # EUP approximate reciprocal + one Newton step -> ~f32-exact, no VPU divide.
    r = pl.reciprocal(x, approx=True)
    return r * (2.0 - x * r)


# --------------------------------- Pallas kernel --------------------------------

def block_kernel(x_ref, g1_ref, b1_ref, wq_ref, wkv_ref, rot_ref,
                 g2_ref, b2_ref, wf1_ref, bf1_ref, wf2_ref, bf2_ref,
                 out_ref, attn_acc_ref, *, num_heads, n_hashes, n_buckets, scale):
    Bt, N, C = x_ref.shape
    d = C // num_heads
    half = n_buckets // 2
    M = n_hashes * n_buckets
    T = Bt * N

    x3 = x_ref[...]                                   # (Bt, N, C)
    x = x3.reshape(T, C)                              # token-flattened (last dim kept)

    # --- norm1 (token-parallel over the whole batch tile) ---
    x_n = _layernorm(x, g1_ref[0], b1_ref[0])         # (T, C)
    x_n3 = x_n.reshape(Bt, N, C)

    # --- q projection (1/sqrt(d) folded in once) ---
    q = jnp.dot(x_n, wq_ref[...], preferred_element_type=jnp.float32) * scale
    q3 = q.reshape(Bt, N, C)

    # --- hash_vectors: one fused rotation matmul, arithmetic +/- argmax ---
    rv_all = jnp.dot(x_n, rot_ref[...], preferred_element_type=jnp.float32)  # (T, n_hashes*half)
    iota_m = lax.broadcasted_iota(jnp.int32, (T, M), 1)
    onehot = jnp.zeros((T, M), jnp.float32)
    for h in range(n_hashes):                         # n_hashes is small & static
        rv = rv_all[:, h * half:(h + 1) * half]       # (T, half)
        iota_h = lax.broadcasted_iota(jnp.int32, rv.shape, 1)
        mx = jnp.max(rv, axis=-1, keepdims=True)
        mn = jnp.min(rv, axis=-1, keepdims=True)
        # first index attaining max(rv) / max(-rv)  (argmax over [rv, -rv] w/o concat)
        idx_p = jnp.min(jnp.where(rv == mx, iota_h, half), axis=-1, keepdims=True)
        idx_n = jnp.min(jnp.where(rv == mn, iota_h, half), axis=-1, keepdims=True)
        bucket = jnp.where(mx >= -mn, idx_p, half + idx_n)          # (T, 1) in [0, n_buckets)
        onehot = onehot + (iota_m == (bucket + h * n_buckets)).astype(jnp.float32)

    onehot3 = onehot.reshape(Bt, N, M)
    sum_buckets = jnp.sum(onehot3, axis=1)            # (Bt, M)
    # pool[b, m, :] = sum_n onehot[b, n, m] * x_n[b, n, :]
    pool = lax.dot_general(onehot3, x_n3,
                           (((1,), (1,)), ((0,), (0,))),
                           preferred_element_type=jnp.float32)      # (Bt, M, C)
    pool = pool * _fast_recip(sum_buckets + 1e-20)[:, :, None]

    # --- kv projection on pooled buckets ---
    kv = jnp.dot(pool.reshape(Bt * M, C), wkv_ref[...],
                 preferred_element_type=jnp.float32).reshape(Bt, M, 2 * C)
    k3 = kv[:, :, :C]
    v3 = kv[:, :, C:]

    valid = (sum_buckets >= 1.0)[:, None, :]          # (Bt, 1, M)
    neg = jnp.float32(-1e30)                          # finite mask sentinel

    # --- masked softmax attention: batched over Bt per head, no concat ---
    for h in range(num_heads):                        # static loop over heads
        q_h = q3[:, :, h * d:(h + 1) * d]             # (Bt, N, d)
        k_h = k3[:, :, h * d:(h + 1) * d]             # (Bt, M, d)
        v_h = v3[:, :, h * d:(h + 1) * d]             # (Bt, M, d)
        s = jnp.einsum('bnd,bmd->bnm', q_h, k_h,
                       preferred_element_type=jnp.float32)          # (Bt, N, M)
        s = jnp.where(valid, s, neg)
        s = s - jnp.max(s, axis=-1, keepdims=True)
        p = jnp.exp(s)
        p = p * _fast_recip(jnp.sum(p, axis=-1, keepdims=True))
        o_h = jnp.einsum('bnm,bmd->bnd', p, v_h,
                         preferred_element_type=jnp.float32)        # (Bt, N, d)
        attn_acc_ref[:, :, h * d:(h + 1) * d] = o_h   # write head slice into VMEM slab

    # --- residual 1 (attn_drop = 0 -> identity) ---
    x2 = x + attn_acc_ref[...].reshape(T, C)

    # --- norm2 + MLP (GELU) + residual 2 ---
    x2_n = _layernorm(x2, g2_ref[0], b2_ref[0])
    h1 = jnp.dot(x2_n, wf1_ref[...], preferred_element_type=jnp.float32) + bf1_ref[0]
    h1 = _gelu_exact(h1)
    h2 = jnp.dot(h1, wf2_ref[...], preferred_element_type=jnp.float32) + bf2_ref[0]

    out_ref[...] = (x2 + h2).reshape(Bt, N, C)


# --------------------------------- wrapper --------------------------------------

def block_forward(x, params, *, num_heads=8, n_hashes=4, n_buckets=8, batch_tile=None):
    B, N, C = x.shape
    scale = (C // num_heads) ** (-0.5)

    if batch_tile is None:
        batch_tile = 1
        for cand in (32, 16, 8, 4, 2, 1):   # largest divisor of B, capped at 32
            if B % cand == 0:
                batch_tile = cand
                break
    bt = batch_tile
    assert B % bt == 0, "batch_tile must divide B"

    kernel = functools.partial(block_kernel, num_heads=num_heads,
                               n_hashes=n_hashes, n_buckets=n_buckets, scale=scale)

    def const2d(shape):
        # Whole tensor, same block every grid step (weights / affine params).
        return pl.BlockSpec(shape, lambda b: (0, 0))

    in_specs = [
        pl.BlockSpec((bt, N, C), lambda b: (b, 0, 0)),   # x: bt batch elements / step
        const2d((1, C)), const2d((1, C)),                # norm1 gamma/beta
        const2d((C, C)),                                 # W_q
        const2d((C, 2 * C)),                             # W_kv
        const2d((C, n_hashes * (n_buckets // 2))),       # random rotations (flattened)
        const2d((1, C)), const2d((1, C)),                # norm2 gamma/beta
        const2d((C, 4 * C)), const2d((1, 4 * C)),        # fc1 W/b
        const2d((4 * C, C)), const2d((1, C)),            # fc2 W/b
    ]

    return pl.pallas_call(
        kernel,
        out_shape=jax.ShapeDtypeStruct((B, N, C), jnp.float32),
        grid=(B // bt,),
        in_specs=in_specs,
        out_specs=pl.BlockSpec((bt, N, C), lambda b: (b, 0, 0)),
        scratch_shapes=[pltpu.VMEM((bt, N, C), jnp.float32)],   # per-head attention slab
        compiler_params=pltpu.CompilerParams(
            # batch steps are fully independent -> shard across v7x's 2 TCs
            dimension_semantics=("parallel",),
            vmem_limit_bytes=32 * 1024 * 1024,
        ),
    )(x, params["g1"], params["b1"], params["wq"], params["wkv"], params["rot"],
      params["g2"], params["b2"], params["wf1"], params["bf1"],
      params["wf2"], params["bf2"])


# ------------------------- plain-JAX reference (for sanity) ---------------------

def block_reference(x, p, *, num_heads=8, n_hashes=4, n_buckets=8):
    B, N, C = x.shape
    d = C // num_heads
    scale = d ** (-0.5)
    x_n = _layernorm(x, p["g1"][0], p["b1"][0])
    q = (x_n @ p["wq"]).reshape(B, N, num_heads, d).transpose(0, 2, 1, 3)
    rot = p["rot"].reshape(C, n_hashes, n_buckets // 2)
    rv = jnp.einsum("btf,fhi->bhti", x_n, rot)
    rv = jnp.concatenate([rv, -rv], axis=-1)
    buckets = jnp.argmax(rv, axis=-1)
    onehot = jax.nn.one_hot(buckets, n_buckets, dtype=jnp.float32)   # (B, h, N, nb)
    sumb = onehot.sum(axis=2)                                        # (B, h, nb)
    pool = jnp.einsum("bnf,bhni->bhif", x_n, onehot) / (sumb[..., None] + 1e-20)
    rp = pool.reshape(B, n_hashes * n_buckets, C)
    sumb = sumb.reshape(B, n_hashes * n_buckets)
    kv = (rp @ p["wkv"]).reshape(B, -1, 2, num_heads, d).transpose(2, 0, 3, 1, 4)
    k, v = kv[0], kv[1]
    attn = jnp.einsum("bhnd,bhmd->bhnm", q, k) * scale
    mask = (sumb >= 1.0)[:, None, None, :]
    attn = jnp.where(mask, attn, -jnp.finfo(jnp.float32).max)
    attn = jax.nn.softmax(attn, axis=-1)
    x_attn = jnp.einsum("bhnm,bhmd->bnhd", attn, v).reshape(B, N, C)
    x2 = x + x_attn
    x2_n = _layernorm(x2, p["g2"][0], p["b2"][0])
    h = _gelu_exact(x2_n @ p["wf1"] + p["bf1"][0])
    return x2 + h @ p["wf2"] + p["bf2"][0]


# ------------------------------------ main --------------------------------------

if __name__ == "__main__":
    B, N, C = 2, 16, 32
    num_heads, n_hashes, n_buckets = 8, 4, 8

    key = jax.random.PRNGKey(0)
    ks = jax.random.split(key, 7)
    params = dict(
        g1=jnp.ones((1, C), jnp.float32),
        b1=jnp.zeros((1, C), jnp.float32),
        wq=0.05 * jax.random.normal(ks[0], (C, C), jnp.float32),
        wkv=0.05 * jax.random.normal(ks[1], (C, 2 * C), jnp.float32),
        rot=jax.random.normal(ks[2], (C, n_hashes * (n_buckets // 2)), jnp.float32),
        g2=jnp.ones((1, C), jnp.float32),
        b2=jnp.zeros((1, C), jnp.float32),
        wf1=0.05 * jax.random.normal(ks[3], (C, 4 * C), jnp.float32),
        bf1=jnp.zeros((1, 4 * C), jnp.float32),
        wf2=0.05 * jax.random.normal(ks[4], (4 * C, C), jnp.float32),
        bf2=jnp.zeros((1, C), jnp.float32),
    )
    x = jax.random.normal(ks[5], (B, N, C), jnp.float32)

    out = block_forward(x, params, num_heads=num_heads,
                        n_hashes=n_hashes, n_buckets=n_buckets)
    out = jax.block_until_ready(out)

    ref = block_reference(x, params, num_heads=num_heads,
                          n_hashes=n_hashes, n_buckets=n_buckets)
    ref = jax.block_until_ready(ref)

    assert out.shape == (B, N, C)
    assert bool(jnp.allclose(out, ref, rtol=1e-4, atol=1e-4)), "Pallas kernel mismatch vs JAX reference"

    print("KERNEL_OK")
</pallas_src>

<mosaic_0001>
module attributes {stable_mosaic.version = 11 : i64} {
  func.func @block_kernel(%arg0: i32, %arg1: memref<2x16x32xf32, #tpu.memory_space<vmem>>, %arg2: memref<1x32xf32, #tpu.memory_space<vmem>>, %arg3: memref<1x32xf32, #tpu.memory_space<vmem>>, %arg4: memref<32x32xf32, #tpu.memory_space<vmem>>, %arg5: memref<32x64xf32, #tpu.memory_space<vmem>>, %arg6: memref<32x16xf32, #tpu.memory_space<vmem>>, %arg7: memref<1x32xf32, #tpu.memory_space<vmem>>, %arg8: memref<1x32xf32, #tpu.memory_space<vmem>>, %arg9: memref<32x128xf32, #tpu.memory_space<vmem>>, %arg10: memref<1x128xf32, #tpu.memory_space<vmem>>, %arg11: memref<128x32xf32, #tpu.memory_space<vmem>>, %arg12: memref<1x32xf32, #tpu.memory_space<vmem>>, %arg13: memref<2x16x32xf32, #tpu.memory_space<vmem>>, %arg14: memref<2x16x32xf32, #tpu.memory_space<vmem>>) attributes {dimension_semantics = [#tpu.dimension_semantics<parallel>], iteration_bounds = array<i64: 1>, scalar_prefetch = 0 : i64, scratch_operands = 1 : i64, tpu.core_type = #tpu.core_type<tc>, window_params = [{transform_indices = @transform_0, window_bounds = array<i64: 2, 16, 32>}, {pipeline_mode = #tpu.pipeline_mode<synchronous>, transform_indices = @transform_1, window_bounds = array<i64: 1, 32>}, {pipeline_mode = #tpu.pipeline_mode<synchronous>, transform_indices = @transform_2, window_bounds = array<i64: 1, 32>}, {pipeline_mode = #tpu.pipeline_mode<synchronous>, transform_indices = @transform_3, window_bounds = array<i64: 32, 32>}, {pipeline_mode = #tpu.pipeline_mode<synchronous>, transform_indices = @transform_4, window_bounds = array<i64: 32, 64>}, {pipeline_mode = #tpu.pipeline_mode<synchronous>, transform_indices = @transform_5, window_bounds = array<i64: 32, 16>}, {pipeline_mode = #tpu.pipeline_mode<synchronous>, transform_indices = @transform_6, window_bounds = array<i64: 1, 32>}, {pipeline_mode = #tpu.pipeline_mode<synchronous>, transform_indices = @transform_7, window_bounds = array<i64: 1, 32>}, {pipeline_mode = #tpu.pipeline_mode<synchronous>, transform_indices = @transform_8, window_bounds = array<i64: 32, 128>}, {pipeline_mode = #tpu.pipeline_mode<synchronous>, transform_indices = @transform_9, window_bounds = array<i64: 1, 128>}, {pipeline_mode = #tpu.pipeline_mode<synchronous>, transform_indices = @transform_10, window_bounds = array<i64: 128, 32>}, {pipeline_mode = #tpu.pipeline_mode<synchronous>, transform_indices = @transform_11, window_bounds = array<i64: 1, 32>}, {transform_indices = @transform_12, window_bounds = array<i64: 2, 16, 32>}]} {
    %c0 = arith.constant 0 : index
    %c0_0 = arith.constant 0 : index
    %c0_1 = arith.constant 0 : index
    %0 = vector.load %arg1[%c0, %c0_0, %c0_1] : memref<2x16x32xf32, #tpu.memory_space<vmem>>, vector<2x16x32xf32>
    %1 = vector.shape_cast %0 : vector<2x16x32xf32> to vector<32x32xf32>
    %c0_2 = arith.constant 0 : index
    %c0_3 = arith.constant 0 : index
    %2 = vector.load %arg2[%c0_2, %c0_3] : memref<1x32xf32, #tpu.memory_space<vmem>>, vector<1x32xf32>
    %3 = vector.shape_cast %2 : vector<1x32xf32> to vector<32xf32>
    %c0_4 = arith.constant 0 : index
    %c0_5 = arith.constant 0 : index
    %4 = vector.load %arg3[%c0_4, %c0_5] : memref<1x32xf32, #tpu.memory_space<vmem>>, vector<1x32xf32>
    %5 = vector.shape_cast %4 : vector<1x32xf32> to vector<32xf32>
    %cst = arith.constant dense<0.000000e+00> : vector<32xf32>
    %6 = vector.multi_reduction <add>, %1, %cst [1] : vector<32x32xf32> to vector<32xf32>
    %7 = vector.shape_cast %6 : vector<32xf32> to vector<32x1xf32>
    %cst_6 = arith.constant 3.200000e+01 : f32
    %8 = vector.broadcast %cst_6 : f32 to vector<32x1xf32>
    %9 = arith.divf %7, %8 : vector<32x1xf32>
    %10 = vector.broadcast %9 : vector<32x1xf32> to vector<32x32xf32>
    %11 = arith.subf %1, %10 : vector<32x32xf32>
    %12 = arith.mulf %11, %11 : vector<32x32xf32>
    %cst_7 = arith.constant dense<0.000000e+00> : vector<32xf32>
    %13 = vector.multi_reduction <add>, %12, %cst_7 [1] : vector<32x32xf32> to vector<32xf32>
    %14 = vector.shape_cast %13 : vector<32xf32> to vector<32x1xf32>
    %cst_8 = arith.constant 3.200000e+01 : f32
    %15 = vector.broadcast %cst_8 : f32 to vector<32x1xf32>
    %16 = arith.divf %14, %15 : vector<32x1xf32>
    %17 = vector.broadcast %9 : vector<32x1xf32> to vector<32x32xf32>
    %18 = arith.subf %1, %17 : vector<32x32xf32>
    %cst_9 = arith.constant 9.99999974E-6 : f32
    %19 = vector.broadcast %cst_9 : f32 to vector<32x1xf32>
    %20 = arith.addf %16, %19 : vector<32x1xf32>
    %21 = math.rsqrt %20 : vector<32x1xf32>
    %22 = vector.broadcast %21 : vector<32x1xf32> to vector<32x32xf32>
    %23 = arith.mulf %18, %22 : vector<32x32xf32>
    %24 = vector.shape_cast %3 : vector<32xf32> to vector<1x32xf32>
    %25 = vector.broadcast %24 : vector<1x32xf32> to vector<32x32xf32>
    %26 = arith.mulf %23, %25 : vector<32x32xf32>
    %27 = vector.shape_cast %5 : vector<32xf32> to vector<1x32xf32>
    %28 = vector.broadcast %27 : vector<1x32xf32> to vector<32x32xf32>
    %29 = arith.addf %26, %28 : vector<32x32xf32>
    %30 = vector.shape_cast %29 : vector<32x32xf32> to vector<2x16x32xf32>
    %c0_10 = arith.constant 0 : index
    %c0_11 = arith.constant 0 : index
    %31 = vector.load %arg4[%c0_10, %c0_11] : memref<32x32xf32, #tpu.memory_space<vmem>>, vector<32x32xf32>
    %cst_12 = arith.constant dense<0.000000e+00> : vector<32x32xf32>
    %32 = tpu.matmul %29, %31, %cst_12 {dimension_numbers = #tpu.dot_dimension_numbers<[1], [0], [0], [1], [0, 0, 1, 1], [], []>} : vector<32x32xf32>, vector<32x32xf32>, vector<32x32xf32> -> vector<32x32xf32>
    %cst_13 = arith.constant 5.000000e-01 : f32
    %33 = vector.broadcast %cst_13 : f32 to vector<32x32xf32>
    %34 = arith.mulf %32, %33 : vector<32x32xf32>
    %35 = vector.shape_cast %34 : vector<32x32xf32> to vector<2x16x32xf32>
    %c0_14 = arith.constant 0 : index
    %c0_15 = arith.constant 0 : index
    %36 = vector.load %arg6[%c0_14, %c0_15] : memref<32x16xf32, #tpu.memory_space<vmem>>, vector<32x16xf32>
    %cst_16 = arith.constant dense<0.000000e+00> : vector<32x16xf32>
    %37 = tpu.matmul %29, %36, %cst_16 {dimension_numbers = #tpu.dot_dimension_numbers<[1], [0], [0], [1], [0, 0, 1, 1], [], []>} : vector<32x32xf32>, vector<32x16xf32>, vector<32x16xf32> -> vector<32x16xf32>
    %38 = tpu.iota {dimensions = array<i32: 1>} : vector<32x32xi32>
    %cst_17 = arith.constant 0.000000e+00 : f32
    %39 = vector.broadcast %cst_17 : f32 to vector<32x32xf32>
    %40 = vector.extract_strided_slice %37 {offsets = [0, 0], sizes = [32, 4], strides = [1, 1]} : vector<32x16xf32> to vector<32x4xf32>
    %41 = tpu.iota {dimensions = array<i32: 1>} : vector<32x4xi32>
    %cst_18 = arith.constant dense<0xFF800000> : vector<32xf32>
    %42 = vector.multi_reduction <maximumf>, %40, %cst_18 [1] : vector<32x4xf32> to vector<32xf32>
    %43 = vector.shape_cast %42 : vector<32xf32> to vector<32x1xf32>
    %cst_19 = arith.constant dense<0x7F800000> : vector<32xf32>
    %44 = vector.multi_reduction <minimumf>, %40, %cst_19 [1] : vector<32x4xf32> to vector<32xf32>
    %45 = vector.shape_cast %44 : vector<32xf32> to vector<32x1xf32>
    %46 = vector.broadcast %43 : vector<32x1xf32> to vector<32x4xf32>
    %47 = arith.cmpf oeq, %40, %46 : vector<32x4xf32>
    %c4_i32 = arith.constant 4 : i32
    %48 = vector.broadcast %c4_i32 : i32 to vector<32x4xi32>
    %49 = arith.select %47, %41, %48 : vector<32x4xi1>, vector<32x4xi32>
    %cst_20 = arith.constant dense<2147483647> : vector<32xi32>
    %50 = vector.multi_reduction <minsi>, %49, %cst_20 [1] : vector<32x4xi32> to vector<32xi32>
    %51 = vector.shape_cast %50 : vector<32xi32> to vector<32x1xi32>
    %52 = vector.broadcast %45 : vector<32x1xf32> to vector<32x4xf32>
    %53 = arith.cmpf oeq, %40, %52 : vector<32x4xf32>
    %c4_i32_21 = arith.constant 4 : i32
    %54 = vector.broadcast %c4_i32_21 : i32 to vector<32x4xi32>
    %55 = arith.select %53, %41, %54 : vector<32x4xi1>, vector<32x4xi32>
    %cst_22 = arith.constant dense<2147483647> : vector<32xi32>
    %56 = vector.multi_reduction <minsi>, %55, %cst_22 [1] : vector<32x4xi32> to vector<32xi32>
    %57 = vector.shape_cast %56 : vector<32xi32> to vector<32x1xi32>
    %cst_23 = arith.constant 0.000000e+00 : f32
    %58 = vector.broadcast %cst_23 : f32 to vector<32x1xf32>
    %59 = arith.subf %58, %45 : vector<32x1xf32>
    %60 = arith.cmpf oge, %43, %59 : vector<32x1xf32>
    %c4_i32_24 = arith.constant 4 : i32
    %61 = vector.broadcast %c4_i32_24 : i32 to vector<32x1xi32>
    %62 = arith.addi %61, %57 : vector<32x1xi32>
    %63 = arith.select %60, %51, %62 : vector<32x1xi1>, vector<32x1xi32>
    %c0_i32 = arith.constant 0 : i32
    %64 = vector.broadcast %c0_i32 : i32 to vector<32x1xi32>
    %65 = arith.addi %63, %64 : vector<32x1xi32>
    %66 = vector.broadcast %65 : vector<32x1xi32> to vector<32x32xi32>
    %67 = arith.cmpi eq, %38, %66 : vector<32x32xi32>
    %68 = arith.extui %67 : vector<32x32xi1> to vector<32x32xi32>
    %69 = arith.sitofp %68 : vector<32x32xi32> to vector<32x32xf32>
    %70 = arith.addf %39, %69 : vector<32x32xf32>
    %71 = vector.extract_strided_slice %37 {offsets = [0, 4], sizes = [32, 4], strides = [1, 1]} : vector<32x16xf32> to vector<32x4xf32>
    %72 = tpu.iota {dimensions = array<i32: 1>} : vector<32x4xi32>
    %cst_25 = arith.constant dense<0xFF800000> : vector<32xf32>
    %73 = vector.multi_reduction <maximumf>, %71, %cst_25 [1] : vector<32x4xf32> to vector<32xf32>
    %74 = vector.shape_cast %73 : vector<32xf32> to vector<32x1xf32>
    %cst_26 = arith.constant dense<0x7F800000> : vector<32xf32>
    %75 = vector.multi_reduction <minimumf>, %71, %cst_26 [1] : vector<32x4xf32> to vector<32xf32>
    %76 = vector.shape_cast %75 : vector<32xf32> to vector<32x1xf32>
    %77 = vector.broadcast %74 : vector<32x1xf32> to vector<32x4xf32>
    %78 = arith.cmpf oeq, %71, %77 : vector<32x4xf32>
    %c4_i32_27 = arith.constant 4 : i32
    %79 = vector.broadcast %c4_i32_27 : i32 to vector<32x4xi32>
    %80 = arith.select %78, %72, %79 : vector<32x4xi1>, vector<32x4xi32>
    %cst_28 = arith.constant dense<2147483647> : vector<32xi32>
    %81 = vector.multi_reduction <minsi>, %80, %cst_28 [1] : vector<32x4xi32> to vector<32xi32>
    %82 = vector.shape_cast %81 : vector<32xi32> to vector<32x1xi32>
    %83 = vector.broadcast %76 : vector<32x1xf32> to vector<32x4xf32>
    %84 = arith.cmpf oeq, %71, %83 : vector<32x4xf32>
    %c4_i32_29 = arith.constant 4 : i32
    %85 = vector.broadcast %c4_i32_29 : i32 to vector<32x4xi32>
    %86 = arith.select %84, %72, %85 : vector<32x4xi1>, vector<32x4xi32>
    %cst_30 = arith.constant dense<2147483647> : vector<32xi32>
    %87 = vector.multi_reduction <minsi>, %86, %cst_30 [1] : vector<32x4xi32> to vector<32xi32>
    %88 = vector.shape_cast %87 : vector<32xi32> to vector<32x1xi32>
    %cst_31 = arith.constant 0.000000e+00 : f32
    %89 = vector.broadcast %cst_31 : f32 to vector<32x1xf32>
    %90 = arith.subf %89, %76 : vector<32x1xf32>
    %91 = arith.cmpf oge, %74, %90 : vector<32x1xf32>
    %c4_i32_32 = arith.constant 4 : i32
    %92 = vector.broadcast %c4_i32_32 : i32 to vector<32x1xi32>
    %93 = arith.addi %92, %88 : vector<32x1xi32>
    %94 = arith.select %91, %82, %93 : vector<32x1xi1>, vector<32x1xi32>
    %c8_i32 = arith.constant 8 : i32
    %95 = vector.broadcast %c8_i32 : i32 to vector<32x1xi32>
    %96 = arith.addi %94, %95 : vector<32x1xi32>
    %97 = vector.broadcast %96 : vector<32x1xi32> to vector<32x32xi32>
    %98 = arith.cmpi eq, %38, %97 : vector<32x32xi32>
    %99 = arith.extui %98 : vector<32x32xi1> to vector<32x32xi32>
    %100 = arith.sitofp %99 : vector<32x32xi32> to vector<32x32xf32>
    %101 = arith.addf %70, %100 : vector<32x32xf32>
    %102 = vector.extract_strided_slice %37 {offsets = [0, 8], sizes = [32, 4], strides = [1, 1]} : vector<32x16xf32> to vector<32x4xf32>
    %103 = tpu.iota {dimensions = array<i32: 1>} : vector<32x4xi32>
    %cst_33 = arith.constant dense<0xFF800000> : vector<32xf32>
    %104 = vector.multi_reduction <maximumf>, %102, %cst_33 [1] : vector<32x4xf32> to vector<32xf32>
    %105 = vector.shape_cast %104 : vector<32xf32> to vector<32x1xf32>
    %cst_34 = arith.constant dense<0x7F800000> : vector<32xf32>
    %106 = vector.multi_reduction <minimumf>, %102, %cst_34 [1] : vector<32x4xf32> to vector<32xf32>
    %107 = vector.shape_cast %106 : vector<32xf32> to vector<32x1xf32>
    %108 = vector.broadcast %105 : vector<32x1xf32> to vector<32x4xf32>
    %109 = arith.cmpf oeq, %102, %108 : vector<32x4xf32>
    %c4_i32_35 = arith.constant 4 : i32
    %110 = vector.broadcast %c4_i32_35 : i32 to vector<32x4xi32>
    %111 = arith.select %109, %103, %110 : vector<32x4xi1>, vector<32x4xi32>
    %cst_36 = arith.constant dense<2147483647> : vector<32xi32>
    %112 = vector.multi_reduction <minsi>, %111, %cst_36 [1] : vector<32x4xi32> to vector<32xi32>
    %113 = vector.shape_cast %112 : vector<32xi32> to vector<32x1xi32>
    %114 = vector.broadcast %107 : vector<32x1xf32> to vector<32x4xf32>
    %115 = arith.cmpf oeq, %102, %114 : vector<32x4xf32>
    %c4_i32_37 = arith.constant 4 : i32
    %116 = vector.broadcast %c4_i32_37 : i32 to vector<32x4xi32>
    %117 = arith.select %115, %103, %116 : vector<32x4xi1>, vector<32x4xi32>
    %cst_38 = arith.constant dense<2147483647> : vector<32xi32>
    %118 = vector.multi_reduction <minsi>, %117, %cst_38 [1] : vector<32x4xi32> to vector<32xi32>
    %119 = vector.shape_cast %118 : vector<32xi32> to vector<32x1xi32>
    %cst_39 = arith.constant 0.000000e+00 : f32
    %120 = vector.broadcast %cst_39 : f32 to vector<32x1xf32>
    %121 = arith.subf %120, %107 : vector<32x1xf32>
    %122 = arith.cmpf oge, %105, %121 : vector<32x1xf32>
    %c4_i32_40 = arith.constant 4 : i32
    %123 = vector.broadcast %c4_i32_40 : i32 to vector<32x1xi32>
    %124 = arith.addi %123, %119 : vector<32x1xi32>
    %125 = arith.select %122, %113, %124 : vector<32x1xi1>, vector<32x1xi32>
    %c16_i32 = arith.constant 16 : i32
    %126 = vector.broadcast %c16_i32 : i32 to vector<32x1xi32>
    %127 = arith.addi %125, %126 : vector<32x1xi32>
    %128 = vector.broadcast %127 : vector<32x1xi32> to vector<32x32xi32>
    %129 = arith.cmpi eq, %38, %128 : vector<32x32xi32>
    %130 = arith.extui %129 : vector<32x32xi1> to vector<32x32xi32>
    %131 = arith.sitofp %130 : vector<32x32xi32> to vector<32x32xf32>
    %132 = arith.addf %101, %131 : vector<32x32xf32>
    %133 = vector.extract_strided_slice %37 {offsets = [0, 12], sizes = [32, 4], strides = [1, 1]} : vector<32x16xf32> to vector<32x4xf32>
    %134 = tpu.iota {dimensions = array<i32: 1>} : vector<32x4xi32>
    %cst_41 = arith.constant dense<0xFF800000> : vector<32xf32>
    %135 = vector.multi_reduction <maximumf>, %133, %cst_41 [1] : vector<32x4xf32> to vector<32xf32>
    %136 = vector.shape_cast %135 : vector<32xf32> to vector<32x1xf32>
    %cst_42 = arith.constant dense<0x7F800000> : vector<32xf32>
    %137 = vector.multi_reduction <minimumf>, %133, %cst_42 [1] : vector<32x4xf32> to vector<32xf32>
    %138 = vector.shape_cast %137 : vector<32xf32> to vector<32x1xf32>
    %139 = vector.broadcast %136 : vector<32x1xf32> to vector<32x4xf32>
    %140 = arith.cmpf oeq, %133, %139 : vector<32x4xf32>
    %c4_i32_43 = arith.constant 4 : i32
    %141 = vector.broadcast %c4_i32_43 : i32 to vector<32x4xi32>
    %142 = arith.select %140, %134, %141 : vector<32x4xi1>, vector<32x4xi32>
    %cst_44 = arith.constant dense<2147483647> : vector<32xi32>
    %143 = vector.multi_reduction <minsi>, %142, %cst_44 [1] : vector<32x4xi32> to vector<32xi32>
    %144 = vector.shape_cast %143 : vector<32xi32> to vector<32x1xi32>
    %145 = vector.broadcast %138 : vector<32x1xf32> to vector<32x4xf32>
    %146 = arith.cmpf oeq, %133, %145 : vector<32x4xf32>
    %c4_i32_45 = arith.constant 4 : i32
    %147 = vector.broadcast %c4_i32_45 : i32 to vector<32x4xi32>
    %148 = arith.select %146, %134, %147 : vector<32x4xi1>, vector<32x4xi32>
    %cst_46 = arith.constant dense<2147483647> : vector<32xi32>
    %149 = vector.multi_reduction <minsi>, %148, %cst_46 [1] : vector<32x4xi32> to vector<32xi32>
    %150 = vector.shape_cast %149 : vector<32xi32> to vector<32x1xi32>
    %cst_47 = arith.constant 0.000000e+00 : f32
    %151 = vector.broadcast %cst_47 : f32 to vector<32x1xf32>
    %152 = arith.subf %151, %138 : vector<32x1xf32>
    %153 = arith.cmpf oge, %136, %152 : vector<32x1xf32>
    %c4_i32_48 = arith.constant 4 : i32
    %154 = vector.broadcast %c4_i32_48 : i32 to vector<32x1xi32>
    %155 = arith.addi %154, %150 : vector<32x1xi32>
    %156 = arith.select %153, %144, %155 : vector<32x1xi1>, vector<32x1xi32>
    %c24_i32 = arith.constant 24 : i32
    %157 = vector.broadcast %c24_i32 : i32 to vector<32x1xi32>
    %158 = arith.addi %156, %157 : vector<32x1xi32>
    %159 = vector.broadcast %158 : vector<32x1xi32> to vector<32x32xi32>
    %160 = arith.cmpi eq, %38, %159 : vector<32x32xi32>
    %161 = arith.extui %160 : vector<32x32xi1> to vector<32x32xi32>
    %162 = arith.sitofp %161 : vector<32x32xi32> to vector<32x32xf32>
    %163 = arith.addf %132, %162 : vector<32x32xf32>
    %164 = vector.shape_cast %163 : vector<32x32xf32> to vector<2x16x32xf32>
    %cst_49 = arith.constant dense<0.000000e+00> : vector<2x32xf32>
    %165 = vector.multi_reduction <add>, %164, %cst_49 [1] : vector<2x16x32xf32> to vector<2x32xf32>
    %cst_50 = arith.constant dense<0.000000e+00> : vector<2x32x32xf32>
    %166 = tpu.matmul %164, %30, %cst_50 {dimension_numbers = #tpu.dot_dimension_numbers<[1], [1], [2], [2], [0, 0, 0, 2, 1, 2], [0], [0]>} : vector<2x16x32xf32>, vector<2x16x32xf32>, vector<2x32x32xf32> -> vector<2x32x32xf32>
    %cst_51 = arith.constant 9.99999968E-21 : f32
    %167 = vector.broadcast %cst_51 : f32 to vector<2x32xf32>
    %168 = arith.addf %165, %167 : vector<2x32xf32>
    %169 = tpu.reciprocal %168 {approx = true} : vector<2x32xf32> -> vector<2x32xf32>
    %170 = arith.mulf %168, %169 : vector<2x32xf32>
    %cst_52 = arith.constant 2.000000e+00 : f32
    %171 = vector.broadcast %cst_52 : f32 to vector<2x32xf32>
    %172 = arith.subf %171, %170 : vector<2x32xf32>
    %173 = arith.mulf %169, %172 : vector<2x32xf32>
    %174 = vector.shape_cast %173 : vector<2x32xf32> to vector<2x32x1xf32>
    %175 = vector.broadcast %174 : vector<2x32x1xf32> to vector<2x32x32xf32>
    %176 = arith.mulf %166, %175 : vector<2x32x32xf32>
    %177 = vector.shape_cast %176 : vector<2x32x32xf32> to vector<64x32xf32>
    %c0_53 = arith.constant 0 : index
    %c0_54 = arith.constant 0 : index
    %178 = vector.load %arg5[%c0_53, %c0_54] : memref<32x64xf32, #tpu.memory_space<vmem>>, vector<32x64xf32>
    %cst_55 = arith.constant dense<0.000000e+00> : vector<64x64xf32>
    %179 = tpu.matmul %177, %178, %cst_55 {dimension_numbers = #tpu.dot_dimension_numbers<[1], [0], [0], [1], [0, 0, 1, 1], [], []>} : vector<64x32xf32>, vector<32x64xf32>, vector<64x64xf32> -> vector<64x64xf32>
    %180 = vector.shape_cast %179 : vector<64x64xf32> to vector<2x32x64xf32>
    %181 = vector.extract_strided_slice %180 {offsets = [0, 0, 0], sizes = [2, 32, 32], strides = [1, 1, 1]} : vector<2x32x64xf32> to vector<2x32x32xf32>
    %182 = vector.extract_strided_slice %180 {offsets = [0, 0, 32], sizes = [2, 32, 32], strides = [1, 1, 1]} : vector<2x32x64xf32> to vector<2x32x32xf32>
    %cst_56 = arith.constant 1.000000e+00 : f32
    %183 = vector.broadcast %cst_56 : f32 to vector<2x32xf32>
    %184 = arith.cmpf oge, %165, %183 : vector<2x32xf32>
    %185 = vector.shape_cast %184 : vector<2x32xi1> to vector<2x1x32xi1>
    %186 = vector.extract_strided_slice %35 {offsets = [0, 0, 0], sizes = [2, 16, 4], strides = [1, 1, 1]} : vector<2x16x32xf32> to vector<2x16x4xf32>
    %187 = vector.extract_strided_slice %181 {offsets = [0, 0, 0], sizes = [2, 32, 4], strides = [1, 1, 1]} : vector<2x32x32xf32> to vector<2x32x4xf32>
    %188 = vector.extract_strided_slice %182 {offsets = [0, 0, 0], sizes = [2, 32, 4], strides = [1, 1, 1]} : vector<2x32x32xf32> to vector<2x32x4xf32>
    "tpu.trace_start"() <{level = 10 : i32, message = "bnd,bmd->bnm"}> : () -> ()
    %cst_57 = arith.constant dense<0.000000e+00> : vector<2x16x32xf32>
    %189 = tpu.matmul %186, %187, %cst_57 {dimension_numbers = #tpu.dot_dimension_numbers<[2], [2], [1], [1], [0, 0, 0, 1, 1, 1], [0], [0]>} : vector<2x16x4xf32>, vector<2x32x4xf32>, vector<2x16x32xf32> -> vector<2x16x32xf32>
    %cst_58 = arith.constant -1.000000e+30 : f32
    "tpu.trace_stop"() : () -> ()
    %190 = vector.shape_cast %185 : vector<2x1x32xi1> to vector<2x1x32xi1>
    %191 = vector.broadcast %190 : vector<2x1x32xi1> to vector<2x16x32xi1>
    %192 = vector.broadcast %cst_58 : f32 to vector<2x16x32xf32>
    %193 = arith.select %191, %189, %192 : vector<2x16x32xi1>, vector<2x16x32xf32>
    %cst_59 = arith.constant dense<0xFF800000> : vector<2x16xf32>
    %194 = vector.multi_reduction <maximumf>, %193, %cst_59 [2] : vector<2x16x32xf32> to vector<2x16xf32>
    %195 = vector.shape_cast %194 : vector<2x16xf32> to vector<2x16x1xf32>
    %196 = vector.broadcast %195 : vector<2x16x1xf32> to vector<2x16x32xf32>
    %197 = arith.subf %193, %196 : vector<2x16x32xf32>
    %198 = math.exp %197 : vector<2x16x32xf32>
    %cst_60 = arith.constant dense<0.000000e+00> : vector<2x16xf32>
    %199 = vector.multi_reduction <add>, %198, %cst_60 [2] : vector<2x16x32xf32> to vector<2x16xf32>
    %200 = vector.shape_cast %199 : vector<2x16xf32> to vector<2x16x1xf32>
    %201 = tpu.reciprocal %200 {approx = true} : vector<2x16x1xf32> -> vector<2x16x1xf32>
    %202 = arith.mulf %200, %201 : vector<2x16x1xf32>
    %cst_61 = arith.constant 2.000000e+00 : f32
    %203 = vector.broadcast %cst_61 : f32 to vector<2x16x1xf32>
    %204 = arith.subf %203, %202 : vector<2x16x1xf32>
    %205 = arith.mulf %201, %204 : vector<2x16x1xf32>
    %206 = vector.broadcast %205 : vector<2x16x1xf32> to vector<2x16x32xf32>
    %207 = arith.mulf %198, %206 : vector<2x16x32xf32>
    "tpu.trace_start"() <{level = 10 : i32, message = "bnm,bmd->bnd"}> : () -> ()
    %cst_62 = arith.constant dense<0.000000e+00> : vector<2x16x4xf32>
    %208 = tpu.matmul %207, %188, %cst_62 {dimension_numbers = #tpu.dot_dimension_numbers<[2], [1], [1], [2], [0, 0, 0, 1, 1, 2], [0], [0]>} : vector<2x16x32xf32>, vector<2x32x4xf32>, vector<2x16x4xf32> -> vector<2x16x4xf32>
    "tpu.trace_stop"() : () -> ()
    %c0_63 = arith.constant 0 : index
    %c0_64 = arith.constant 0 : index
    %c0_65 = arith.constant 0 : index
    %209 = vector.load %arg14[%c0_63, %c0_64, %c0_65] : memref<2x16x32xf32, #tpu.memory_space<vmem>>, vector<2x16x4xf32>
    tpu.vector_store %arg14[%c0_63, %c0_64, %c0_65], %208 {strides = array<i32>} : memref<2x16x32xf32, #tpu.memory_space<vmem>>, vector<2x16x4xf32>,
    %210 = vector.extract_strided_slice %35 {offsets = [0, 0, 4], sizes = [2, 16, 4], strides = [1, 1, 1]} : vector<2x16x32xf32> to vector<2x16x4xf32>
    %211 = vector.extract_strided_slice %181 {offsets = [0, 0, 4], sizes = [2, 32, 4], strides = [1, 1, 1]} : vector<2x32x32xf32> to vector<2x32x4xf32>
    %212 = vector.extract_strided_slice %182 {offsets = [0, 0, 4], sizes = [2, 32, 4], strides = [1, 1, 1]} : vector<2x32x32xf32> to vector<2x32x4xf32>
    "tpu.trace_start"() <{level = 10 : i32, message = "bnd,bmd->bnm"}> : () -> ()
    %cst_66 = arith.constant dense<0.000000e+00> : vector<2x16x32xf32>
    %213 = tpu.matmul %210, %211, %cst_66 {dimension_numbers = #tpu.dot_dimension_numbers<[2], [2], [1], [1], [0, 0, 0, 1, 1, 1], [0], [0]>} : vector<2x16x4xf32>, vector<2x32x4xf32>, vector<2x16x32xf32> -> vector<2x16x32xf32>
    %cst_67 = arith.constant -1.000000e+30 : f32
    "tpu.trace_stop"() : () -> ()
    %214 = vector.shape_cast %185 : vector<2x1x32xi1> to vector<2x1x32xi1>
    %215 = vector.broadcast %214 : vector<2x1x32xi1> to vector<2x16x32xi1>
    %216 = vector.broadcast %cst_67 : f32 to vector<2x16x32xf32>
    %217 = arith.select %215, %213, %216 : vector<2x16x32xi1>, vector<2x16x32xf32>
    %cst_68 = arith.constant dense<0xFF800000> : vector<2x16xf32>
    %218 = vector.multi_reduction <maximumf>, %217, %cst_68 [2] : vector<2x16x32xf32> to vector<2x16xf32>
    %219 = vector.shape_cast %218 : vector<2x16xf32> to vector<2x16x1xf32>
    %220 = vector.broadcast %219 : vector<2x16x1xf32> to vector<2x16x32xf32>
    %221 = arith.subf %217, %220 : vector<2x16x32xf32>
    %222 = math.exp %221 : vector<2x16x32xf32>
    %cst_69 = arith.constant dense<0.000000e+00> : vector<2x16xf32>
    %223 = vector.multi_reduction <add>, %222, %cst_69 [2] : vector<2x16x32xf32> to vector<2x16xf32>
    %224 = vector.shape_cast %223 : vector<2x16xf32> to vector<2x16x1xf32>
    %225 = tpu.reciprocal %224 {approx = true} : vector<2x16x1xf32> -> vector<2x16x1xf32>
    %226 = arith.mulf %224, %225 : vector<2x16x1xf32>
    %cst_70 = arith.constant 2.000000e+00 : f32
    %227 = vector.broadcast %cst_70 : f32 to vector<2x16x1xf32>
    %228 = arith.subf %227, %226 : vector<2x16x1xf32>
    %229 = arith.mulf %225, %228 : vector<2x16x1xf32>
    %230 = vector.broadcast %229 : vector<2x16x1xf32> to vector<2x16x32xf32>
    %231 = arith.mulf %222, %230 : vector<2x16x32xf32>
    "tpu.trace_start"() <{level = 10 : i32, message = "bnm,bmd->bnd"}> : () -> ()
    %cst_71 = arith.constant dense<0.000000e+00> : vector<2x16x4xf32>
    %232 = tpu.matmul %231, %212, %cst_71 {dimension_numbers = #tpu.dot_dimension_numbers<[2], [1], [1], [2], [0, 0, 0, 1, 1, 2], [0], [0]>} : vector<2x16x32xf32>, vector<2x32x4xf32>, vector<2x16x4xf32> -> vector<2x16x4xf32>
    "tpu.trace_stop"() : () -> ()
    %c0_72 = arith.constant 0 : index
    %c0_73 = arith.constant 0 : index
    %c4 = arith.constant 4 : index
    %233 = vector.load %arg14[%c0_72, %c0_73, %c4] : memref<2x16x32xf32, #tpu.memory_space<vmem>>, vector<2x16x4xf32>
    tpu.vector_store %arg14[%c0_72, %c0_73, %c4], %232 {strides = array<i32>} : memref<2x16x32xf32, #tpu.memory_space<vmem>>, vector<2x16x4xf32>,
    %234 = vector.extract_strided_slice %35 {offsets = [0, 0, 8], sizes = [2, 16, 4], strides = [1, 1, 1]} : vector<2x16x32xf32> to vector<2x16x4xf32>
    %235 = vector.extract_strided_slice %181 {offsets = [0, 0, 8], sizes = [2, 32, 4], strides = [1, 1, 1]} : vector<2x32x32xf32> to vector<2x32x4xf32>
    %236 = vector.extract_strided_slice %182 {offsets = [0, 0, 8], sizes = [2, 32, 4], strides = [1, 1, 1]} : vector<2x32x32xf32> to vector<2x32x4xf32>
    "tpu.trace_start"() <{level = 10 : i32, message = "bnd,bmd->bnm"}> : () -> ()
    %cst_74 = arith.constant dense<0.000000e+00> : vector<2x16x32xf32>
    %237 = tpu.matmul %234, %235, %cst_74 {dimension_numbers = #tpu.dot_dimension_numbers<[2], [2], [1], [1], [0, 0, 0, 1, 1, 1], [0], [0]>} : vector<2x16x4xf32>, vector<2x32x4xf32>, vector<2x16x32xf32> -> vector<2x16x32xf32>
    %cst_75 = arith.constant -1.000000e+30 : f32
    "tpu.trace_stop"() : () -> ()
    %238 = vector.shape_cast %185 : vector<2x1x32xi1> to vector<2x1x32xi1>
    %239 = vector.broadcast %238 : vector<2x1x32xi1> to vector<2x16x32xi1>
    %240 = vector.broadcast %cst_75 : f32 to vector<2x16x32xf32>
    %241 = arith.select %239, %237, %240 : vector<2x16x32xi1>, vector<2x16x32xf32>
    %cst_76 = arith.constant dense<0xFF800000> : vector<2x16xf32>
    %242 = vector.multi_reduction <maximumf>, %241, %cst_76 [2] : vector<2x16x32xf32> to vector<2x16xf32>
    %243 = vector.shape_cast %242 : vector<2x16xf32> to vector<2x16x1xf32>
    %244 = vector.broadcast %243 : vector<2x16x1xf32> to vector<2x16x32xf32>
    %245 = arith.subf %241, %244 : vector<2x16x32xf32>
    %246 = math.exp %245 : vector<2x16x32xf32>
    %cst_77 = arith.constant dense<0.000000e+00> : vector<2x16xf32>
    %247 = vector.multi_reduction <add>, %246, %cst_77 [2] : vector<2x16x32xf32> to vector<2x16xf32>
    %248 = vector.shape_cast %247 : vector<2x16xf32> to vector<2x16x1xf32>
    %249 = tpu.reciprocal %248 {approx = true} : vector<2x16x1xf32> -> vector<2x16x1xf32>
    %250 = arith.mulf %248, %249 : vector<2x16x1xf32>
    %cst_78 = arith.constant 2.000000e+00 : f32
    %251 = vector.broadcast %cst_78 : f32 to vector<2x16x1xf32>
    %252 = arith.subf %251, %250 : vector<2x16x1xf32>
    %253 = arith.mulf %249, %252 : vector<2x16x1xf32>
    %254 = vector.broadcast %253 : vector<2x16x1xf32> to vector<2x16x32xf32>
    %255 = arith.mulf %246, %254 : vector<2x16x32xf32>
    "tpu.trace_start"() <{level = 10 : i32, message = "bnm,bmd->bnd"}> : () -> ()
    %cst_79 = arith.constant dense<0.000000e+00> : vector<2x16x4xf32>
    %256 = tpu.matmul %255, %236, %cst_79 {dimension_numbers = #tpu.dot_dimension_numbers<[2], [1], [1], [2], [0, 0, 0, 1, 1, 2], [0], [0]>} : vector<2x16x32xf32>, vector<2x32x4xf32>, vector<2x16x4xf32> -> vector<2x16x4xf32>
    "tpu.trace_stop"() : () -> ()
    %c0_80 = arith.constant 0 : index
    %c0_81 = arith.constant 0 : index
    %c8 = arith.constant 8 : index
    %257 = vector.load %arg14[%c0_80, %c0_81, %c8] : memref<2x16x32xf32, #tpu.memory_space<vmem>>, vector<2x16x4xf32>
    tpu.vector_store %arg14[%c0_80, %c0_81, %c8], %256 {strides = array<i32>} : memref<2x16x32xf32, #tpu.memory_space<vmem>>, vector<2x16x4xf32>,
    %258 = vector.extract_strided_slice %35 {offsets = [0, 0, 12], sizes = [2, 16, 4], strides = [1, 1, 1]} : vector<2x16x32xf32> to vector<2x16x4xf32>
    %259 = vector.extract_strided_slice %181 {offsets = [0, 0, 12], sizes = [2, 32, 4], strides = [1, 1, 1]} : vector<2x32x32xf32> to vector<2x32x4xf32>
    %260 = vector.extract_strided_slice %182 {offsets = [0, 0, 12], sizes = [2, 32, 4], strides = [1, 1, 1]} : vector<2x32x32xf32> to vector<2x32x4xf32>
    "tpu.trace_start"() <{level = 10 : i32, message = "bnd,bmd->bnm"}> : () -> ()
    %cst_82 = arith.constant dense<0.000000e+00> : vector<2x16x32xf32>
    %261 = tpu.matmul %258, %259, %cst_82 {dimension_numbers = #tpu.dot_dimension_numbers<[2], [2], [1], [1], [0, 0, 0, 1, 1, 1], [0], [0]>} : vector<2x16x4xf32>, vector<2x32x4xf32>, vector<2x16x32xf32> -> vector<2x16x32xf32>
    %cst_83 = arith.constant -1.000000e+30 : f32
    "tpu.trace_stop"() : () -> ()
    %262 = vector.shape_cast %185 : vector<2x1x32xi1> to vector<2x1x32xi1>
    %263 = vector.broadcast %262 : vector<2x1x32xi1> to vector<2x16x32xi1>
    %264 = vector.broadcast %cst_83 : f32 to vector<2x16x32xf32>
    %265 = arith.select %263, %261, %264 : vector<2x16x32xi1>, vector<2x16x32xf32>
    %cst_84 = arith.constant dense<0xFF800000> : vector<2x16xf32>
    %266 = vector.multi_reduction <maximumf>, %265, %cst_84 [2] : vector<2x16x32xf32> to vector<2x16xf32>
    %267 = vector.shape_cast %266 : vector<2x16xf32> to vector<2x16x1xf32>
    %268 = vector.broadcast %267 : vector<2x16x1xf32> to vector<2x16x32xf32>
    %269 = arith.subf %265, %268 : vector<2x16x32xf32>
    %270 = math.exp %269 : vector<2x16x32xf32>
    %cst_85 = arith.constant dense<0.000000e+00> : vector<2x16xf32>
    %271 = vector.multi_reduction <add>, %270, %cst_85 [2] : vector<2x16x32xf32> to vector<2x16xf32>
    %272 = vector.shape_cast %271 : vector<2x16xf32> to vector<2x16x1xf32>
    %273 = tpu.reciprocal %272 {approx = true} : vector<2x16x1xf32> -> vector<2x16x1xf32>
    %274 = arith.mulf %272, %273 : vector<2x16x1xf32>
    %cst_86 = arith.constant 2.000000e+00 : f32
    %275 = vector.broadcast %cst_86 : f32 to vector<2x16x1xf32>
    %276 = arith.subf %275, %274 : vector<2x16x1xf32>
    %277 = arith.mulf %273, %276 : vector<2x16x1xf32>
    %278 = vector.broadcast %277 : vector<2x16x1xf32> to vector<2x16x32xf32>
    %279 = arith.mulf %270, %278 : vector<2x16x32xf32>
    "tpu.trace_start"() <{level = 10 : i32, message = "bnm,bmd->bnd"}> : () -> ()
    %cst_87 = arith.constant dense<0.000000e+00> : vector<2x16x4xf32>
    %280 = tpu.matmul %279, %260, %cst_87 {dimension_numbers = #tpu.dot_dimension_numbers<[2], [1], [1], [2], [0, 0, 0, 1, 1, 2], [0], [0]>} : vector<2x16x32xf32>, vector<2x32x4xf32>, vector<2x16x4xf32> -> vector<2x16x4xf32>
    "tpu.trace_stop"() : () -> ()
    %c0_88 = arith.constant 0 : index
    %c0_89 = arith.constant 0 : index
    %c12 = arith.constant 12 : index
    %281 = vector.load %arg14[%c0_88, %c0_89, %c12] : memref<2x16x32xf32, #tpu.memory_space<vmem>>, vector<2x16x4xf32>
    tpu.vector_store %arg14[%c0_88, %c0_89, %c12], %280 {strides = array<i32>} : memref<2x16x32xf32, #tpu.memory_space<vmem>>, vector<2x16x4xf32>,
    %282 = vector.extract_strided_slice %35 {offsets = [0, 0, 16], sizes = [2, 16, 4], strides = [1, 1, 1]} : vector<2x16x32xf32> to vector<2x16x4xf32>
    %283 = vector.extract_strided_slice %181 {offsets = [0, 0, 16], sizes = [2, 32, 4], strides = [1, 1, 1]} : vector<2x32x32xf32> to vector<2x32x4xf32>
    %284 = vector.extract_strided_slice %182 {offsets = [0, 0, 16], sizes = [2, 32, 4], strides = [1, 1, 1]} : vector<2x32x32xf32> to vector<2x32x4xf32>
    "tpu.trace_start"() <{level = 10 : i32, message = "bnd,bmd->bnm"}> : () -> ()
    %cst_90 = arith.constant dense<0.000000e+00> : vector<2x16x32xf32>
    %285 = tpu.matmul %282, %283, %cst_90 {dimension_numbers = #tpu.dot_dimension_numbers<[2], [2], [1], [1], [0, 0, 0, 1, 1, 1], [0], [0]>} : vector<2x16x4xf32>, vector<2x32x4xf32>, vector<2x16x32xf32> -> vector<2x16x32xf32>
    %cst_91 = arith.constant -1.000000e+30 : f32
    "tpu.trace_stop"() : () -> ()
    %286 = vector.shape_cast %185 : vector<2x1x32xi1> to vector<2x1x32xi1>
    %287 = vector.broadcast %286 : vector<2x1x32xi1> to vector<2x16x32xi1>
    %288 = vector.broadcast %cst_91 : f32 to vector<2x16x32xf32>
    %289 = arith.select %287, %285, %288 : vector<2x16x32xi1>, vector<2x16x32xf32>
    %cst_92 = arith.constant dense<0xFF800000> : vector<2x16xf32>
    %290 = vector.multi_reduction <maximumf>, %289, %cst_92 [2] : vector<2x16x32xf32> to vector<2x16xf32>
    %291 = vector.shape_cast %290 : vector<2x16xf32> to vector<2x16x1xf32>
    %292 = vector.broadcast %291 : vector<2x16x1xf32> to vector<2x16x32xf32>
    %293 = arith.subf %289, %292 : vector<2x16x32xf32>
    %294 = math.exp %293 : vector<2x16x32xf32>
    %cst_93 = arith.constant dense<0.000000e+00> : vector<2x16xf32>
    %295 = vector.multi_reduction <add>, %294, %cst_93 [2] : vector<2x16x32xf32> to vector<2x16xf32>
    %296 = vector.shape_cast %295 : vector<2x16xf32> to vector<2x16x1xf32>
    %297 = tpu.reciprocal %296 {approx = true} : vector<2x16x1xf32> -> vector<2x16x1xf32>
    %298 = arith.mulf %296, %297 : vector<2x16x1xf32>
    %cst_94 = arith.constant 2.000000e+00 : f32
    %299 = vector.broadcast %cst_94 : f32 to vector<2x16x1xf32>
    %300 = arith.subf %299, %298 : vector<2x16x1xf32>
    %301 = arith.mulf %297, %300 : vector<2x16x1xf32>
    %302 = vector.broadcast %301 : vector<2x16x1xf32> to vector<2x16x32xf32>
    %303 = arith.mulf %294, %302 : vector<2x16x32xf32>
    "tpu.trace_start"() <{level = 10 : i32, message = "bnm,bmd->bnd"}> : () -> ()
    %cst_95 = arith.constant dense<0.000000e+00> : vector<2x16x4xf32>
    %304 = tpu.matmul %303, %284, %cst_95 {dimension_numbers = #tpu.dot_dimension_numbers<[2], [1], [1], [2], [0, 0, 0, 1, 1, 2], [0], [0]>} : vector<2x16x32xf32>, vector<2x32x4xf32>, vector<2x16x4xf32> -> vector<2x16x4xf32>
    "tpu.trace_stop"() : () -> ()
    %c0_96 = arith.constant 0 : index
    %c0_97 = arith.constant 0 : index
    %c16 = arith.constant 16 : index
    %305 = vector.load %arg14[%c0_96, %c0_97, %c16] : memref<2x16x32xf32, #tpu.memory_space<vmem>>, vector<2x16x4xf32>
    tpu.vector_store %arg14[%c0_96, %c0_97, %c16], %304 {strides = array<i32>} : memref<2x16x32xf32, #tpu.memory_space<vmem>>, vector<2x16x4xf32>,
    %306 = vector.extract_strided_slice %35 {offsets = [0, 0, 20], sizes = [2, 16, 4], strides = [1, 1, 1]} : vector<2x16x32xf32> to vector<2x16x4xf32>
    %307 = vector.extract_strided_slice %181 {offsets = [0, 0, 20], sizes = [2, 32, 4], strides = [1, 1, 1]} : vector<2x32x32xf32> to vector<2x32x4xf32>
    %308 = vector.extract_strided_slice %182 {offsets = [0, 0, 20], sizes = [2, 32, 4], strides = [1, 1, 1]} : vector<2x32x32xf32> to vector<2x32x4xf32>
    "tpu.trace_start"() <{level = 10 : i32, message = "bnd,bmd->bnm"}> : () -> ()
    %cst_98 = arith.constant dense<0.000000e+00> : vector<2x16x32xf32>
    %309 = tpu.matmul %306, %307, %cst_98 {dimension_numbers = #tpu.dot_dimension_numbers<[2], [2], [1], [1], [0, 0, 0, 1, 1, 1], [0], [0]>} : vector<2x16x4xf32>, vector<2x32x4xf32>, vector<2x16x32xf32> -> vector<2x16x32xf32>
    %cst_99 = arith.constant -1.000000e+30 : f32
    "tpu.trace_stop"() : () -> ()
    %310 = vector.shape_cast %185 : vector<2x1x32xi1> to vector<2x1x32xi1>
    %311 = vector.broadcast %310 : vector<2x1x32xi1> to vector<2x16x32xi1>
    %312 = vector.broadcast %cst_99 : f32 to vector<2x16x32xf32>
    %313 = arith.select %311, %309, %312 : vector<2x16x32xi1>, vector<2x16x32xf32>
    %cst_100 = arith.constant dense<0xFF800000> : vector<2x16xf32>
    %314 = vector.multi_reduction <maximumf>, %313, %cst_100 [2] : vector<2x16x32xf32> to vector<2x16xf32>
    %315 = vector.shape_cast %314 : vector<2x16xf32> to vector<2x16x1xf32>
    %316 = vector.broadcast %315 : vector<2x16x1xf32> to vector<2x16x32xf32>
    %317 = arith.subf %313, %316 : vector<2x16x32xf32>
    %318 = math.exp %317 : vector<2x16x32xf32>
    %cst_101 = arith.constant dense<0.000000e+00> : vector<2x16xf32>
    %319 = vector.multi_reduction <add>, %318, %cst_101 [2] : vector<2x16x32xf32> to vector<2x16xf32>
    %320 = vector.shape_cast %319 : vector<2x16xf32> to vector<2x16x1xf32>
    %321 = tpu.reciprocal %320 {approx = true} : vector<2x16x1xf32> -> vector<2x16x1xf32>
    %322 = arith.mulf %320, %321 : vector<2x16x1xf32>
    %cst_102 = arith.constant 2.000000e+00 : f32
    %323 = vector.broadcast %cst_102 : f32 to vector<2x16x1xf32>
    %324 = arith.subf %323, %322 : vector<2x16x1xf32>
    %325 = arith.mulf %321, %324 : vector<2x16x1xf32>
    %326 = vector.broadcast %325 : vector<2x16x1xf32> to vector<2x16x32xf32>
    %327 = arith.mulf %318, %326 : vector<2x16x32xf32>
    "tpu.trace_start"() <{level = 10 : i32, message = "bnm,bmd->bnd"}> : () -> ()
    %cst_103 = arith.constant dense<0.000000e+00> : vector<2x16x4xf32>
    %328 = tpu.matmul %327, %308, %cst_103 {dimension_numbers = #tpu.dot_dimension_numbers<[2], [1], [1], [2], [0, 0, 0, 1, 1, 2], [0], [0]>} : vector<2x16x32xf32>, vector<2x32x4xf32>, vector<2x16x4xf32> -> vector<2x16x4xf32>
    "tpu.trace_stop"() : () -> ()
    %c0_104 = arith.constant 0 : index
    %c0_105 = arith.constant 0 : index
    %c20 = arith.constant 20 : index
    %329 = vector.load %arg14[%c0_104, %c0_105, %c20] : memref<2x16x32xf32, #tpu.memory_space<vmem>>, vector<2x16x4xf32>
    tpu.vector_store %arg14[%c0_104, %c0_105, %c20], %328 {strides = array<i32>} : memref<2x16x32xf32, #tpu.memory_space<vmem>>, vector<2x16x4xf32>,
    %330 = vector.extract_strided_slice %35 {offsets = [0, 0, 24], sizes = [2, 16, 4], strides = [1, 1, 1]} : vector<2x16x32xf32> to vector<2x16x4xf32>
    %331 = vector.extract_strided_slice %181 {offsets = [0, 0, 24], sizes = [2, 32, 4], strides = [1, 1, 1]} : vector<2x32x32xf32> to vector<2x32x4xf32>
    %332 = vector.extract_strided_slice %182 {offsets = [0, 0, 24], sizes = [2, 32, 4], strides = [1, 1, 1]} : vector<2x32x32xf32> to vector<2x32x4xf32>
    "tpu.trace_start"() <{level = 10 : i32, message = "bnd,bmd->bnm"}> : () -> ()
    %cst_106 = arith.constant dense<0.000000e+00> : vector<2x16x32xf32>
    %333 = tpu.matmul %330, %331, %cst_106 {dimension_numbers = #tpu.dot_dimension_numbers<[2], [2], [1], [1], [0, 0, 0, 1, 1, 1], [0], [0]>} : vector<2x16x4xf32>, vector<2x32x4xf32>, vector<2x16x32xf32> -> vector<2x16x32xf32>
    %cst_107 = arith.constant -1.000000e+30 : f32
    "tpu.trace_stop"() : () -> ()
    %334 = vector.shape_cast %185 : vector<2x1x32xi1> to vector<2x1x32xi1>
    %335 = vector.broadcast %334 : vector<2x1x32xi1> to vector<2x16x32xi1>
    %336 = vector.broadcast %cst_107 : f32 to vector<2x16x32xf32>
    %337 = arith.select %335, %333, %336 : vector<2x16x32xi1>, vector<2x16x32xf32>
    %cst_108 = arith.constant dense<0xFF800000> : vector<2x16xf32>
    %338 = vector.multi_reduction <maximumf>, %337, %cst_108 [2] : vector<2x16x32xf32> to vector<2x16xf32>
    %339 = vector.shape_cast %338 : vector<2x16xf32> to vector<2x16x1xf32>
    %340 = vector.broadcast %339 : vector<2x16x1xf32> to vector<2x16x32xf32>
    %341 = arith.subf %337, %340 : vector<2x16x32xf32>
    %342 = math.exp %341 : vector<2x16x32xf32>
    %cst_109 = arith.constant dense<0.000000e+00> : vector<2x16xf32>
    %343 = vector.multi_reduction <add>, %342, %cst_109 [2] : vector<2x16x32xf32> to vector<2x16xf32>
    %344 = vector.shape_cast %343 : vector<2x16xf32> to vector<2x16x1xf32>
    %345 = tpu.reciprocal %344 {approx = true} : vector<2x16x1xf32> -> vector<2x16x1xf32>
    %346 = arith.mulf %344, %345 : vector<2x16x1xf32>
    %cst_110 = arith.constant 2.000000e+00 : f32
    %347 = vector.broadcast %cst_110 : f32 to vector<2x16x1xf32>
    %348 = arith.subf %347, %346 : vector<2x16x1xf32>
    %349 = arith.mulf %345, %348 : vector<2x16x1xf32>
    %350 = vector.broadcast %349 : vector<2x16x1xf32> to vector<2x16x32xf32>
    %351 = arith.mulf %342, %350 : vector<2x16x32xf32>
    "tpu.trace_start"() <{level = 10 : i32, message = "bnm,bmd->bnd"}> : () -> ()
    %cst_111 = arith.constant dense<0.000000e+00> : vector<2x16x4xf32>
    %352 = tpu.matmul %351, %332, %cst_111 {dimension_numbers = #tpu.dot_dimension_numbers<[2], [1], [1], [2], [0, 0, 0, 1, 1, 2], [0], [0]>} : vector<2x16x32xf32>, vector<2x32x4xf32>, vector<2x16x4xf32> -> vector<2x16x4xf32>
    "tpu.trace_stop"() : () -> ()
    %c0_112 = arith.constant 0 : index
    %c0_113 = arith.constant 0 : index
    %c24 = arith.constant 24 : index
    %353 = vector.load %arg14[%c0_112, %c0_113, %c24] : memref<2x16x32xf32, #tpu.memory_space<vmem>>, vector<2x16x4xf32>
    tpu.vector_store %arg14[%c0_112, %c0_113, %c24], %352 {strides = array<i32>} : memref<2x16x32xf32, #tpu.memory_space<vmem>>, vector<2x16x4xf32>,
    %354 = vector.extract_strided_slice %35 {offsets = [0, 0, 28], sizes = [2, 16, 4], strides = [1, 1, 1]} : vector<2x16x32xf32> to vector<2x16x4xf32>
    %355 = vector.extract_strided_slice %181 {offsets = [0, 0, 28], sizes = [2, 32, 4], strides = [1, 1, 1]} : vector<2x32x32xf32> to vector<2x32x4xf32>
    %356 = vector.extract_strided_slice %182 {offsets = [0, 0, 28], sizes = [2, 32, 4], strides = [1, 1, 1]} : vector<2x32x32xf32> to vector<2x32x4xf32>
    "tpu.trace_start"() <{level = 10 : i32, message = "bnd,bmd->bnm"}> : () -> ()
    %cst_114 = arith.constant dense<0.000000e+00> : vector<2x16x32xf32>
    %357 = tpu.matmul %354, %355, %cst_114 {dimension_numbers = #tpu.dot_dimension_numbers<[2], [2], [1], [1], [0, 0, 0, 1, 1, 1], [0], [0]>} : vector<2x16x4xf32>, vector<2x32x4xf32>, vector<2x16x32xf32> -> vector<2x16x32xf32>
    %cst_115 = arith.constant -1.000000e+30 : f32
    "tpu.trace_stop"() : () -> ()
    %358 = vector.shape_cast %185 : vector<2x1x32xi1> to vector<2x1x32xi1>
    %359 = vector.broadcast %358 : vector<2x1x32xi1> to vector<2x16x32xi1>
    %360 = vector.broadcast %cst_115 : f32 to vector<2x16x32xf32>
    %361 = arith.select %359, %357, %360 : vector<2x16x32xi1>, vector<2x16x32xf32>
    %cst_116 = arith.constant dense<0xFF800000> : vector<2x16xf32>
    %362 = vector.multi_reduction <maximumf>, %361, %cst_116 [2] : vector<2x16x32xf32> to vector<2x16xf32>
    %363 = vector.shape_cast %362 : vector<2x16xf32> to vector<2x16x1xf32>
    %364 = vector.broadcast %363 : vector<2x16x1xf32> to vector<2x16x32xf32>
    %365 = arith.subf %361, %364 : vector<2x16x32xf32>
    %366 = math.exp %365 : vector<2x16x32xf32>
    %cst_117 = arith.constant dense<0.000000e+00> : vector<2x16xf32>
    %367 = vector.multi_reduction <add>, %366, %cst_117 [2] : vector<2x16x32xf32> to vector<2x16xf32>
    %368 = vector.shape_cast %367 : vector<2x16xf32> to vector<2x16x1xf32>
    %369 = tpu.reciprocal %368 {approx = true} : vector<2x16x1xf32> -> vector<2x16x1xf32>
    %370 = arith.mulf %368, %369 : vector<2x16x1xf32>
    %cst_118 = arith.constant 2.000000e+00 : f32
    %371 = vector.broadcast %cst_118 : f32 to vector<2x16x1xf32>
    %372 = arith.subf %371, %370 : vector<2x16x1xf32>
    %373 = arith.mulf %369, %372 : vector<2x16x1xf32>
    %374 = vector.broadcast %373 : vector<2x16x1xf32> to vector<2x16x32xf32>
    %375 = arith.mulf %366, %374 : vector<2x16x32xf32>
    "tpu.trace_start"() <{level = 10 : i32, message = "bnm,bmd->bnd"}> : () -> ()
    %cst_119 = arith.constant dense<0.000000e+00> : vector<2x16x4xf32>
    %376 = tpu.matmul %375, %356, %cst_119 {dimension_numbers = #tpu.dot_dimension_numbers<[2], [1], [1], [2], [0, 0, 0, 1, 1, 2], [0], [0]>} : vector<2x16x32xf32>, vector<2x32x4xf32>, vector<2x16x4xf32> -> vector<2x16x4xf32>
    "tpu.trace_stop"() : () -> ()
    %c0_120 = arith.constant 0 : index
    %c0_121 = arith.constant 0 : index
    %c28 = arith.constant 28 : index
    %377 = vector.load %arg14[%c0_120, %c0_121, %c28] : memref<2x16x32xf32, #tpu.memory_space<vmem>>, vector<2x16x4xf32>
    tpu.vector_store %arg14[%c0_120, %c0_121, %c28], %376 {strides = array<i32>} : memref<2x16x32xf32, #tpu.memory_space<vmem>>, vector<2x16x4xf32>,
    %c0_122 = arith.constant 0 : index
    %c0_123 = arith.constant 0 : index
    %c0_124 = arith.constant 0 : index
    %378 = vector.load %arg14[%c0_122, %c0_123, %c0_124] : memref<2x16x32xf32, #tpu.memory_space<vmem>>, vector<2x16x32xf32>
    %379 = vector.shape_cast %378 : vector<2x16x32xf32> to vector<32x32xf32>
    %380 = arith.addf %1, %379 : vector<32x32xf32>
    %c0_125 = arith.constant 0 : index
    %c0_126 = arith.constant 0 : index
    %381 = vector.load %arg7[%c0_125, %c0_126] : memref<1x32xf32, #tpu.memory_space<vmem>>, vector<1x32xf32>
    %382 = vector.shape_cast %381 : vector<1x32xf32> to vector<32xf32>
    %c0_127 = arith.constant 0 : index
    %c0_128 = arith.constant 0 : index
    %383 = vector.load %arg8[%c0_127, %c0_128] : memref<1x32xf32, #tpu.memory_space<vmem>>, vector<1x32xf32>
    %384 = vector.shape_cast %383 : vector<1x32xf32> to vector<32xf32>
    %cst_129 = arith.constant dense<0.000000e+00> : vector<32xf32>
    %385 = vector.multi_reduction <add>, %380, %cst_129 [1] : vector<32x32xf32> to vector<32xf32>
    %386 = vector.shape_cast %385 : vector<32xf32> to vector<32x1xf32>
    %cst_130 = arith.constant 3.200000e+01 : f32
    %387 = vector.broadcast %cst_130 : f32 to vector<32x1xf32>
    %388 = arith.divf %386, %387 : vector<32x1xf32>
    %389 = vector.broadcast %388 : vector<32x1xf32> to vector<32x32xf32>
    %390 = arith.subf %380, %389 : vector<32x32xf32>
    %391 = arith.mulf %390, %390 : vector<32x32xf32>
    %cst_131 = arith.constant dense<0.000000e+00> : vector<32xf32>
    %392 = vector.multi_reduction <add>, %391, %cst_131 [1] : vector<32x32xf32> to vector<32xf32>
    %393 = vector.shape_cast %392 : vector<32xf32> to vector<32x1xf32>
    %cst_132 = arith.constant 3.200000e+01 : f32
    %394 = vector.broadcast %cst_132 : f32 to vector<32x1xf32>
    %395 = arith.divf %393, %394 : vector<32x1xf32>
    %396 = vector.broadcast %388 : vector<32x1xf32> to vector<32x32xf32>
    %397 = arith.subf %380, %396 : vector<32x32xf32>
    %cst_133 = arith.constant 9.99999974E-6 : f32
    %398 = vector.broadcast %cst_133 : f32 to vector<32x1xf32>
    %399 = arith.addf %395, %398 : vector<32x1xf32>
    %400 = math.rsqrt %399 : vector<32x1xf32>
    %401 = vector.broadcast %400 : vector<32x1xf32> to vector<32x32xf32>
    %402 = arith.mulf %397, %401 : vector<32x32xf32>
    %403 = vector.shape_cast %382 : vector<32xf32> to vector<1x32xf32>
    %404 = vector.broadcast %403 : vector<1x32xf32> to vector<32x32xf32>
    %405 = arith.mulf %402, %404 : vector<32x32xf32>
    %406 = vector.shape_cast %384 : vector<32xf32> to vector<1x32xf32>
    %407 = vector.broadcast %406 : vector<1x32xf32> to vector<32x32xf32>
    %408 = arith.addf %405, %407 : vector<32x32xf32>
    %c0_134 = arith.constant 0 : index
    %c0_135 = arith.constant 0 : index
    %409 = vector.load %arg9[%c0_134, %c0_135] : memref<32x128xf32, #tpu.memory_space<vmem>>, vector<32x128xf32>
    %cst_136 = arith.constant dense<0.000000e+00> : vector<32x128xf32>
    %410 = tpu.matmul %408, %409, %cst_136 {dimension_numbers = #tpu.dot_dimension_numbers<[1], [0], [0], [1], [0, 0, 1, 1], [], []>} : vector<32x32xf32>, vector<32x128xf32>, vector<32x128xf32> -> vector<32x128xf32>
    %c0_137 = arith.constant 0 : index
    %c0_138 = arith.constant 0 : index
    %411 = vector.load %arg10[%c0_137, %c0_138] : memref<1x128xf32, #tpu.memory_space<vmem>>, vector<1x128xf32>
    %412 = vector.shape_cast %411 : vector<1x128xf32> to vector<128xf32>
    %413 = vector.shape_cast %412 : vector<128xf32> to vector<1x128xf32>
    %414 = vector.broadcast %413 : vector<1x128xf32> to vector<32x128xf32>
    %415 = arith.addf %410, %414 : vector<32x128xf32>
    %cst_139 = arith.constant 5.000000e-01 : f32
    %416 = vector.broadcast %cst_139 : f32 to vector<32x128xf32>
    %417 = arith.mulf %416, %415 : vector<32x128xf32>
    %cst_140 = arith.constant 0.707106769 : f32
    %418 = vector.broadcast %cst_140 : f32 to vector<32x128xf32>
    %419 = arith.mulf %415, %418 : vector<32x128xf32>
    %420 = math.erf %419 : vector<32x128xf32>
    %cst_141 = arith.constant 1.000000e+00 : f32
    %421 = vector.broadcast %cst_141 : f32 to vector<32x128xf32>
    %422 = arith.addf %421, %420 : vector<32x128xf32>
    %423 = arith.mulf %417, %422 : vector<32x128xf32>
    %c0_142 = arith.constant 0 : index
    %c0_143 = arith.constant 0 : index
    %424 = vector.load %arg11[%c0_142, %c0_143] : memref<128x32xf32, #tpu.memory_space<vmem>>, vector<128x32xf32>
    %cst_144 = arith.constant dense<0.000000e+00> : vector<32x32xf32>
    %425 = tpu.matmul %423, %424, %cst_144 {dimension_numbers = #tpu.dot_dimension_numbers<[1], [0], [0], [1], [0, 0, 1, 1], [], []>} : vector<32x128xf32>, vector<128x32xf32>, vector<32x32xf32> -> vector<32x32xf32>
    %c0_145 = arith.constant 0 : index
    %c0_146 = arith.constant 0 : index
    %426 = vector.load %arg12[%c0_145, %c0_146] : memref<1x32xf32, #tpu.memory_space<vmem>>, vector<1x32xf32>
    %427 = vector.shape_cast %426 : vector<1x32xf32> to vector<32xf32>
    %428 = vector.shape_cast %427 : vector<32xf32> to vector<1x32xf32>
    %429 = vector.broadcast %428 : vector<1x32xf32> to vector<32x32xf32>
    %430 = arith.addf %425, %429 : vector<32x32xf32>
    %431 = arith.addf %380, %430 : vector<32x32xf32>
    %432 = vector.shape_cast %431 : vector<32x32xf32> to vector<2x16x32xf32>
    %c0_147 = arith.constant 0 : index
    %c0_148 = arith.constant 0 : index
    %c0_149 = arith.constant 0 : index
    %433 = vector.load %arg13[%c0_147, %c0_148, %c0_149] : memref<2x16x32xf32, #tpu.memory_space<vmem>>, vector<2x16x32xf32>
    tpu.vector_store %arg13[%c0_147, %c0_148, %c0_149], %432 {strides = array<i32>} : memref<2x16x32xf32, #tpu.memory_space<vmem>>, vector<2x16x32xf32>,
    return
  }
  func.func @transform_0(%arg0: i32) -> (i32, i32, i32) {
    %c0_i32 = arith.constant 0 : i32
    %c0_i32_0 = arith.constant 0 : i32
    %c0_i32_1 = arith.constant 0 : i32
    return %arg0, %c0_i32, %c0_i32_0 : i32, i32, i32
  }
  func.func @transform_1(%arg0: i32) -> (i32, i32) {
    %c0_i32 = arith.constant 0 : i32
    %c0_i32_0 = arith.constant 0 : i32
    %c0_i32_1 = arith.constant 0 : i32
    return %c0_i32, %c0_i32_0 : i32, i32
  }
  func.func @transform_2(%arg0: i32) -> (i32, i32) {
    %c0_i32 = arith.constant 0 : i32
    %c0_i32_0 = arith.constant 0 : i32
    %c0_i32_1 = arith.constant 0 : i32
    return %c0_i32, %c0_i32_0 : i32, i32
  }
  func.func @transform_3(%arg0: i32) -> (i32, i32) {
    %c0_i32 = arith.constant 0 : i32
    %c0_i32_0 = arith.constant 0 : i32
    %c0_i32_1 = arith.constant 0 : i32
    return %c0_i32, %c0_i32_0 : i32, i32
  }
  func.func @transform_4(%arg0: i32) -> (i32, i32) {
    %c0_i32 = arith.constant 0 : i32
    %c0_i32_0 = arith.constant 0 : i32
    %c0_i32_1 = arith.constant 0 : i32
    return %c0_i32, %c0_i32_0 : i32, i32
  }
  func.func @transform_5(%arg0: i32) -> (i32, i32) {
    %c0_i32 = arith.constant 0 : i32
    %c0_i32_0 = arith.constant 0 : i32
    %c0_i32_1 = arith.constant 0 : i32
    return %c0_i32, %c0_i32_0 : i32, i32
  }
  func.func @transform_6(%arg0: i32) -> (i32, i32) {
    %c0_i32 = arith.constant 0 : i32
    %c0_i32_0 = arith.constant 0 : i32
    %c0_i32_1 = arith.constant 0 : i32
    return %c0_i32, %c0_i32_0 : i32, i32
  }
  func.func @transform_7(%arg0: i32) -> (i32, i32) {
    %c0_i32 = arith.constant 0 : i32
    %c0_i32_0 = arith.constant 0 : i32
    %c0_i32_1 = arith.constant 0 : i32
    return %c0_i32, %c0_i32_0 : i32, i32
  }
  func.func @transform_8(%arg0: i32) -> (i32, i32) {
    %c0_i32 = arith.constant 0 : i32
    %c0_i32_0 = arith.constant 0 : i32
    %c0_i32_1 = arith.constant 0 : i32
    return %c0_i32, %c0_i32_0 : i32, i32
  }
  func.func @transform_9(%arg0: i32) -> (i32, i32) {
    %c0_i32 = arith.constant 0 : i32
    %c0_i32_0 = arith.constant 0 : i32
    %c0_i32_1 = arith.constant 0 : i32
    return %c0_i32, %c0_i32_0 : i32, i32
  }
  func.func @transform_10(%arg0: i32) -> (i32, i32) {
    %c0_i32 = arith.constant 0 : i32
    %c0_i32_0 = arith.constant 0 : i32
    %c0_i32_1 = arith.constant 0 : i32
    return %c0_i32, %c0_i32_0 : i32, i32
  }
  func.func @transform_11(%arg0: i32) -> (i32, i32) {
    %c0_i32 = arith.constant 0 : i32
    %c0_i32_0 = arith.constant 0 : i32
    %c0_i32_1 = arith.constant 0 : i32
    return %c0_i32, %c0_i32_0 : i32, i32
  }
  func.func @transform_12(%arg0: i32) -> (i32, i32, i32) {
    %c0_i32 = arith.constant 0 : i32
    %c0_i32_0 = arith.constant 0 : i32
    %c0_i32_1 = arith.constant 0 : i32
    return %arg0, %c0_i32, %c0_i32_0 : i32, i32, i32
  }
}

</mosaic_0001>

<bundles_post_ra>
// kernel: tpu_custom_call.1
= control target key start
LH: loop header
LB: loop body
LE: loop exit
PB: predicated region body
PF: predicated region fallthrough
CT: control target
= control target key end

     0   :  { %vm48_vm0 = vcmask 261120   ;;  %s9174_s0 = inlined_call_operand.vmem [shape: f32[2,16,32], index: 0, kind: input, shape index: {}]   ;;  %s9175_s1 = inlined_call_operand.vmem [shape: f32[1,32], index: 1, kind: input, shape index: {}]   ;;  %s9176_s2 = inlined_call_operand.vmem [shape: f32[1,32], index: 2, kind: input, shape index: {}]   ;;  %s9177_s3 = inlined_call_operand.vmem [shape: f32[32,32], index: 3, kind: input, shape index: {}]   ;;  %s9178_s4 = inlined_call_operand.vmem [shape: f32[32,64], index: 4, kind: input, shape index: {}]   ;;  %s9179_s5 = inlined_call_operand.vmem [shape: f32[32,16], index: 5, kind: input, shape index: {}]   ;;  %s9180_s6 = inlined_call_operand.vmem [shape: f32[1,32], index: 6, kind: input, shape index: {}]   ;;  %s9181_s7 = inlined_call_operand.vmem [shape: f32[1,32], index: 7, kind: input, shape index: {}]   ;;  %s9182_s8 = inlined_call_operand.vmem [shape: f32[32,128], index: 8, kind: input, shape index: {}]   ;;  %s9183_s9 = inlined_call_operand.vmem [shape: f32[1,128], index: 9, kind: input, shape index: {}]   ;;  %s9184_s10 = inlined_call_operand.vmem [shape: f32[128,32], index: 10, kind: input, shape index: {}]   ;;  %s9185_s11 = inlined_call_operand.vmem [shape: f32[1,32], index: 11, kind: input, shape index: {}]   ;;  %s9186_s12 = inlined_call_operand.hbm [shape: f32[2,16,32], index: 12, kind: output, shape index: {}]  }
   0x1   :  { %v42_v0 = vld [vmem:[%s9174_s0] sm:$0xff]  ;;  %v43_v1 = vld [vmem:[%s9174_s0 + $0x8] sm:$0xff] }
   0x2   :  { %17 = vsyncpa [#allocation4], 0  ;;  %v49_v2 = vsel %vm48_vm0, %v42_v0, 0.0  ;;  %v52_v3 = vsel %vm48_vm0, %v43_v1, 0.0  ;;  %v122_v14 = vld [vmem:[%s9177_s3] sm:$0xff]  ;;  %v123_v15 = vld [vmem:[%s9177_s3 + $0x8] sm:$0xff] }
   0x3   :  { %50 = vadd.xlane.f32.xlu0 %v49_v2  ;;  %v227_v16 = vld [vmem:[%s9179_s5] sm:$0xff]  ;;  %v6512_v17 = vpack.c.bf16 %v123_v15, %v122_v14  ;;  %v228_v18 = vld [vmem:[%s9179_s5 + $0x8] sm:$0xff]  ;;  %v124_v19 = vld [vmem:[%s9177_s3 + $0x10] sm:$0xff]  ;;  %vm511_vm1 = vcmask 64544   ;;  %vm318_vm2 = vcmask 31744   ;;  %vm710_vm3 = vcmask 97344  }
   0x4   :  { %v125_v20 = vld [vmem:[%s9177_s3 + $0x18] sm:$0xff]  ;;  %v6520_v21 = vpack.c.bf16 %v228_v18, %v227_v16  ;;  %v229_v23 = vld [vmem:[%s9179_s5 + $0x10] sm:$0xff]  ;;  %v7554_v37 = vld [vmem:[%s9175_s1] ss:$0 sm:$0xff]  ;;  %vm909_vm4 = vcmask 130144   ;;  %v316_v2 = vlaneseq  ;;  %s7413_s1 = smov 8  }
   0x5   :  { %v6516_v22 = vpack.c.bf16 %v125_v20, %v124_v19  ;;  %6513 = vmatprep.subr.bf16.mxu0 %v6512_v17  ;;  %v230_v24 = vld [vmem:[%s9179_s5 + $0x18] sm:$0xff]  ;;  %v7545_v27 = vld [vmem:[%s9174_s0 + $0x10] sm:$0xff]  ;;  %v7559_v39 = vld [vmem:[%s9176_s2] ss:$0 sm:$0xff]  ;;  %s7414_s2 = smov 4   ;;  %s7415_s29 = smov 12  }
   0x6   :  { %6521 = vmatprep.subr.bf16.mxu1 %v6520_v21  ;;  %6515 = vmatpush3.bf16.msra.mxu0 %v6512_v17  ;;  %v6524_v25 = vpack.c.bf16 %v230_v24, %v229_v23  ;;  %v7540_v26 = vld [vmem:[%s9174_s0 + $0x18] sm:$0xff]  ;;  %v55_v29 = vsel %vm48_vm0, %v7545_v27, 0.0  ;;  %s7418_s20 = smov 124   ;;  %s7419_s21 = smov 92  }
   0x7   :  { %53 = vadd.xlane.f32.xlu0 %v52_v3  ;;  %6523 = vmatpush3.bf16.msra.mxu1 %v6520_v21  ;;  %v58_v28 = vsel %vm48_vm0, %v7540_v26, 0.0  ;;  %v7607_v3 = vand.u32 127, %v316_v2  ;;  %s7420_s22 = smov 120   ;;  %s7421_s3 = smov 88  }
   0x8   :  { %6517 = vmatprep.subr.bf16.mxu0 %v6516_v22  ;;  %6525 = vmatprep.subr.bf16.mxu1 %v6524_v25  ;;  %s7422_s23 = smov 116   ;;  %s7423_s24 = smov 84  }
   0x9   :  { %s7424_s25 = smov 112   ;;  %s7425_s5 = smov 80  }
   0xa   :  { %6519 = vmatpush3.bf16.msra.mxu0 %v6516_v22  ;;  %s7426_s26 = smov 108   ;;  %s7427_s27 = smov 76  }
   0xb   :  { %6527 = vmatpush3.bf16.msra.mxu1 %v6524_v25  ;;  %56 = vadd.xlane.f32.xlu0 %v55_v29  ;;  %s7428_s28 = smov 104   ;;  %s7429_s30 = smov 72  }
   0xc   :  { %s7430_s13 = smov 100   ;;  %s7431_s14 = smov 68  }
   0xd   :  { %s7432_s15 = smov 20   ;;  %s7433_s16 = smov 24  }
   0xe   :  { %s7434_s17 = smov 16  }
  0x90   :  { %v51_v4 = vpop.xlane.xlu0 %50 }
  0x91   :  { %v62_v5 = vmul.f32 0.03125, %v51_v4 }
  0x93   :  { %v66_v6 = vsub.f32 %v42_v0, %v62_v5 }
  0x94   :  { %v54_v7 = vpop.xlane.xlu0 %53 }
  0x95   :  { %v63_v8 = vmul.f32 0.03125, %v54_v7  ;;  %v70_v9 = vmul.f32 %v66_v6, %v66_v6 }
  0x97   :  { %v67_v10 = vsub.f32 %v43_v1, %v63_v8  ;;  %v74_v11 = vsel %vm48_vm0, %v70_v9, 0.0 }
  0x98   :  { %75 = vadd.xlane.f32.xlu1 %v74_v11 }
  0x99   :  { %v71_v12 = vmul.f32 %v67_v10, %v67_v10 }
  0x9b   :  { %v77_v13 = vsel %vm48_vm0, %v71_v12, 0.0 }
  0x9c   :  { %78 = vadd.xlane.f32.xlu1 %v77_v13 }
  0xa0   :  { %59 = vadd.xlane.f32.xlu1 %v58_v28 }
 0x125   :  { %v76_v30 = vpop.xlane.xlu1 %75 }
 0x126   :  { %v86_v31 = vmul.f32 0.03125, %v76_v30 }
 0x128   :  { %v90_v32 = vadd.f32 1e-05, %v86_v31 }
 0x129   :  { %v79_v33 = vpop.xlane.xlu1 %78 }
 0x12a   :  { %7229 = vrsqrt.f32 %v90_v32  ;;  %v87_v34 = vmul.f32 0.03125, %v79_v33 }
 0x12c   :  { %v91_v35 = vadd.f32 1e-05, %v87_v34 }
 0x12d   :  { %v60_v4 = vpop.xlane.xlu1 %59 }
 0x12e   :  { %7231 = vrsqrt.f32 %v91_v35  ;;  %v65_v5 = vmul.f32 0.03125, %v60_v4 }
 0x134   :  { %v7230_v36 = vpop.eup %7229 }
 0x135   :  { %v98_v38 = vmul.f32 %v7230_v36, %v66_v6  ;;  %v7614_v6 = vsub.f32 %v7540_v26, %v65_v5 }
 0x137   :  { %v108_v40 = vmul.f32 %v7554_v37, %v98_v38  ;;  %v73_v7 = vmul.f32 %v7614_v6, %v7614_v6 }
 0x138   :  { %v7232_v41 = vpop.eup %7231 }
 0x139   :  { %v118_v42 = vadd.f32 %v7559_v39, %v108_v40  ;;  %v99_v43 = vmul.f32 %v7232_v41, %v67_v10  ;;  %v83_v9 = vsel %vm48_vm0, %v73_v7, 0.0  ;;  %v57_v10 = vpop.xlane.xlu0 %56 }
 0x13a   :  { %v64_v11 = vmul.f32 0.03125, %v57_v10 }
 0x13b   :  { %6048 = vmatprep.mubr.msk.f32.mxu0 %vm48_vm0, %v118_v42  ;;  %6062 = vmatprep.mubr.msk.f32.mxu1 %vm48_vm0, %v118_v42  ;;  %v109_v44 = vmul.f32 %v7554_v37, %v99_v43 }
 0x13c   :  { %v7624_v12 = vsub.f32 %v7545_v27, %v64_v11 }
 0x13d   :  { %v119_v45 = vadd.f32 %v7559_v39, %v109_v44 }
 0x13e   :  { %v72_v13 = vmul.f32 %v7624_v12, %v7624_v12 }
 0x13f   :  { %6049 = vmatmul.mubr.msk.f32.vlgmr.msra.gmra.mrb[0].mxu0 %vm48_vm0, %v119_v45  ;;  %6063 = vmatmul.mubr.msk.f32.vlgmr.msra.gmra.mrb[0].mxu1 %vm48_vm0, %v119_v45  ;;  %v6528_v46 = vpack.c.bf16 %v119_v45, %v118_v42 }
 0x140   :  { %v80_v14 = vsel %vm48_vm0, %v72_v13, 0.0 }
 0x141   :  { %6529 = vmatprep.subr.bf16.mxu0 %v6528_v46 }
 0x142   :  { %6531 = vmatpush3.bf16.msra.mxu0 %v6528_v46 }
 0x212   :  { %v7569_v47 = vpop.f32.mrb[0].mxu0  ;;  %v7571_v48 = vpop.f32.mrb[0].mxu1 }
 0x213   :  { %9196 = vst [vmem:[#allocation6_spill] sm:$0xff] %v7569_v47  ;;  %v7573_v49 = vpop.f32.mrb[1].mxu0  ;;  %v7575_v50 = vpop.f32.mrb[1].mxu1  ;;  %v527_v51 = vsel %vm511_vm1, %v7571_v48, inf  ;;  %v334_v52 = vsel %vm318_vm2, %v7571_v48, inf  ;;  %v515_v53 = vsel %vm511_vm1, %v7571_v48, -inf }
 0x214   :  { %9197 = vst [vmem:[#allocation7_spill] sm:$0xff] %v7573_v49  ;;  %528 = vmin.xlane.f32.xlu1 %v527_v51  ;;  %335 = vmin.xlane.f32.xlu0 %v334_v52  ;;  %v714_v54 = vsel %vm710_vm3, %v7571_v48, -inf  ;;  %v726_v55 = vsel %vm710_vm3, %v7571_v48, inf  ;;  %v925_v56 = vsel %vm909_vm4, %v7571_v48, inf  ;;  %v322_v57 = vsel %vm318_vm2, %v7571_v48, -inf }
 0x215   :  { %v524_v58 = vsel %vm511_vm1, %v7575_v50, inf  ;;  %v913_v59 = vsel %vm909_vm4, %v7571_v48, -inf  ;;  %v512_v60 = vsel %vm511_vm1, %v7575_v50, -inf  ;;  %v723_v61 = vsel %vm710_vm3, %v7575_v50, inf }
 0x216   :  { %v331_v62 = vsel %vm318_vm2, %v7575_v50, inf  ;;  %v711_v63 = vsel %vm710_vm3, %v7575_v50, -inf  ;;  %v319_v0 = vsel %vm318_vm2, %v7575_v50, -inf  ;;  %v922_v1 = vsel %vm909_vm4, %v7575_v50, inf }
 0x217   :  { %v910_v8 = vsel %vm909_vm4, %v7575_v50, -inf }
 0x218   :  { %516 = vmax.xlane.f32.xlu1 %v515_v53  ;;  %715 = vmax.xlane.f32.xlu0 %v714_v54 }
 0x21c   :  { %727 = vmin.xlane.f32.xlu1 %v726_v55  ;;  %926 = vmin.xlane.f32.xlu0 %v925_v56 }
 0x220   :  { %323 = vmax.xlane.f32.xlu1 %v322_v57  ;;  %525 = vmin.xlane.f32.xlu0 %v524_v58 }
 0x224   :  { %914 = vmax.xlane.f32.xlu1 %v913_v59  ;;  %513 = vmax.xlane.f32.xlu0 %v512_v60 }
 0x228   :  { %724 = vmin.xlane.f32.xlu0 %v723_v61  ;;  %332 = vmin.xlane.f32.xlu1 %v331_v62 }
 0x22c   :  { %712 = vmax.xlane.f32.xlu0 %v711_v63  ;;  %320 = vmax.xlane.f32.xlu1 %v319_v0 }
 0x230   :  { %923 = vmin.xlane.f32.xlu0 %v922_v1 }
 0x23d   :  { %739 = vrot.lane.b32.xlu1 %v7607_v3, %s7413_s1 }
 0x246   :  { %540 = vrot.lane.b32.xlu0 %v7607_v3, %s7414_s2 }
 0x261   :  { %911 = vmax.xlane.f32.xlu1 %v910_v8 }
 0x265   :  { %84 = vadd.xlane.f32.xlu0 %v83_v9 }
 0x272   :  { %938 = vrot.lane.b32.xlu1 %v7607_v3, %s7415_s29 }
 0x296   :  { %81 = vadd.xlane.f32.xlu1 %v80_v14 }
 0x2a1   :  { %v7629_v15 = vpop.xlane.xlu1 %528  ;;  %v7631_v16 = vpop.xlane.xlu0 %335 }
 0x2a2   :  { %vm412_vm5 = vcmp.eq.f32.partialorder %v7571_v48, %v7631_v16  ;;  %vm607_vm8 = vcmp.eq.f32.partialorder %v7571_v48, %v7629_v15 }
 0x2a3   :  { %v416_v17 = vsel %vm412_vm5, %v7607_v3, 4 }
 0x2a4   :  { %v7637_v18 = vsel %vm318_vm2, %v416_v17, 2147483647 }
 0x2a5   :  { %v7639_v19 = vpop.xlane.xlu1 %516  ;;  %v7641_v20 = vpop.xlane.xlu0 %715  ;;  %v436_v21 = vshra.s32 %v7637_v18, 16 }
 0x2a6   :  { %vm736_vm6 = vcmp.eq.f32.partialorder %v7571_v48, %v7641_v20  ;;  %vm537_vm9 = vcmp.eq.f32.partialorder %v7571_v48, %v7639_v19 }
 0x2a7   :  { %v7644_v22 = vcvt.s32.f32 %v436_v21 }
 0x2a9   :  { %v7646_v23 = vpop.xlane.xlu1 %727  ;;  %439 = vmin.xlane.f32.xlu1 %v7644_v22  ;;  %v7649_v24 = vpop.xlane.xlu0 %926 }
 0x2aa   :  { %9198 = vst [vmem:[#allocation8_spill] sm:$0xff] %v7649_v24  ;;  %vm806_vm10 = vcmp.eq.f32.partialorder %v7571_v48, %v7646_v23 }
 0x2ad   :  { %v7651_v25 = vpop.xlane.xlu1 %323  ;;  %v7653_v26 = vpop.xlane.xlu0 %525 }
 0x2ae   :  { %vm344_vm13 = vcmp.eq.f32.partialorder %v7571_v48, %v7651_v25  ;;  %vm606_vm14 = vcmp.eq.f32.partialorder %v7575_v50, %v7653_v26 }
 0x2af   :  { %v348_v0 = vsel %vm344_vm13, %v7607_v3, 4 }
 0x2b0   :  { %v7741_v7 = vsel %vm318_vm2, %v348_v0, 2147483647 }
 0x2b1   :  { %v7655_v27 = vpop.xlane.xlu1 %914  ;;  %v7657_v28 = vpop.xlane.xlu0 %513  ;;  %v368_v11 = vshra.s32 %v7741_v7, 16 }
 0x2b2   :  { %9199 = vst [vmem:[#allocation9_spill] sm:$0xff] %v7655_v27  ;;  %vm536_vm11 = vcmp.eq.f32.partialorder %v7575_v50, %v7657_v28 }
 0x2b3   :  { %v7761_v17 = vcvt.s32.f32 %v368_v11 }
 0x2b5   :  { %v7659_v29 = vpop.xlane.xlu1 %332  ;;  %v7661_v30 = vpop.xlane.xlu0 %724 }
 0x2b6   :  { %vm805_vm7 = vcmp.eq.f32.partialorder %v7575_v50, %v7661_v30  ;;  %vm411_vm15 = vcmp.eq.f32.partialorder %v7575_v50, %v7659_v29 }
 0x2b7   :  { %v415_v14 = vsel %vm411_vm15, %v7607_v3, 4 }
 0x2b9   :  { %v7663_v31 = vpop.xlane.xlu1 %320  ;;  %v7665_v32 = vpop.xlane.xlu0 %712 }
 0x2ba   :  { %vm735_vm12 = vcmp.eq.f32.partialorder %v7575_v50, %v7665_v32  ;;  %vm343_vm5 = vcmp.eq.f32.partialorder %v7575_v50, %v7663_v31 }
 0x2bd   :  { %v7671_v33 = vpop.permute.xlu1 %739  ;;  %v7673_v34 = vpop.xlane.xlu0 %923 }
 0x2be   :  { %9200 = vst [vmem:[#allocation10_spill] sm:$0xff] %v7671_v33  ;;  %v742_v35 = vsel %vm736_vm6, %v7671_v33, 4  ;;  %v809_v36 = vsel %vm805_vm7, %v7671_v33, 4  ;;  %v810_v56 = vsel %vm806_vm10, %v7671_v33, 4  ;;  %v741_v57 = vsel %vm735_vm12, %v7671_v33, 4 }
 0x2bf   :  { %v7678_v38 = vsel %vm710_vm3, %v742_v35, 2147483647  ;;  %v7692_v42 = vsel %vm710_vm3, %v809_v36, 2147483647  ;;  %v7724_v62 = vsel %vm710_vm3, %v810_v56, 2147483647  ;;  %vm935_vm6 = vcmp.eq.f32.partialorder %v7571_v48, %v7655_v27 }
 0x2c0   :  { %v762_v40 = vshra.s32 %v7678_v38, 16  ;;  %v815_v61 = vshra.s32 %v7692_v42, 16  ;;  %v7727_v63 = vsel %vm710_vm3, %v741_v57, 2147483647  ;;  %v830_v4 = vshra.s32 %v7724_v62, 16 }
 0x2c1   :  { %v7689_v41 = vpop.permute.xlu0 %540  ;;  %v747_v5 = vshra.s32 %v7727_v63, 16  ;;  %v7765_v35 = vsel %vm318_vm2, %v415_v14, 2147483647  ;;  %v347_v36 = vsel %vm343_vm5, %v7607_v3, 4  ;;  %vm1004_vm7 = vcmp.eq.f32.partialorder %v7575_v50, %v7673_v34 }
 0x2c2   :  { %9201 = vst [vmem:[#allocation11_spill] sm:$0xff] %v7689_v41  ;;  %v7694_v43 = vcvt.s32.f32 %v762_v40  ;;  %v611_v44 = vsel %vm607_vm8, %v7689_v41, 4  ;;  %v542_v45 = vsel %vm536_vm11, %v7689_v41, 4  ;;  %v543_v46 = vsel %vm537_vm9, %v7689_v41, 4 }
 0x2c3   :  { %v7702_v51 = vsel %vm511_vm1, %v611_v44, 2147483647  ;;  %v7705_v52 = vsel %vm511_vm1, %v542_v45, 2147483647  ;;  %v7708_v53 = vsel %vm511_vm1, %v543_v46, 2147483647  ;;  %v7734_v2 = vcvt.s32.f32 %v815_v61 }
 0x2c4   :  { %765 = vmin.xlane.f32.xlu1 %v7694_v43  ;;  %v631_v54 = vshra.s32 %v7702_v51, 16  ;;  %v548_v55 = vshra.s32 %v7705_v52, 16  ;;  %v563_v60 = vshra.s32 %v7708_v53, 16  ;;  %v610_v8 = vsel %vm606_vm14, %v7689_v41, 4 }
 0x2c5   :  { %v7748_v9 = vcvt.s32.f32 %v830_v4  ;;  %v7750_v10 = vcvt.s32.f32 %v747_v5  ;;  %v7754_v13 = vsel %vm511_vm1, %v610_v8, 2147483647  ;;  %v421_v44 = vshra.s32 %v7765_v35, 16 }
 0x2c6   :  { %v7717_v58 = vcvt.s32.f32 %v631_v54  ;;  %v7719_v59 = vcvt.s32.f32 %v548_v55  ;;  %v7732_v1 = vcvt.s32.f32 %v563_v60  ;;  %v616_v21 = vshra.s32 %v7754_v13, 16 }
 0x2c7   :  { %v7773_v45 = vsel %vm318_vm2, %v347_v36, 2147483647  ;;  %v7776_v46 = vcvt.s32.f32 %v421_v44  ;;  %vm1005_vm9 = vcmp.eq.f32.partialorder %v7571_v48, %v7649_v24 }
 0x2c8   :  { %634 = vmin.xlane.f32.xlu0 %v7717_v58  ;;  %551 = vmin.xlane.f32.xlu1 %v7719_v59  ;;  %v7769_v40 = vcvt.s32.f32 %v616_v21  ;;  %v353_v54 = vshra.s32 %v7773_v45, 16 }
 0x2ca   :  { %v7780_v55 = vcvt.s32.f32 %v353_v54 }
 0x2cc   :  { %566 = vmin.xlane.f32.xlu0 %v7732_v1  ;;  %818 = vmin.xlane.f32.xlu1 %v7734_v2 }
 0x2d0   :  { %833 = vmin.xlane.f32.xlu0 %v7748_v9  ;;  %750 = vmin.xlane.f32.xlu1 %v7750_v10 }
 0x2d4   :  { %371 = vmin.xlane.f32.xlu0 %v7761_v17 }
 0x2d8   :  { %619 = vmin.xlane.f32.xlu0 %v7769_v40 }
 0x2dc   :  { %424 = vmin.xlane.f32.xlu0 %v7776_v46 }
 0x2e0   :  { %356 = vmin.xlane.f32.xlu0 %v7780_v55 }
 0x2ee   :  { %v7783_v56 = vpop.xlane.xlu1 %911 }
 0x2ef   :  { %9202 = vst [vmem:[#allocation12_spill] sm:$0xff] %v7783_v56  ;;  %vm934_vm8 = vcmp.eq.f32.partialorder %v7575_v50, %v7783_v56 }
 0x2f2   :  { %v7791_v57 = vpop.permute.xlu1 %938 }
 0x2f3   :  { %9203 = vst [vmem:[#allocation13_spill] sm:$0xff] %v7791_v57  ;;  %v940_v60 = vsel %vm934_vm8, %v7791_v57, 4  ;;  %v1008_v61 = vsel %vm1004_vm7, %v7791_v57, 4  ;;  %v941_v0 = vsel %vm935_vm6, %v7791_v57, 4  ;;  %v1009_v14 = vsel %vm1005_vm9, %v7791_v57, 4 }
 0x2f4   :  { %v7797_v4 = vsel %vm909_vm4, %v940_v60, 2147483647  ;;  %v7800_v5 = vsel %vm909_vm4, %v1008_v61, 2147483647  ;;  %v7803_v8 = vsel %vm909_vm4, %v941_v0, 2147483647  ;;  %v85_v0 = vpop.xlane.xlu0 %84 }
 0x2f5   :  { %v946_v50 = vshra.s32 %v7797_v4, 16  ;;  %v1014_v11 = vshra.s32 %v7800_v5, 16  ;;  %v961_v44 = vshra.s32 %v7803_v8, 16  ;;  %v7816_v54 = vsel %vm909_vm4, %v1009_v14, 2147483647 }
 0x2f6   :  { %v1029_v48 = vshra.s32 %v7816_v54, 16 }
 0x2f7   :  { %v7810_v21 = vcvt.s32.f32 %v946_v50  ;;  %v7812_v36 = vcvt.s32.f32 %v1014_v11  ;;  %v7821_v60 = vcvt.s32.f32 %v961_v44  ;;  %v89_v50 = vmul.f32 0.03125, %v85_v0 }
 0x2f8   :  { %v7823_v61 = vcvt.s32.f32 %v1029_v48  ;;  %v435_v44 = vand.u32 65535, %v7637_v18 }
 0x2f9   :  { %949 = vmin.xlane.f32.xlu0 %v7810_v21  ;;  %1017 = vmin.xlane.f32.xlu1 %v7812_v36  ;;  %v93_v11 = vadd.f32 1e-05, %v89_v50 }
 0x2fa   :  { %v437_v0 = vcvt.s32.f32 %v435_v44 }
 0x2fb   :  { %7233 = vrsqrt.f32 %v93_v11 }
 0x2fd   :  { %964 = vmin.xlane.f32.xlu0 %v7821_v60  ;;  %1032 = vmin.xlane.f32.xlu1 %v7823_v61 }
 0x305   :  { %v7234_v57 = vpop.eup %7233 }
 0x306   :  { %v101_v33 = vmul.f32 %v7234_v57, %v7614_v6 }
 0x308   :  { %v111_v27 = vmul.f32 %v7554_v37, %v101_v33  ;;  %v562_v33 = vand.u32 65535, %v7708_v53  ;;  %v367_v53 = vand.u32 65535, %v7741_v7 }
 0x30a   :  { %v564_v57 = vcvt.s32.f32 %v562_v33 }
 0x323   :  { %v82_v14 = vpop.xlane.xlu1 %81 }
 0x324   :  { %v88_v47 = vmul.f32 0.03125, %v82_v14 }
 0x326   :  { %v92_v49 = vadd.f32 1e-05, %v88_v47  ;;  %v121_v47 = vadd.f32 %v7559_v39, %v111_v27 }
 0x328   :  { %7235 = vrsqrt.f32 %v92_v49 }
 0x332   :  { %v7236_v41 = vpop.eup %7235 }
 0x333   :  { %v100_v48 = vmul.f32 %v7236_v41, %v7624_v12 }
 0x335   :  { %v110_v24 = vmul.f32 %v7554_v37, %v100_v48  ;;  %v761_v37 = vand.u32 65535, %v7678_v38 }
 0x336   :  { %v7832_v56 = vpop.xlane.xlu1 %439 }
 0x337   :  { %v120_v50 = vadd.f32 %v7559_v39, %v110_v24  ;;  %vm441_vm10 = vcmp.eq.f32.partialorder %v7644_v22, %v7832_v56  ;;  %v763_v18 = vcvt.s32.f32 %v761_v37  ;;  %v630_v39 = vand.u32 65535, %v7702_v51 }
 0x338   :  { %v442_v49 = vsel %vm441_vm10, %v437_v0, inf  ;;  %v829_v51 = vand.u32 65535, %v7724_v62  ;;  %v369_v62 = vcvt.s32.f32 %v367_v53  ;;  %v615_v0 = vand.u32 65535, %v7754_v13 }
 0x339   :  { %6051 = vmatprep.mubr.msk.f32.mxu0 %vm48_vm0, %v120_v50  ;;  %6065 = vmatprep.mubr.msk.f32.mxu1 %vm48_vm0, %v120_v50  ;;  %v6532_v6 = vpack.c.bf16 %v121_v47, %v120_v50  ;;  %v632_v27 = vcvt.s32.f32 %v630_v39  ;;  %v960_v53 = vand.u32 65535, %v7803_v8 }
 0x33a   :  { %443 = vmin.xlane.f32.xlu1 %v442_v49  ;;  %6052 = vmatmul.mubr.msk.f32.gmra.mrb[2].mxu0 %vm48_vm0, %v121_v47  ;;  %v831_v14 = vcvt.s32.f32 %v829_v51  ;;  %v617_v7 = vcvt.s32.f32 %v615_v0 }
 0x33b   :  { %6066 = vmatmul.mubr.msk.f32.gmra.mrb[2].mxu1 %vm48_vm0, %v121_v47  ;;  %6533 = vmatprep.subr.bf16.mxu1 %v6532_v6  ;;  %v547_v47 = vand.u32 65535, %v7705_v52  ;;  %v352_v52 = vand.u32 65535, %v7773_v45  ;;  %v962_v0 = vcvt.s32.f32 %v960_v53 }
 0x33c   :  { %6535 = vmatpush3.bf16.msra.mxu1 %v6532_v6 }
 0x351   :  { %v7843_v12 = vpop.xlane.xlu1 %765 }
 0x352   :  { %vm767_vm11 = vcmp.eq.f32.partialorder %v7694_v43, %v7843_v12 }
 0x353   :  { %v768_v22 = vsel %vm767_vm11, %v763_v18, inf  ;;  %v814_v18 = vand.u32 65535, %v7692_v42  ;;  %v746_v42 = vand.u32 65535, %v7727_v63 }
 0x354   :  { %769 = vmin.xlane.f32.xlu1 %v768_v22 }
 0x355   :  { %v7848_v24 = vpop.xlane.xlu0 %634  ;;  %v7863_v44 = vpop.xlane.xlu1 %551  ;;  %v816_v22 = vcvt.s32.f32 %v814_v18  ;;  %v748_v33 = vcvt.s32.f32 %v746_v42 }
 0x356   :  { %vm636_vm12 = vcmp.eq.f32.partialorder %v7717_v58, %v7848_v24  ;;  %vm553_vm6 = vcmp.eq.f32.partialorder %v7719_v59, %v7863_v44 }
 0x357   :  { %v637_v41 = vsel %vm636_vm12, %v632_v27, inf  ;;  %v354_v27 = vcvt.s32.f32 %v352_v52  ;;  %v675_v52 = vsub.f32 0.0, %v7629_v15 }
 0x358   :  { %638 = vmin.xlane.f32.xlu0 %v637_v41  ;;  %v1013_v41 = vand.u32 65535, %v7800_v5 }
 0x359   :  { %v7853_v38 = vpop.xlane.xlu0 %566  ;;  %v7876_v49 = vpop.xlane.xlu1 %818 }
 0x35a   :  { %vm568_vm13 = vcmp.eq.f32.partialorder %v7732_v1, %v7853_v38  ;;  %vm820_vm8 = vcmp.eq.f32.partialorder %v7734_v2, %v7876_v49 }
 0x35b   :  { %v569_v43 = vsel %vm568_vm13, %v564_v57, inf  ;;  %v821_v45 = vsel %vm820_vm8, %v816_v22, inf  ;;  %v945_v57 = vand.u32 65535, %v7797_v4 }
 0x35c   :  { %570 = vmin.xlane.f32.xlu0 %v569_v43  ;;  %v1015_v43 = vcvt.s32.f32 %v1013_v41 }
 0x35d   :  { %v7858_v11 = vpop.xlane.xlu0 %833  ;;  %v7888_v39 = vpop.xlane.xlu1 %750 }
 0x35e   :  { %vm835_vm14 = vcmp.eq.f32.partialorder %v7748_v9, %v7858_v11  ;;  %v420_v9 = vand.u32 65535, %v7765_v35  ;;  %vm752_vm10 = vcmp.eq.f32.partialorder %v7750_v10, %v7888_v39 }
 0x35f   :  { %v836_v58 = vsel %vm835_vm14, %v831_v14, inf  ;;  %v753_v2 = vsel %vm752_vm10, %v748_v33, inf  ;;  %v1028_v14 = vand.u32 65535, %v7816_v54 }
 0x360   :  { %837 = vmin.xlane.f32.xlu0 %v836_v58  ;;  %v422_v37 = vcvt.s32.f32 %v420_v9 }
 0x361   :  { %v7865_v48 = vpop.xlane.xlu0 %371 }
 0x362   :  { %vm373_vm15 = vcmp.eq.f32.partialorder %v7761_v17, %v7865_v48  ;;  %v549_v17 = vcvt.s32.f32 %v547_v47 }
 0x363   :  { %v374_v1 = vsel %vm373_vm15, %v369_v62, inf  ;;  %v1030_v62 = vcvt.s32.f32 %v1028_v14  ;;  %vm679_vm15 = vcmp.ge.f32.partialorder %v7639_v19, %v675_v52  ;;  %v480_v19 = vsub.f32 0.0, %v7631_v16 }
 0x364   :  { %375 = vmin.xlane.f32.xlu0 %v374_v1  ;;  %v554_v35 = vsel %vm553_vm6, %v549_v17, inf  ;;  %v446_v17 = vcvt.f32.s32 %v7832_v56  ;;  %v378_v56 = vcvt.f32.s32 %v7865_v48 }
 0x365   :  { %v7870_v50 = vpop.xlane.xlu0 %619  ;;  %vm484_vm6 = vcmp.ge.f32.partialorder %v7651_v25, %v480_v19 }
 0x366   :  { %vm621_vm5 = vcmp.eq.f32.partialorder %v7769_v40, %v7870_v50 }
 0x367   :  { %v622_v6 = vsel %vm621_vm5, %v617_v7, inf  ;;  %v573_v7 = vcvt.f32.s32 %v7853_v38  ;;  %v447_v38 = vshll.u32 %v446_v17, 16 }
 0x368   :  { %623 = vmin.xlane.f32.xlu1 %v622_v6 }
 0x369   :  { %v7880_v13 = vpop.xlane.xlu0 %424  ;;  %v574_v18 = vshll.u32 %v573_v7, 16 }
 0x36a   :  { %vm426_vm7 = vcmp.eq.f32.partialorder %v7776_v46, %v7880_v13  ;;  %v431_v17 = vcvt.f32.s32 %v7880_v13 }
 0x36b   :  { %v427_v40 = vsel %vm426_vm7, %v422_v37, inf }
 0x36c   :  { %555 = vmin.xlane.f32.xlu1 %v554_v35  ;;  %428 = vmin.xlane.f32.xlu0 %v427_v40  ;;  %v772_v40 = vcvt.f32.s32 %v7843_v12 }
 0x36d   :  { %v7890_v59 = vpop.xlane.xlu0 %356 }
 0x36e   :  { %vm358_vm9 = vcmp.eq.f32.partialorder %v7780_v55, %v7890_v59  ;;  %v947_v55 = vcvt.s32.f32 %v945_v57  ;;  %v773_v41 = vshll.u32 %v772_v40, 16  ;;  %v363_v40 = vcvt.f32.s32 %v7890_v59 }
 0x36f   :  { %v359_v46 = vsel %vm358_vm9, %v354_v27, inf }
 0x370   :  { %822 = vmin.xlane.f32.xlu1 %v821_v45  ;;  %360 = vmin.xlane.f32.xlu0 %v359_v46 }
 0x374   :  { %754 = vmin.xlane.f32.xlu1 %v753_v2  ;;  %v874_v2 = vsub.f32 0.0, %v7646_v23 }
 0x376   :  { %vm878_vm5 = vcmp.ge.f32.partialorder %v7641_v20, %v874_v2 }
 0x386   :  { %v7899_v51 = vpop.xlane.xlu1 %1017  ;;  %v7901_v63 = vpop.xlane.xlu0 %949 }
 0x387   :  { %vm1019_vm11 = vcmp.eq.f32.partialorder %v7812_v36, %v7899_v51  ;;  %vm951_vm12 = vcmp.eq.f32.partialorder %v7810_v21, %v7901_v63  ;;  %v641_v21 = vcvt.f32.s32 %v7848_v24 }
 0x388   :  { %v1020_v10 = vsel %vm1019_vm11, %v1015_v43, inf  ;;  %v952_v5 = vsel %vm951_vm12, %v947_v55, inf  ;;  %v379_v55 = vshll.u32 %v378_v56, 16 }
 0x389   :  { %1021 = vmin.xlane.f32.xlu1 %v1020_v10  ;;  %953 = vmin.xlane.f32.xlu0 %v952_v5  ;;  %v642_v1 = vshll.u32 %v641_v21, 16 }
 0x38a   :  { %v7909_v4 = vpop.xlane.xlu1 %1032  ;;  %v7911_v58 = vpop.xlane.xlu0 %964 }
 0x38b   :  { %vm1034_vm13 = vcmp.eq.f32.partialorder %v7823_v61, %v7909_v4  ;;  %vm966_vm14 = vcmp.eq.f32.partialorder %v7821_v60, %v7911_v58  ;;  %v840_v61 = vcvt.f32.s32 %v7858_v11 }
 0x38c   :  { %v1035_v8 = vsel %vm1034_vm13, %v1030_v62, inf  ;;  %v967_v36 = vsel %vm966_vm14, %v962_v0, inf }
 0x38d   :  { %1036 = vmin.xlane.f32.xlu1 %v1035_v8  ;;  %968 = vmin.xlane.f32.xlu0 %v967_v36  ;;  %v841_v42 = vshll.u32 %v840_v61, 16  ;;  %v7416_v36 = vmov 0.0  }
 0x3c7   :  { %v444_v9 = vpop.xlane.xlu1 %443 }
 0x3c8   :  { %v445_v24 = vcvt.f32.s32 %v444_v9  ;;  %v825_v9 = vcvt.f32.s32 %v7876_v49  ;;  %v432_v49 = vshll.u32 %v431_v17, 16 }
 0x3ca   :  { %v448_v15 = vadd.s32 %v447_v38, %v445_v24 }
 0x3cc   :  { %v488_v5 = vadd.s32 4, %v448_v15 }
 0x3e1   :  { %v770_v35 = vpop.xlane.xlu1 %769 }
 0x3e2   :  { %v771_v46 = vcvt.f32.s32 %v770_v35 }
 0x3e4   :  { %v774_v14 = vadd.s32 %v773_v41, %v771_v46 }
 0x3e5   :  { %v639_v54 = vpop.xlane.xlu0 %638 }
 0x3e6   :  { %v640_v47 = vcvt.f32.s32 %v639_v54 }
 0x3e8   :  { %v643_v6 = vadd.s32 %v642_v1, %v640_v47 }
 0x3e9   :  { %v571_v37 = vpop.xlane.xlu0 %570 }
 0x3ea   :  { %v572_v60 = vcvt.f32.s32 %v571_v37  ;;  %v683_v22 = vadd.s32 4, %v643_v6  ;;  %v626_v6 = vcvt.f32.s32 %v7870_v50  ;;  %v558_v37 = vcvt.f32.s32 %v7863_v44 }
 0x3eb   :  { %v364_v44 = vshll.u32 %v363_v40, 16 }
 0x3ec   :  { %v575_v27 = vadd.s32 %v574_v18, %v572_v60  ;;  %v757_v18 = vcvt.f32.s32 %v7888_v39  ;;  %v559_v50 = vshll.u32 %v558_v37, 16 }
 0x3ed   :  { %v838_v45 = vpop.xlane.xlu0 %837 }
 0x3ee   :  { %v687_v11 = vsel %vm679_vm15, %v575_v27, %v683_v22  ;;  %v839_v33 = vcvt.f32.s32 %v838_v45  ;;  %v826_v22 = vshll.u32 %v825_v9, 16  ;;  %v627_v27 = vshll.u32 %v626_v6, 16 }
 0x3ef   :  { %v691_v43 = vadd.s32 8, %v687_v11  ;;  %v758_v56 = vshll.u32 %v757_v18, 16  ;;  %v9206_v18 = vld [vmem:[#allocation12_spill] sm:$0xff] }
 0x3f0   :  { %v842_v57 = vadd.s32 %v841_v42, %v839_v33 }
 0x3f1   :  { %v376_v12 = vpop.xlane.xlu0 %375  ;;  %vm695_vm7 = vcmp.eq.s32.totalorder %v7607_v3, %v691_v43  ;;  %v873_v43 = vsub.f32 0.0, %v7661_v30 }
 0x3f2   :  { %v882_v53 = vadd.s32 4, %v842_v57  ;;  %v377_v10 = vcvt.f32.s32 %v376_v12  ;;  %v5617_v16 = vsel %vm695_vm7, 1.0, %v7416_v36  ;;  %v674_v57 = vsub.f32 0.0, %v7653_v26 }
 0x3f3   :  { %vm877_vm11 = vcmp.ge.f32.partialorder %v7665_v32, %v873_v43  ;;  %v1024_v26 = vcvt.f32.s32 %v7899_v51  ;;  %v1039_v32 = vcvt.f32.s32 %v7909_v4 }
 0x3f4   :  { %v886_v48 = vsel %vm878_vm5, %v774_v14, %v882_v53  ;;  %v380_v62 = vadd.s32 %v379_v55, %v377_v10  ;;  %v479_v14 = vsub.f32 0.0, %v7659_v29  ;;  %vm678_vm10 = vcmp.ge.f32.partialorder %v7657_v28, %v674_v57 }
 0x3f5   :  { %v890_v0 = vadd.s32 16, %v886_v48  ;;  %v624_v8 = vpop.xlane.xlu1 %623  ;;  %v956_v28 = vcvt.f32.s32 %v7901_v63  ;;  %v1040_v4 = vshll.u32 %v1039_v32, 16  ;;  %v9209_v32 = vld [vmem:[#allocation11_spill] sm:$0xff] }
 0x3f6   :  { %v492_v23 = vsel %vm484_vm6, %v380_v62, %v488_v5  ;;  %v625_v60 = vcvt.f32.s32 %v624_v8  ;;  %vm7959_vm12 = vcmp.ge.f32.partialorder %v7663_v31, %v479_v14 }
 0x3f7   :  { %vm496_vm8 = vcmp.eq.s32.totalorder %v7607_v3, %v492_v23  ;;  %vm894_vm9 = vcmp.eq.s32.totalorder %v7607_v3, %v890_v0  ;;  %v957_v63 = vshll.u32 %v956_v28, 16 }
 0x3f8   :  { %v5613_v21 = vsel %vm496_vm8, 1.0, %v7416_v36  ;;  %v5621_v54 = vsel %vm894_vm9, 1.0, %v7416_v36  ;;  %v628_v13 = vadd.s32 %v627_v27, %v625_v60 }
 0x3f9   :  { %v707_v20 = vadd.f32 %v5617_v16, %v5613_v21  ;;  %v556_v25 = vpop.xlane.xlu1 %555  ;;  %v429_v47 = vpop.xlane.xlu0 %428  ;;  %v1025_v21 = vshll.u32 %v1024_v26, 16 }
 0x3fa   :  { %v430_v24 = vcvt.f32.s32 %v429_v47  ;;  %v557_v38 = vcvt.f32.s32 %v556_v25  ;;  %v682_v53 = vadd.s32 4, %v628_v13  ;;  %v1072_v25 = vsub.f32 0.0, %v7673_v34 }
 0x3fb   :  { %v7935_v1 = vadd.f32 %v5621_v54, %v707_v20  ;;  %v971_v20 = vcvt.f32.s32 %v7911_v58 }
 0x3fc   :  { %v433_v39 = vadd.s32 %v432_v49, %v430_v24  ;;  %v560_v59 = vadd.s32 %v559_v50, %v557_v38  ;;  %vm1076_vm5 = vcmp.ge.f32.partialorder %v9206_v18, %v1072_v25  ;;  %v9208_v50 = vld [vmem:[#allocation9_spill] sm:$0xff] }
 0x3fd   :  { %v823_v7 = vpop.xlane.xlu1 %822  ;;  %v361_v35 = vpop.xlane.xlu0 %360  ;;  %v972_v60 = vshll.u32 %v971_v20, 16 }
 0x3fe   :  { %v824_v52 = vcvt.f32.s32 %v823_v7  ;;  %v362_v45 = vcvt.f32.s32 %v361_v35  ;;  %v487_v19 = vadd.s32 4, %v433_v39  ;;  %v686_v30 = vsel %vm678_vm10, %v560_v59, %v682_v53 }
 0x3ff   :  { %v690_v0 = vadd.s32 8, %v686_v30  ;;  %vm1158_vm10 = vcmask 130048  }
 0x400   :  { %v827_v46 = vadd.s32 %v826_v22, %v824_v52  ;;  %v365_v12 = vadd.s32 %v364_v44, %v362_v45  ;;  %v9207_v22 = vld [vmem:[#allocation8_spill] sm:$0xff] }
 0x401   :  { %v755_v61 = vpop.xlane.xlu1 %754  ;;  %vm694_vm14 = vcmp.eq.s32.totalorder %v7607_v3, %v690_v0  ;;  %v1073_v27 = vsub.f32 0.0, %v9207_v22 }
 0x402   :  { %v756_v42 = vcvt.f32.s32 %v755_v61  ;;  %v881_v10 = vadd.s32 4, %v827_v46  ;;  %v491_v29 = vsel %vm7959_vm12, %v365_v12, %v487_v19  ;;  %v5616_v35 = vsel %vm694_vm14, 1.0, %v7416_v36 }
 0x403   :  { %vm495_vm13 = vcmp.eq.s32.totalorder %v7607_v3, %v491_v29  ;;  %vm1077_vm6 = vcmp.ge.f32.partialorder %v9208_v50, %v1073_v27 }
 0x404   :  { %v759_v41 = vadd.s32 %v758_v56, %v756_v42  ;;  %v5612_v6 = vsel %vm495_vm13, 1.0, %v7416_v36 }
 0x405   :  { %v706_v38 = vadd.f32 %v5616_v35, %v5612_v6  ;;  %v9210_v35 = vld [vmem:[#allocation10_spill] sm:$0xff] }
 0x406   :  { %v885_v48 = vsel %vm877_vm11, %v759_v41, %v881_v10 }
 0x407   :  { %v889_v8 = vadd.s32 16, %v885_v48 }
 0x409   :  { %vm893_vm15 = vcmp.eq.s32.totalorder %v7607_v3, %v889_v8 }
 0x40a   :  { %v5620_v40 = vsel %vm893_vm15, 1.0, %v7416_v36 }
 0x40b   :  { %v905_v13 = vadd.f32 %v5620_v40, %v706_v38 }
 0x40d   :  { %v7943_v11 = vpop.f32.mrb[2].mxu0 }
 0x40e   :  { %v7945_v33 = vpop.f32.mrb[2].mxu1  ;;  %v7947_v2 = vpop.f32.mrb[3].mxu0 }
 0x40f   :  { %v7949_v15 = vpop.f32.mrb[3].mxu1  ;;  %v533_v34 = vsel %vm511_vm1, %v7945_v33, inf  ;;  %v521_v10 = vsel %vm511_vm1, %v7945_v33, -inf  ;;  %v328_v26 = vsel %vm318_vm2, %v7945_v33, -inf  ;;  %v720_v30 = vsel %vm710_vm3, %v7945_v33, -inf }
 0x410   :  { %v530_v55 = vsel %vm511_vm1, %v7949_v15, inf  ;;  %v337_v62 = vsel %vm318_vm2, %v7949_v15, inf  ;;  %v518_v54 = vsel %vm511_vm1, %v7949_v15, -inf  ;;  %v729_v56 = vsel %vm710_vm3, %v7949_v15, inf }
 0x411   :  { %531 = vmin.xlane.f32.xlu0 %v530_v55  ;;  %v325_v41 = vsel %vm318_vm2, %v7949_v15, -inf  ;;  %v340_v55 = vsel %vm318_vm2, %v7945_v33, inf  ;;  %v717_v19 = vsel %vm710_vm3, %v7949_v15, -inf  ;;  %v928_v5 = vsel %vm909_vm4, %v7949_v15, inf }
 0x412   :  { %v931_v48 = vsel %vm909_vm4, %v7945_v33, inf  ;;  %v919_v29 = vsel %vm909_vm4, %v7945_v33, -inf }
 0x415   :  { %338 = vmin.xlane.f32.xlu0 %v337_v62  ;;  %v916_v62 = vsel %vm909_vm4, %v7949_v15, -inf }
 0x416   :  { %v1022_v31 = vpop.xlane.xlu1 %1021  ;;  %v954_v23 = vpop.xlane.xlu0 %953 }
 0x417   :  { %v1023_v16 = vcvt.f32.s32 %v1022_v31  ;;  %v955_v51 = vcvt.f32.s32 %v954_v23 }
 0x419   :  { %v1026_v7 = vadd.s32 %v1025_v21, %v1023_v16  ;;  %519 = vmax.xlane.f32.xlu0 %v518_v54  ;;  %v958_v61 = vadd.s32 %v957_v63, %v955_v51 }
 0x41a   :  { %v1037_v47 = vpop.xlane.xlu1 %1036  ;;  %v969_v9 = vpop.xlane.xlu0 %968 }
 0x41b   :  { %v1080_v17 = vadd.s32 4, %v1026_v7  ;;  %v1038_v58 = vcvt.f32.s32 %v1037_v47  ;;  %v970_v37 = vcvt.f32.s32 %v969_v9 }
 0x41d   :  { %v1041_v52 = vadd.s32 %v1040_v4, %v1038_v58  ;;  %534 = vmin.xlane.f32.xlu0 %v533_v34  ;;  %v1084_v24 = vsel %vm1076_vm5, %v958_v61, %v1080_v17  ;;  %v973_v45 = vadd.s32 %v972_v60, %v970_v37 }
 0x41e   :  { %v1088_v42 = vadd.s32 24, %v1084_v24 }
 0x41f   :  { %v1081_v49 = vadd.s32 4, %v1041_v52 }
 0x420   :  { %vm1092_vm7 = vcmp.eq.s32.totalorder %v7607_v3, %v1088_v42 }
 0x421   :  { %730 = vmin.xlane.f32.xlu0 %v729_v56  ;;  %v5624_v46 = vsel %vm1092_vm7, 1.0, %v7416_v36  ;;  %v1085_v44 = vsel %vm1077_vm6, %v973_v45, %v1081_v49 }
 0x422   :  { %v1104_v39 = vadd.f32 %v5624_v46, %v905_v13  ;;  %v1089_v59 = vadd.s32 24, %v1085_v44 }
 0x424   :  { %1126 = vxpose.xlu1.b32.start [1/2] (short) (narrow) %v1104_v39, 32  ;;  %vm1093_vm8 = vcmp.eq.s32.totalorder %v7607_v3, %v1089_v59  ;;  %v1108_v12 = vsel %vm48_vm0, %v1104_v39, 0.0 }
 0x425   :  { %326 = vmax.xlane.f32.xlu0 %v325_v41  ;;  %v5625_v57 = vsel %vm1093_vm8, 1.0, %v7416_v36 }
 0x426   :  { %v1105_v43 = vadd.f32 %v5625_v57, %v7935_v1  ;;  %v732_v1 = vsel %vm710_vm3, %v7945_v33, inf }
 0x428   :  { %1127 = vxpose.xlu1.b32.end [2/2] (short) (narrow) %v1105_v43, 32  ;;  %v1109_v14 = vsel %vm48_vm0, %v1105_v43, 0.0 }
 0x429   :  { %341 = vmin.xlane.f32.xlu0 %v340_v55  ;;  %v7998_v53 = vadd.f32 %v1109_v14, %v1108_v12 }
 0x42b   :  { %v1111_v46 = vrot.slane %v7998_v53, 4 }
 0x42d   :  { %522 = vmax.xlane.f32.xlu0 %v521_v10  ;;  %v1112_v43 = vadd.f32 %v1111_v46, %v7998_v53 }
 0x431   :  { %718 = vmax.xlane.f32.xlu0 %v717_v19 }
 0x435   :  { %733 = vmin.xlane.f32.xlu0 %v732_v1  ;;  %v1113_v1 = vrot.slane %v1112_v43, 2 }
 0x439   :  { %929 = vmin.xlane.f32.xlu0 %v928_v5 }
 0x43d   :  { %329 = vmax.xlane.f32.xlu0 %v328_v26 }
 0x441   :  { %721 = vmax.xlane.f32.xlu0 %v720_v30 }
 0x445   :  { %932 = vmin.xlane.f32.xlu0 %v931_v48 }
 0x449   :  { %920 = vmax.xlane.f32.xlu0 %v919_v29  ;;  %v1114_v29 = vadd.f32 %v1113_v1, %v1112_v43 }
 0x457   :  { %917 = vmax.xlane.f32.xlu1 %v916_v62 }
 0x49e   :  { %v8018_v28 = vpop.xlane.xlu0 %531 }
 0x49f   :  { %vm608_vm9 = vcmp.eq.f32.partialorder %v7949_v15, %v8018_v28 }
 0x4a0   :  { %v612_v0 = vsel %vm608_vm9, %v9209_v32, 4 }
 0x4a1   :  { %v8024_v31 = vsel %vm511_vm1, %v612_v0, 2147483647 }
 0x4a2   :  { %v8026_v23 = vpop.xlane.xlu0 %338  ;;  %v646_v8 = vshra.s32 %v8024_v31, 16 }
 0x4a3   :  { %vm413_vm11 = vcmp.eq.f32.partialorder %v7949_v15, %v8026_v23 }
 0x4a4   :  { %v1142_v21 = vpop.trf.xlu1  ;;  %v8031_v16 = vcvt.s32.f32 %v646_v8  ;;  %v417_v51 = vsel %vm413_vm11, %v7607_v3, 4 }
 0x4a5   :  { %6072 = vmatprep.mubr.msk.f32.mxu0 %vm1158_vm10, %v1142_v21  ;;  %v8036_v20 = vsel %vm318_vm2, %v417_v51, 2147483647  ;;  %v9211_v21 = vld [vmem:[#allocation13_spill] sm:$0xff] }
 0x4a6   :  { %649 = vmin.xlane.f32.xlu0 %v8031_v16  ;;  %v8039_v54 = vpop.xlane.xlu0 %519  ;;  %v451_v25 = vshra.s32 %v8036_v20, 16 }
 0x4a7   :  { %vm538_vm12 = vcmp.eq.f32.partialorder %v7949_v15, %v8039_v54 }
 0x4a8   :  { %v1143_v63 = vpop.trf.xlu1  ;;  %v8044_v7 = vcvt.s32.f32 %v451_v25  ;;  %v544_v4 = vsel %vm538_vm12, %v9209_v32, 4  ;;  %v1115_v25 = vrot.slane %v1114_v29, 1 }
 0x4a9   :  { %6073 = vmatmul.mubr.msk.f32.vlgmr.msra.gmra.mrb[4].mxu0 %vm1158_vm10, %v1143_v63  ;;  %v8049_v47 = vsel %vm511_vm1, %v544_v4, 2147483647 }
 0x4aa   :  { %454 = vmin.xlane.f32.xlu1 %v8044_v7  ;;  %v8052_v9 = vpop.xlane.xlu0 %534  ;;  %v578_v6 = vshra.s32 %v8049_v47, 16 }
 0x4ab   :  { %vm609_vm13 = vcmp.eq.f32.partialorder %v7945_v33, %v8052_v9 }
 0x4ac   :  { %v1144_v17 = vpop.trf.xlu1  ;;  %v8057_v61 = vcvt.s32.f32 %v578_v6  ;;  %v613_v58 = vsel %vm609_vm13, %v9209_v32, 4 }
 0x4ad   :  { %6075 = vmatprep.mubr.msk.f32.mxu0 %vm1158_vm10, %v1144_v17  ;;  %v8062_v37 = vsel %vm511_vm1, %v613_v58, 2147483647 }
 0x4ae   :  { %581 = vmin.xlane.f32.xlu1 %v8057_v61  ;;  %v8065_v18 = vpop.xlane.xlu0 %730  ;;  %v661_v60 = vshra.s32 %v8062_v37, 16 }
 0x4af   :  { %vm807_vm14 = vcmp.eq.f32.partialorder %v7949_v15, %v8065_v18 }
 0x4b0   :  { %v1145_v34 = vpop.trf.xlu1  ;;  %v8070_v52 = vcvt.s32.f32 %v661_v60  ;;  %v811_v40 = vsel %vm807_vm14, %v9210_v35, 4  ;;  %v8160_v60 = vadd.f32 %v1115_v25, %v1114_v29 }
 0x4b1   :  { %6076 = vmatmul.mubr.msk.f32.gmra.mrb[6].mxu0 %vm1158_vm10, %v1145_v34  ;;  %v8075_v24 = vsel %vm710_vm3, %v811_v40, 2147483647 }
 0x4b2   :  { %664 = vmin.xlane.f32.xlu1 %v8070_v52  ;;  %v8078_v22 = vpop.xlane.xlu0 %326  ;;  %v845_v27 = vshra.s32 %v8075_v24, 16  ;;  %v1385_v46 = vadd.f32 1e-20, %v8160_v60 }
 0x4b3   :  { %vm345_vm15 = vcmp.eq.f32.partialorder %v7949_v15, %v8078_v22 }
 0x4b4   :  { %v8083_v38 = vcvt.s32.f32 %v845_v27  ;;  %v349_v42 = vsel %vm345_vm15, %v7607_v3, 4  ;;  %7237 = vrcp.f32 %v1385_v46 }
 0x4b5   :  { %v8087_v49 = vsel %vm318_vm2, %v349_v42, 2147483647 }
 0x4b6   :  { %848 = vmin.xlane.f32.xlu1 %v8083_v38  ;;  %v8090_v45 = vpop.xlane.xlu0 %341  ;;  %v383_v50 = vshra.s32 %v8087_v49, 16 }
 0x4b7   :  { %vm414_vm5 = vcmp.eq.f32.partialorder %v7945_v33, %v8090_v45 }
 0x4b8   :  { %v8095_v56 = vcvt.s32.f32 %v383_v50  ;;  %v418_v13 = vsel %vm414_vm5, %v7607_v3, 4 }
 0x4b9   :  { %v8100_v44 = vsel %vm318_vm2, %v418_v13, 2147483647 }
 0x4ba   :  { %386 = vmin.xlane.f32.xlu1 %v8095_v56  ;;  %v8103_v39 = vpop.xlane.xlu0 %522  ;;  %v466_v59 = vshra.s32 %v8100_v44, 16 }
 0x4bb   :  { %vm539_vm6 = vcmp.eq.f32.partialorder %v7945_v33, %v8103_v39 }
 0x4bc   :  { %v8108_v41 = vcvt.s32.f32 %v466_v59  ;;  %v545_v57 = vsel %vm539_vm6, %v9209_v32, 4 }
 0x4bd   :  { %v8113_v12 = vsel %vm511_vm1, %v545_v57, 2147483647 }
 0x4be   :  { %469 = vmin.xlane.f32.xlu1 %v8108_v41  ;;  %v8116_v55 = vpop.xlane.xlu0 %718  ;;  %v593_v14 = vshra.s32 %v8113_v12, 16 }
 0x4bf   :  { %vm737_vm7 = vcmp.eq.f32.partialorder %v7949_v15, %v8116_v55 }
 0x4c0   :  { %v8121_v10 = vcvt.s32.f32 %v593_v14  ;;  %v743_v19 = vsel %vm737_vm7, %v9210_v35, 4 }
 0x4c1   :  { %v8125_v5 = vsel %vm710_vm3, %v743_v19, 2147483647  ;;  %v7238_v19 = vpop.eup %7237 }
 0x4c2   :  { %596 = vmin.xlane.f32.xlu1 %v8121_v10  ;;  %v8128_v53 = vpop.xlane.xlu0 %733  ;;  %v777_v26 = vshra.s32 %v8125_v5, 16 }
 0x4c3   :  { %vm808_vm8 = vcmp.eq.f32.partialorder %v7945_v33, %v8128_v53 }
 0x4c4   :  { %v8133_v30 = vcvt.s32.f32 %v777_v26  ;;  %v812_v48 = vsel %vm808_vm8, %v9210_v35, 4 }
 0x4c5   :  { %v8137_v62 = vsel %vm710_vm3, %v812_v48, 2147483647 }
 0x4c6   :  { %780 = vmin.xlane.f32.xlu0 %v8133_v30  ;;  %v8140_v32 = vpop.xlane.xlu0 %929  ;;  %v860_v0 = vshra.s32 %v8137_v62, 16 }
 0x4c7   :  { %vm1006_vm9 = vcmp.eq.f32.partialorder %v7949_v15, %v8140_v32 }
 0x4c8   :  { %v8145_v8 = vcvt.s32.f32 %v860_v0  ;;  %v1010_v51 = vsel %vm1006_vm9, %v9211_v21, 4 }
 0x4c9   :  { %v8149_v63 = vsel %vm909_vm4, %v1010_v51, 2147483647 }
 0x4ca   :  { %863 = vmin.xlane.f32.xlu1 %v8145_v8  ;;  %v8152_v4 = vpop.xlane.xlu0 %329  ;;  %v1044_v6 = vshra.s32 %v8149_v63, 16 }
 0x4cb   :  { %vm346_vm11 = vcmp.eq.f32.partialorder %v7945_v33, %v8152_v4 }
 0x4cc   :  { %v8157_v17 = vcvt.s32.f32 %v1044_v6  ;;  %v350_v58 = vsel %vm346_vm11, %v7607_v3, 4 }
 0x4cd   :  { %v8163_v34 = vsel %vm318_vm2, %v350_v58, 2147483647 }
 0x4ce   :  { %1047 = vmin.xlane.f32.xlu0 %v8157_v17  ;;  %v8166_v40 = vpop.xlane.xlu0 %721  ;;  %v398_v27 = vshra.s32 %v8163_v34, 16 }
 0x4cf   :  { %vm738_vm12 = vcmp.eq.f32.partialorder %v7945_v33, %v8166_v40 }
 0x4d0   :  { %v8171_v42 = vcvt.s32.f32 %v398_v27  ;;  %v744_v50 = vsel %vm738_vm12, %v9210_v35, 4  ;;  %v1389_v35 = vmul.f32 %v7238_v19, %v1385_v46  ;;  %v1434_v46 = vld [vmem:[%s9178_s4 + $0x8] sm:$0xff] }
 0x4d1   :  { %v8175_v13 = vsel %vm710_vm3, %v744_v50, 2147483647  ;;  %v1433_v50 = vld [vmem:[%s9178_s4] sm:$0xff] }
 0x4d2   :  { %401 = vmin.xlane.f32.xlu1 %v8171_v42  ;;  %v792_v59 = vshra.s32 %v8175_v13, 16  ;;  %v8183_v43 = vpop.xlane.xlu0 %932  ;;  %v1391_v48 = vsub.f32 2.0, %v1389_v35  ;;  %v1436_v35 = vld [vmem:[%s9178_s4 + $0x18] sm:$0xff] }
 0x4d3   :  { %vm1007_vm15 = vcmp.eq.f32.partialorder %v7945_v33, %v8183_v43 }
 0x4d4   :  { %v8180_v57 = vcvt.s32.f32 %v792_v59  ;;  %v1393_v6 = vmul.f32 %v7238_v19, %v1391_v48  ;;  %v6536_v59 = vpack.c.bf16 %v1434_v46, %v1433_v50  ;;  %v1435_v19 = vld [vmem:[%s9178_s4 + $0x10] sm:$0xff]  ;;  %v1011_v48 = vsel %vm1007_vm15, %v9211_v21, 4  ;;  %s7417_s4 = smov 96  }
 0x4d6   :  { %795 = vmin.xlane.f32.xlu0 %v8180_v57  ;;  %v8185_v14 = vpop.xlane.xlu0 %920  ;;  %6537 = vmatprep.subr.bf16.mxu0 %v6536_v59 }
 0x4d7   :  { %vm937_vm13 = vcmp.eq.f32.partialorder %v7945_v33, %v8185_v14  ;;  %6539 = vmatpush3.bf16.msra.mxu0 %v6536_v59  ;;  %v450_v59 = vand.u32 65535, %v8036_v20  ;;  %v660_v20 = vand.u32 65535, %v8062_v37  ;;  %v382_v37 = vand.u32 65535, %v8087_v49 }
 0x4d8   :  { %v943_v26 = vsel %vm937_vm13, %v9211_v21, 4  ;;  %v592_v49 = vand.u32 65535, %v8113_v12 }
 0x4d9   :  { %v8199_v51 = vsel %vm909_vm4, %v943_v26, 2147483647  ;;  %v6540_v26 = vpack.c.bf16 %v1436_v35, %v1435_v19  ;;  %v452_v35 = vcvt.s32.f32 %v450_v59 }
 0x4da   :  { %v991_v27 = vshra.s32 %v8199_v51, 16 }
 0x4db   :  { %6541 = vmatprep.subr.bf16.mxu0 %v6540_v26 }
 0x4dc   :  { %6543 = vmatpush3.bf16.msra.mxu0 %v6540_v26 }
 0x4e4   :  { %v8189_v1 = vpop.xlane.xlu1 %917 }
 0x4e5   :  { %vm936_vm14 = vcmp.eq.f32.partialorder %v7949_v15, %v8189_v1  ;;  %v8206_v15 = vcvt.s32.f32 %v991_v27  ;;  %v645_v27 = vand.u32 65535, %v8024_v31 }
 0x4e6   :  { %v942_v29 = vsel %vm936_vm14, %v9211_v21, 4  ;;  %v577_v21 = vand.u32 65535, %v8049_v47  ;;  %v844_v47 = vand.u32 65535, %v8075_v24  ;;  %v465_v24 = vand.u32 65535, %v8100_v44 }
 0x4e7   :  { %v8196_v0 = vsel %vm909_vm4, %v942_v29, 2147483647  ;;  %v8225_v29 = vsel %vm909_vm4, %v1011_v48, 2147483647  ;;  %v647_v46 = vcvt.s32.f32 %v645_v27  ;;  %v662_v27 = vcvt.s32.f32 %v660_v20 }
 0x4e8   :  { %v976_v25 = vshra.s32 %v8196_v0, 16  ;;  %v579_v48 = vcvt.s32.f32 %v577_v21  ;;  %v846_v59 = vcvt.s32.f32 %v844_v47  ;;  %v384_v21 = vcvt.s32.f32 %v382_v37 }
 0x4e9   :  { %v776_v44 = vand.u32 65535, %v8125_v5  ;;  %v594_v20 = vcvt.s32.f32 %v592_v49  ;;  %v1043_v5 = vand.u32 65535, %v8149_v63  ;;  %v791_v63 = vand.u32 65535, %v8175_v13 }
 0x4ea   :  { %v8202_v58 = vcvt.s32.f32 %v976_v25  ;;  %v1059_v25 = vshra.s32 %v8225_v29, 16  ;;  %v990_v13 = vand.u32 65535, %v8199_v51 }
 0x4eb   :  { %v778_v12 = vcvt.s32.f32 %v776_v44  ;;  %v1045_v37 = vcvt.s32.f32 %v1043_v5 }
 0x4ec   :  { %1396 = vbcast.lane.b32.xlu0 %v1393_v6, 256  ;;  %979 = vmin.xlane.f32.xlu1 %v8202_v58 }
 0x4f0   :  { %1400 = vbcast.lane.b32.xlu0 %v1393_v6, 264  ;;  %994 = vmin.xlane.f32.xlu1 %v8206_v15 }
 0x4f4   :  { %1404 = vbcast.lane.b32.xlu0 %v1393_v6, 272 }
 0x4f8   :  { %1408 = vbcast.lane.b32.xlu0 %v1393_v6, 280  ;;  %v8228_v6 = vcvt.s32.f32 %v1059_v25 }
 0x517   :  { %1062 = vmin.xlane.f32.xlu0 %v8228_v6 }
 0x533   :  { %v8232_v50 = vpop.xlane.xlu0 %649 }
 0x534   :  { %vm651_vm5 = vcmp.eq.f32.partialorder %v8031_v16, %v8232_v50 }
 0x535   :  { %v652_v33 = vsel %vm651_vm5, %v647_v46, inf }
 0x536   :  { %653 = vmin.xlane.f32.xlu0 %v652_v33 }
 0x537   :  { %v8238_v19 = vpop.xlane.xlu1 %454 }
 0x538   :  { %vm456_vm6 = vcmp.eq.f32.partialorder %v8044_v7, %v8238_v19 }
 0x539   :  { %v457_v26 = vsel %vm456_vm6, %v452_v35, inf }
 0x53a   :  { %458 = vmin.xlane.f32.xlu1 %v457_v26  ;;  %v467_v26 = vcvt.s32.f32 %v465_v24 }
 0x53b   :  { %v8242_v31 = vpop.xlane.xlu1 %581 }
 0x53c   :  { %vm583_vm7 = vcmp.eq.f32.partialorder %v8057_v61, %v8242_v31 }
 0x53d   :  { %v584_v16 = vsel %vm583_vm7, %v579_v48, inf }
 0x53e   :  { %585 = vmin.xlane.f32.xlu0 %v584_v16  ;;  %v859_v16 = vand.u32 65535, %v8137_v62  ;;  %v397_v62 = vand.u32 65535, %v8163_v34  ;;  %v793_v34 = vcvt.s32.f32 %v791_v63 }
 0x53f   :  { %v8248_v25 = vpop.xlane.xlu1 %664 }
 0x540   :  { %vm666_vm8 = vcmp.eq.f32.partialorder %v8070_v52, %v8248_v25  ;;  %v399_v24 = vcvt.s32.f32 %v397_v62 }
 0x541   :  { %v667_v7 = vsel %vm666_vm8, %v662_v27, inf }
 0x542   :  { %668 = vmin.xlane.f32.xlu1 %v667_v7  ;;  %v861_v7 = vcvt.s32.f32 %v859_v16 }
 0x543   :  { %v8252_v46 = vpop.xlane.xlu1 %848 }
 0x544   :  { %vm850_vm9 = vcmp.eq.f32.partialorder %v8083_v38, %v8252_v46 }
 0x545   :  { %v851_v61 = vsel %vm850_vm9, %v846_v59, inf }
 0x546   :  { %852 = vmin.xlane.f32.xlu0 %v851_v61 }
 0x547   :  { %v8258_v33 = vpop.xlane.xlu1 %386 }
 0x548   :  { %vm388_vm11 = vcmp.eq.f32.partialorder %v8095_v56, %v8258_v33 }
 0x549   :  { %v389_v52 = vsel %vm388_vm11, %v384_v21, inf }
 0x54a   :  { %390 = vmin.xlane.f32.xlu1 %v389_v52 }
 0x54b   :  { %v8262_v35 = vpop.xlane.xlu1 %469 }
 0x54c   :  { %vm471_vm12 = vcmp.eq.f32.partialorder %v8108_v41, %v8262_v35 }
 0x54d   :  { %v472_v38 = vsel %vm471_vm12, %v467_v26, inf  ;;  %v975_v26 = vand.u32 65535, %v8196_v0 }
 0x54e   :  { %473 = vmin.xlane.f32.xlu0 %v472_v38 }
 0x54f   :  { %v8268_v48 = vpop.xlane.xlu1 %596  ;;  %v977_v38 = vcvt.s32.f32 %v975_v26 }
 0x550   :  { %vm598_vm13 = vcmp.eq.f32.partialorder %v8121_v10, %v8268_v48 }
 0x551   :  { %v599_v56 = vsel %vm598_vm13, %v594_v20, inf }
 0x552   :  { %600 = vmin.xlane.f32.xlu1 %v599_v56 }
 0x553   :  { %v8273_v47 = vpop.xlane.xlu0 %780 }
 0x554   :  { %vm782_vm14 = vcmp.eq.f32.partialorder %v8133_v30, %v8273_v47 }
 0x555   :  { %v783_v41 = vsel %vm782_vm14, %v778_v12, inf }
 0x556   :  { %784 = vmin.xlane.f32.xlu0 %v783_v41 }
 0x557   :  { %v8278_v27 = vpop.xlane.xlu1 %863 }
 0x558   :  { %vm865_vm15 = vcmp.eq.f32.partialorder %v8145_v8, %v8278_v27 }
 0x559   :  { %v866_v10 = vsel %vm865_vm15, %v861_v7, inf }
 0x55a   :  { %867 = vmin.xlane.f32.xlu1 %v866_v10 }
 0x55b   :  { %v8283_v59 = vpop.xlane.xlu0 %1047 }
 0x55c   :  { %vm1049_vm5 = vcmp.eq.f32.partialorder %v8157_v17, %v8283_v59 }
 0x55d   :  { %v1050_v30 = vsel %vm1049_vm5, %v1045_v37, inf  ;;  %v1058_v37 = vand.u32 65535, %v8225_v29  ;;  %v855_v29 = vcvt.f32.s32 %v8252_v46 }
 0x55e   :  { %1051 = vmin.xlane.f32.xlu0 %v1050_v30 }
 0x55f   :  { %v8288_v61 = vpop.xlane.xlu1 %401  ;;  %v1060_v30 = vcvt.s32.f32 %v1058_v37 }
 0x560   :  { %vm403_vm6 = vcmp.eq.f32.partialorder %v8171_v42, %v8288_v61 }
 0x561   :  { %v404_v8 = vsel %vm403_vm6, %v399_v24, inf }
 0x562   :  { %405 = vmin.xlane.f32.xlu1 %v404_v8 }
 0x563   :  { %v8292_v21 = vpop.xlane.xlu0 %795 }
 0x564   :  { %vm797_vm7 = vcmp.eq.f32.partialorder %v8180_v57, %v8292_v21  ;;  %v992_v57 = vcvt.s32.f32 %v990_v13  ;;  %v656_v13 = vcvt.f32.s32 %v8232_v50 }
 0x565   :  { %v798_v52 = vsel %vm797_vm7, %v793_v34, inf }
 0x566   :  { %799 = vmin.xlane.f32.xlu0 %v798_v52 }
 0x567   :  { %v1397_v17 = vpop.permute.xlu0 %1396 }
 0x56b   :  { %v1401_v44 = vpop.permute.xlu0 %1400 }
 0x56f   :  { %v1405_v41 = vpop.permute.xlu0 %1404 }
 0x573   :  { %v1409_v7 = vpop.permute.xlu0 %1408 }
 0x579   :  { %v8298_v49 = vpop.xlane.xlu1 %979 }
 0x57a   :  { %vm981_vm8 = vcmp.eq.f32.partialorder %v8202_v58, %v8298_v49 }
 0x57b   :  { %v982_v42 = vsel %vm981_vm8, %v977_v38, inf  ;;  %v461_v38 = vcvt.f32.s32 %v8238_v19 }
 0x57c   :  { %v6074_v20 = vpop.f32.mrb[4].mxu0  ;;  %983 = vmin.xlane.f32.xlu1 %v982_v42 }
 0x57d   :  { %v1237_v56 = vpop.f32.mrb[5].mxu0  ;;  %v8302_v16 = vpop.xlane.xlu1 %994  ;;  %v1426_v0 = vmul.f32 %v6074_v20, %v1401_v44  ;;  %v588_v44 = vcvt.f32.s32 %v8242_v31  ;;  %v787_v20 = vcvt.f32.s32 %v8273_v47  ;;  %v462_v50 = vshll.u32 %v461_v38, 16 }
 0x57e   :  { %v1425_v12 = vmul.f32 %v1397_v17, %v1237_v56  ;;  %vm996_vm9 = vcmp.eq.f32.partialorder %v8206_v15, %v8302_v16 }
 0x57f   :  { %v997_v51 = vsel %vm996_vm9, %v992_v57, inf  ;;  %v788_v19 = vshll.u32 %v787_v20, 16 }
 0x580   :  { %998 = vmin.xlane.f32.xlu1 %v997_v51  ;;  %6096 = vmatprep.mubr.msk.f32.mxu0 %vm48_vm0, %v1425_v12  ;;  %v657_v12 = vshll.u32 %v656_v13, 16  ;;  %v393_v51 = vcvt.f32.s32 %v8258_v33 }
 0x581   :  { %6097 = vmatmul.mubr.msk.f32.vlgmr.msra.gmra.mrb[8].mxu0 %vm48_vm0, %v1426_v0  ;;  %v856_v0 = vshll.u32 %v855_v29, 16 }
 0x582   :  { %v394_v37 = vshll.u32 %v393_v51, 16 }
 0x584   :  { %v6077_v58 = vpop.f32.mrb[6].mxu0 }
 0x585   :  { %v1247_v5 = vpop.f32.mrb[7].mxu0  ;;  %v1428_v62 = vmul.f32 %v6077_v58, %v1409_v7  ;;  %v589_v7 = vshll.u32 %v588_v44, 16  ;;  %v481_v44 = vsub.f32 0.0, %v8026_v23 }
 0x586   :  { %v1427_v10 = vmul.f32 %v1405_v41, %v1247_v5 }
 0x587   :  { %vm485_vm14 = vcmp.ge.f32.partialorder %v8078_v22, %v481_v44 }
 0x588   :  { %6099 = vmatprep.mubr.msk.f32.mxu0 %vm48_vm0, %v1427_v10 }
 0x589   :  { %6100 = vmatmul.mubr.msk.f32.gmra.mrb[10].mxu0 %vm48_vm0, %v1428_v62 }
 0x5a4   :  { %v8311_v15 = vpop.xlane.xlu0 %1062 }
 0x5a5   :  { %vm1064_vm11 = vcmp.eq.f32.partialorder %v8228_v6, %v8311_v15 }
 0x5a6   :  { %v1065_v63 = vsel %vm1064_vm11, %v1060_v30, inf }
 0x5a7   :  { %1066 = vmin.xlane.f32.xlu0 %v1065_v63 }
 0x5c3   :  { %v654_v24 = vpop.xlane.xlu0 %653 }
 0x5c4   :  { %v655_v56 = vcvt.f32.s32 %v654_v24  ;;  %v676_v24 = vsub.f32 0.0, %v8018_v28 }
 0x5c6   :  { %v658_v10 = vadd.s32 %v657_v12, %v655_v56  ;;  %vm680_vm12 = vcmp.ge.f32.partialorder %v8039_v54, %v676_v24  ;;  %v802_v24 = vcvt.f32.s32 %v8292_v21 }
 0x5c7   :  { %v459_v34 = vpop.xlane.xlu1 %458 }
 0x5c8   :  { %v460_v41 = vcvt.f32.s32 %v459_v34  ;;  %v684_v13 = vadd.s32 4, %v658_v10 }
 0x5ca   :  { %v463_v30 = vadd.s32 %v462_v50, %v460_v41 }
 0x5cb   :  { %v586_v8 = vpop.xlane.xlu0 %585 }
 0x5cc   :  { %v587_v58 = vcvt.f32.s32 %v586_v8  ;;  %v1054_v8 = vcvt.f32.s32 %v8283_v59 }
 0x5ce   :  { %v590_v47 = vadd.s32 %v589_v7, %v587_v58 }
 0x5cf   :  { %v8315_v17 = vpop.xlane.xlu1 %668 }
 0x5d3   :  { %v853_v52 = vpop.xlane.xlu0 %852 }
 0x5d4   :  { %v854_v57 = vcvt.f32.s32 %v853_v52  ;;  %v875_v52 = vsub.f32 0.0, %v8065_v18  ;;  %v1055_v18 = vshll.u32 %v1054_v8, 16 }
 0x5d6   :  { %v857_v31 = vadd.s32 %v856_v0, %v854_v57  ;;  %vm879_vm13 = vcmp.ge.f32.partialorder %v8116_v55, %v875_v52  ;;  %v986_v57 = vcvt.f32.s32 %v8298_v49  ;;  %v1074_v55 = vsub.f32 0.0, %v8140_v32 }
 0x5d7   :  { %v391_v42 = vpop.xlane.xlu1 %390  ;;  %v670_v52 = vcvt.f32.s32 %v8315_v17 }
 0x5d8   :  { %v392_v62 = vcvt.f32.s32 %v391_v42  ;;  %v883_v29 = vadd.s32 4, %v857_v31  ;;  %v489_v42 = vadd.s32 4, %v463_v30  ;;  %v987_v54 = vshll.u32 %v986_v57, 16 }
 0x5d9   :  { %vm1078_vm7 = vcmp.ge.f32.partialorder %v8189_v1, %v1074_v55  ;;  %v870_v1 = vcvt.f32.s32 %v8278_v27  ;;  %v476_v30 = vcvt.f32.s32 %v8262_v35  ;;  %v803_v35 = vshll.u32 %v802_v24, 16 }
 0x5da   :  { %v395_v38 = vadd.s32 %v394_v37, %v392_v62  ;;  %v671_v37 = vcvt.f32.s32 %v8248_v25  ;;  %v876_v57 = vsub.f32 0.0, %v8128_v53 }
 0x5db   :  { %v8317_v26 = vpop.xlane.xlu0 %473  ;;  %v477_v27 = vshll.u32 %v476_v30, 16 }
 0x5dc   :  { %v493_v59 = vsel %vm485_vm14, %v395_v38, %v489_v42  ;;  %v672_v8 = vshll.u32 %v671_v37, 16  ;;  %v475_v38 = vcvt.f32.s32 %v8317_v26  ;;  %vm880_vm11 = vcmp.ge.f32.partialorder %v8166_v40, %v876_v57  ;;  %v9215_v57 = vld [vmem:[#allocation6_spill] sm:$0xff] }
 0x5dd   :  { %vm497_vm15 = vcmp.eq.s32.totalorder %v7607_v3, %v493_v59 }
 0x5de   :  { %v478_v21 = vadd.s32 %v477_v27, %v475_v38 }
 0x5df   :  { %v8325_v46 = vpop.xlane.xlu1 %600 }
 0x5e0   :  { %v602_v25 = vcvt.f32.s32 %v8325_v46  ;;  %v482_v46 = vsub.f32 0.0, %v8090_v45 }
 0x5e3   :  { %v785_v6 = vpop.xlane.xlu0 %784 }
 0x5e4   :  { %v786_v5 = vcvt.f32.s32 %v785_v6  ;;  %v688_v6 = vsel %vm680_vm12, %v590_v47, %v684_v13  ;;  %v603_v47 = vcvt.f32.s32 %v8268_v48  ;;  %v871_v13 = vshll.u32 %v870_v1, 16 }
 0x5e5   :  { %v692_v12 = vadd.s32 8, %v688_v6  ;;  %v673_v6 = vadd.s32 %v672_v8, %v670_v52  ;;  %vm486_vm12 = vcmp.ge.f32.partialorder %v8152_v4, %v482_v46 }
 0x5e6   :  { %v789_v63 = vadd.s32 %v788_v19, %v786_v5  ;;  %v5614_v5 = vsel %vm497_vm15, 1.0, %v7416_v36  ;;  %v604_v42 = vshll.u32 %v603_v47, 16 }
 0x5e7   :  { %v868_v33 = vpop.xlane.xlu1 %867  ;;  %vm696_vm5 = vcmp.eq.s32.totalorder %v7607_v3, %v692_v12  ;;  %v1069_v12 = vcvt.f32.s32 %v8311_v15  ;;  %v1075_v15 = vsub.f32 0.0, %v8183_v43 }
 0x5e8   :  { %v887_v20 = vsel %vm879_vm13, %v789_v63, %v883_v29  ;;  %v5618_v49 = vsel %vm696_vm5, 1.0, %v7416_v36  ;;  %v408_v29 = vcvt.f32.s32 %v8288_v61  ;;  %v685_v61 = vadd.s32 4, %v673_v6 }
 0x5e9   :  { %v891_v0 = vadd.s32 16, %v887_v20  ;;  %v708_v19 = vadd.f32 %v5618_v49, %v5614_v5  ;;  %vm1079_vm5 = vcmp.ge.f32.partialorder %v8185_v14, %v1075_v15 }
 0x5eb   :  { %v1052_v34 = vpop.xlane.xlu0 %1051  ;;  %vm895_vm6 = vcmp.eq.s32.totalorder %v7607_v3, %v891_v0 }
 0x5ec   :  { %v1053_v56 = vcvt.f32.s32 %v1052_v34  ;;  %v5622_v50 = vsel %vm895_vm6, 1.0, %v7416_v36  ;;  %v869_v34 = vcvt.f32.s32 %v868_v33  ;;  %v677_v33 = vsub.f32 0.0, %v8052_v9 }
 0x5ed   :  { %v907_v31 = vadd.f32 %v5622_v50, %v708_v19  ;;  %v1001_v9 = vcvt.f32.s32 %v8302_v16 }
 0x5ee   :  { %v1056_v51 = vadd.s32 %v1055_v18, %v1053_v56  ;;  %v872_v48 = vadd.s32 %v871_v13, %v869_v34  ;;  %v409_v56 = vshll.u32 %v408_v29, 16  ;;  %v605_v18 = vadd.s32 %v604_v42, %v602_v25 }
 0x5ef   :  { %v406_v28 = vpop.xlane.xlu1 %405  ;;  %vm681_vm9 = vcmp.ge.f32.partialorder %v8103_v39, %v677_v33  ;;  %v1002_v39 = vshll.u32 %v1001_v9, 16 }
 0x5f0   :  { %v1082_v22 = vadd.s32 4, %v1056_v51  ;;  %v407_v20 = vcvt.f32.s32 %v406_v28  ;;  %v884_v59 = vadd.s32 4, %v872_v48  ;;  %v490_v28 = vadd.s32 4, %v478_v21 }
 0x5f1   :  { %v689_v0 = vsel %vm681_vm9, %v605_v18, %v685_v61  ;;  %v9214_v18 = vld [vmem:[#allocation7_spill] sm:$0xff]  ;;  %v8409_v61 = vmul.f32 0.5, %v9215_v57  ;;  %vm4325_vm9 = vcmask 195744  }
 0x5f2   :  { %v410_v26 = vadd.s32 %v409_v56, %v407_v20 }
 0x5f3   :  { %v800_v63 = vpop.xlane.xlu0 %799 }
 0x5f4   :  { %v801_v44 = vcvt.f32.s32 %v800_v63  ;;  %v494_v53 = vsel %vm486_vm12, %v410_v26, %v490_v28 }
 0x5f5   :  { %vm498_vm13 = vcmp.eq.s32.totalorder %v7607_v3, %v494_v53 }
 0x5f6   :  { %v804_v17 = vadd.s32 %v803_v35, %v801_v44  ;;  %v5615_v16 = vsel %vm498_vm13, 1.0, %v7416_v36 }
 0x5f8   :  { %v888_v51 = vsel %vm880_vm11, %v804_v17, %v884_v59  ;;  %v8401_v17 = vmul.f32 0.5, %v9214_v18  ;;  %vm4790_vm11 = vcmask 228544  }
 0x609   :  { %v984_v23 = vpop.xlane.xlu1 %983 }
 0x60a   :  { %v985_v41 = vcvt.f32.s32 %v984_v23 }
 0x60c   :  { %v988_v58 = vadd.s32 %v987_v54, %v985_v41  ;;  %v693_v54 = vadd.s32 8, %v689_v0  ;;  %v892_v41 = vadd.s32 16, %v888_v51 }
 0x60d   :  { %v999_v23 = vpop.xlane.xlu1 %998 }
 0x60e   :  { %v1086_v7 = vsel %vm1078_vm7, %v988_v58, %v1082_v22  ;;  %v1070_v22 = vshll.u32 %v1069_v12, 16  ;;  %v1000_v45 = vcvt.f32.s32 %v999_v23  ;;  %vm697_vm14 = vcmp.eq.s32.totalorder %v7607_v3, %v693_v54  ;;  %vm8383_vm7 = vmpackc.low %vm318_vm2, %vm318_vm2 }
 0x60f   :  { %v1090_v10 = vadd.s32 24, %v1086_v7  ;;  %vm896_vm15 = vcmp.eq.s32.totalorder %v7607_v3, %v892_v41  ;;  %v5619_v49 = vsel %vm697_vm14, 1.0, %v7416_v36 }
 0x610   :  { %v1003_v4 = vadd.s32 %v1002_v39, %v1000_v45  ;;  %v5623_v50 = vsel %vm896_vm15, 1.0, %v7416_v36  ;;  %v709_v19 = vadd.f32 %v5619_v49, %v5615_v16 }
 0x611   :  { %vm1094_vm8 = vcmp.eq.s32.totalorder %v7607_v3, %v1090_v10 }
 0x612   :  { %v5626_v32 = vsel %vm1094_vm8, 1.0, %v7416_v36 }
 0x613   :  { %v8345_v62 = vadd.f32 %v5626_v32, %v907_v31  ;;  %v908_v31 = vadd.f32 %v5623_v50, %v709_v19 }
 0x615   :  { %1256 = vxpose.xlu0.b32.start [1/2] (short) (narrow) %v8345_v62, 32  ;;  %v1117_v37 = vsel %vm48_vm0, %v8345_v62, 0.0 }
 0x634   :  { %v1067_v55 = vpop.xlane.xlu0 %1066 }
 0x635   :  { %v1068_v58 = vcvt.f32.s32 %v1067_v55  ;;  %v8416_v55 = vmul.f32 0.5, %v7947_v2 }
 0x637   :  { %v1071_v40 = vadd.s32 %v1070_v22, %v1068_v58 }
 0x639   :  { %v1083_v5 = vadd.s32 4, %v1071_v40 }
 0x63b   :  { %v1087_v7 = vsel %vm1079_vm5, %v1003_v4, %v1083_v5 }
 0x63c   :  { %v1091_v10 = vadd.s32 24, %v1087_v7 }
 0x63e   :  { %vm1095_vm6 = vcmp.eq.s32.totalorder %v7607_v3, %v1091_v10 }
 0x63f   :  { %v5627_v43 = vsel %vm1095_vm6, 1.0, %v7416_v36 }
 0x640   :  { %v1107_v32 = vadd.f32 %v5627_v43, %v908_v31 }
 0x642   :  { %1257 = vxpose.xlu0.b32.end [2/2] (short) (narrow) %v1107_v32, 32  ;;  %v1118_v1 = vsel %vm48_vm0, %v1107_v32, 0.0 }
 0x643   :  { %v1119_v14 = vadd.f32 %v1118_v1, %v1117_v37 }
 0x645   :  { %v1120_v30 = vrot.slane %v1119_v14, 4 }
 0x647   :  { %v1121_v47 = vadd.f32 %v1120_v30, %v1119_v14 }
 0x649   :  { %v1122_v63 = vrot.slane %v1121_v47, 2 }
 0x64b   :  { %v1123_v24 = vadd.f32 %v1122_v63, %v1121_v47 }
 0x64d   :  { %v1124_v52 = vrot.slane %v1123_v24, 1 }
 0x64f   :  { %v8378_v34 = vadd.f32 %v1124_v52, %v1123_v24 }
 0x651   :  { %v1386_v8 = vadd.f32 1e-20, %v8378_v34  ;;  %vm1567_vm8 = vcmp.ge.f32.partialorder %v8378_v34, 1.0 }
 0x653   :  { %7239 = vrcp.f32 %v1386_v8 }
 0x654   :  { %v6098_v3 = vpop.f32.mrb[8].mxu0 }
 0x655   :  { %v1527_v36 = vpop.f32.mrb[9].mxu0 }
 0x656   :  { %v6544_v13 = vpack.c.bf16 %v6098_v3, %v1527_v36  ;;  %v8387_v29 = vpack.i.bf16 %v6098_v3, %v1527_v36 }
 0x658   :  { %6546 = vmatprep.subr.msk.bf16.mxu1 %vm8383_vm7, %v6544_v13 }
 0x65c   :  { %v6101_v38 = vpop.f32.mrb[10].mxu0 }
 0x65d   :  { %v7240_v25 = vpop.eup %7239  ;;  %v1537_v44 = vpop.f32.mrb[11].mxu0 }
 0x65e   :  { %v1390_v27 = vmul.f32 %v7240_v25, %v1386_v8  ;;  %v6550_v42 = vpack.c.bf16 %v6101_v38, %v1537_v44  ;;  %v8391_v35 = vpack.i.bf16 %v6101_v38, %v1537_v44  ;;  %v8455_v44 = vmul.f32 0.5, %v7943_v11 }
 0x660   :  { %v1392_v6 = vsub.f32 2.0, %v1390_v27 }
 0x662   :  { %v1394_v48 = vmul.f32 %v7240_v25, %v1392_v6 }
 0x664   :  { %1411 = vbcast.lane.b32.xlu1 %v1394_v48, 256 }
 0x668   :  { %1415 = vbcast.lane.b32.xlu1 %v1394_v48, 264 }
 0x66c   :  { %1419 = vbcast.lane.b32.xlu1 %v1394_v48, 272 }
 0x670   :  { %1423 = vbcast.lane.b32.xlu1 %v1394_v48, 280 }
 0x6be   :  { %v1272_v20 = vpop.trf.xlu0 }
 0x6bf   :  { %6082 = vmatprep.mubr.msk.f32.mxu1 %vm1158_vm10, %v1272_v20 }
 0x6c2   :  { %v1273_v56 = vpop.trf.xlu0 }
 0x6c3   :  { %6083 = vmatmul.mubr.msk.f32.vlgmr.msra.gmra.mrb[4].mxu1 %vm1158_vm10, %v1273_v56 }
 0x6c4   :  { %6549 = vmatpush3.bf16.xpose.msk.msra.mxu1 %vm8383_vm7, %v6544_v13 }
 0x6c5   :  { %6552 = vmatprep.subr.msk.bf16.mxu1 %vm8383_vm7, %v6550_v42 }
 0x6c6   :  { %v1274_v21 = vpop.trf.xlu0 }
 0x6c7   :  { %6085 = vmatprep.mubr.msk.f32.mxu1 %vm1158_vm10, %v1274_v21 }
 0x6ca   :  { %v1275_v33 = vpop.trf.xlu0 }
 0x6cb   :  { %6086 = vmatmul.mubr.msk.f32.gmra.mrb[6].mxu1 %vm1158_vm10, %v1275_v33  ;;  %vm1566_vm10 = vcmp.ge.f32.partialorder %v8160_v60, 1.0 }
 0x6cc   :  { %6555 = vmatpush3.bf16.xpose.msk.msra.mxu1 %vm8383_vm7, %v6550_v42  ;;  %6116 = vmatprep.mubr.msk.f32.mxu1 %vm318_vm2, %v8401_v17 }
 0x6d3   :  { %6117 = vmatmul.mubr.msk.f32.vlgmr.msra.gmra.mrb[8].mxu1 %vm318_vm2, %v8409_v61 }
 0x6d6   :  { %v1412_v59 = vpop.permute.xlu1 %1411 }
 0x6da   :  { %v1416_v26 = vpop.permute.xlu1 %1415 }
 0x6de   :  { %v1420_v51 = vpop.permute.xlu1 %1419 }
 0x6e2   :  { %v1424_v53 = vpop.permute.xlu1 %1423 }
 0x796   :  { %v6084_v46 = vpop.f32.mrb[4].mxu1 }
 0x797   :  { %v1366_v12 = vpop.f32.mrb[5].mxu1  ;;  %v1430_v0 = vmul.f32 %v6084_v46, %v1416_v26 }
 0x798   :  { %v1429_v28 = vmul.f32 %v1412_v59, %v1366_v12 }
 0x79a   :  { %6102 = vmatprep.mubr.msk.f32.mxu0 %vm48_vm0, %v1429_v28 }
 0x79b   :  { %6103 = vmatmul.mubr.msk.f32.gmra.mrb[12].mxu0 %vm48_vm0, %v1430_v0 }
 0x79e   :  { %v6087_v23 = vpop.f32.mrb[6].mxu1 }
 0x79f   :  { %v1376_v9 = vpop.f32.mrb[7].mxu1  ;;  %v1432_v41 = vmul.f32 %v6087_v23, %v1424_v53 }
 0x7a0   :  { %v1431_v54 = vmul.f32 %v1420_v51, %v1376_v9 }
 0x7a2   :  { %6105 = vmatprep.mubr.msk.f32.mxu0 %vm48_vm0, %v1431_v54 }
 0x7a3   :  { %6106 = vmatmul.mubr.msk.f32.gmra.mrb[14].mxu0 %vm48_vm0, %v1432_v41 }
 0x7a4   :  { %6127 = vmatprep.mubr.msk.f32.mxu0 %vm318_vm2, %v8416_v55 }
 0x7a6   :  { %v6118_v22 = vpop.f32.mrb[8].mxu1 }
 0x7a7   :  { %v1759_v45 = vsel %vm1566_vm10, %v6118_v22, -1e+30  ;;  %v1652_v58 = vpop.f32.mrb[9].mxu1 }
 0x7a8   :  { %v1765_v39 = vsel %vm48_vm0, %v1759_v45, -inf  ;;  %v1758_v2 = vsel %vm1566_vm10, %v1652_v58, -1e+30 }
 0x7a9   :  { %v1762_v40 = vsel %vm48_vm0, %v1758_v2, -inf  ;;  %1766 = vmax.xlane.f32.xlu0 %v1765_v39 }
 0x7aa   :  { %1763 = vmax.xlane.f32.xlu1 %v1762_v40 }
 0x7bb   :  { %6930 = vrot.lane.b32.xlu1 %v8387_v29, %s7417_s4 }
 0x7bf   :  { %6935 = vrot.lane.b32.xlu1 %v8391_v35, %s7417_s4 }
 0x836   :  { %v1767_v15 = vpop.xlane.xlu0 %1766 }
 0x837   :  { %v1775_v4 = vsub.f32 %v1759_v45, %v1767_v15  ;;  %v1764_v5 = vpop.xlane.xlu1 %1763 }
 0x838   :  { %v1774_v16 = vsub.f32 %v1758_v2, %v1764_v5 }
 0x839   :  { %v1780_v49 = vmul.f32 1.442695, %v1775_v4 }
 0x83a   :  { %v1778_v50 = vmul.f32 1.442695, %v1774_v16 }
 0x83b   :  { %7241 = vpow2.f32 %v1780_v49  ;;  %v6931_v7 = vpop.permute.xlu1 %6930 }
 0x83c   :  { %v6933_v19 = vunpack.i.h.bf16 %v6931_v7  ;;  %v6932_v10 = vunpack.i.l.bf16 %v6931_v7  ;;  %7243 = vpow2.f32 %v1778_v50 }
 0x83e   :  { %v6568_v31 = vpack.c.bf16 %v6933_v19, %v6932_v10 }
 0x83f   :  { %v6936_v43 = vpop.permute.xlu1 %6935 }
 0x840   :  { %v6938_v32 = vunpack.i.h.bf16 %v6936_v43  ;;  %v6937_v37 = vunpack.i.l.bf16 %v6936_v43  ;;  %6569 = vmatprep.subr.bf16.mxu1 %v6568_v31 }
 0x841   :  { %6571 = vmatpush3.bf16.msra.mxu1 %v6568_v31 }
 0x842   :  { %v6572_v1 = vpack.c.bf16 %v6938_v32, %v6937_v37 }
 0x844   :  { %6573 = vmatprep.subr.bf16.mxu1 %v6572_v1 }
 0x845   :  { %v7242_v14 = vpop.eup %7241  ;;  %6575 = vmatpush3.bf16.msra.mxu1 %v6572_v1 }
 0x846   :  { %v1789_v30 = vsel %vm48_vm0, %v7242_v14, 0.0  ;;  %v7244_v47 = vpop.eup %7243 }
 0x847   :  { %1790 = vadd.xlane.f32.xlu1 %v1789_v30  ;;  %v1786_v63 = vsel %vm48_vm0, %v7244_v47, 0.0 }
 0x84b   :  { %1787 = vadd.xlane.f32.xlu1 %v1786_v63 }
 0x85c   :  { %6940 = vrot.lane.b32.xlu1 %v8387_v29, %s7418_s20 }
 0x860   :  { %6945 = vrot.lane.b32.xlu1 %v8391_v35, %s7418_s20 }
 0x864   :  { %2008 = vrot.lane.b32.xlu1 %v8401_v17, %s7418_s20 }
 0x868   :  { %2010 = vrot.lane.b32.xlu1 %v8409_v61, %s7418_s20 }
 0x86e   :  { %v6104_v24 = vpop.f32.mrb[12].mxu0 }
 0x86f   :  { %v1547_v52 = vpop.f32.mrb[13].mxu0 }
 0x870   :  { %v8439_v8 = vpack.i.bf16 %v6104_v24, %v1547_v52  ;;  %v6556_v3 = vpack.c.bf16 %v6104_v24, %v1547_v52 }
 0x872   :  { %6950 = vrot.lane.b32.xlu0 %v8439_v8, %s7418_s20  ;;  %6558 = vmatprep.subr.msk.bf16.mxu0 %vm8383_vm7, %v6556_v3 }
 0x873   :  { %6561 = vmatpush3.bf16.xpose.msk.msra.mxu0 %vm8383_vm7, %v6556_v3 }
 0x876   :  { %v6107_v36 = vpop.f32.mrb[14].mxu0 }
 0x877   :  { %v1557_v13 = vpop.f32.mrb[15].mxu0 }
 0x878   :  { %v6562_v38 = vpack.c.bf16 %v6107_v36, %v1557_v13  ;;  %v8446_v25 = vpack.i.bf16 %v6107_v36, %v1557_v13 }
 0x87a   :  { %6564 = vmatprep.subr.msk.bf16.mxu0 %vm8383_vm7, %v6562_v38  ;;  %6955 = vrot.lane.b32.xlu1 %v8446_v25, %s7418_s20 }
 0x87b   :  { %6567 = vmatpush3.bf16.xpose.msk.msra.mxu0 %vm8383_vm7, %v6562_v38 }
 0x87e   :  { %2107 = vrot.lane.b32.xlu1 %v8416_v55, %s7418_s20 }
 0x882   :  { %6128 = vmatmul.mubr.msk.f32.vlgmr.msra.gmra.mrb[16].mxu0 %vm318_vm2, %v8455_v44  ;;  %2109 = vrot.lane.b32.xlu1 %v8455_v44, %s7418_s20  ;;  %s7436_s20 = smov [#allocation3]  }
 0x8d4   :  { %v1791_v27 = vpop.xlane.xlu1 %1790 }
 0x8d5   :  { %7245 = vrcp.f32 %v1791_v27 }
 0x8d8   :  { %v1788_v42 = vpop.xlane.xlu1 %1787 }
 0x8d9   :  { %7247 = vrcp.f32 %v1788_v42 }
 0x8dc   :  { %v6941_v6 = vpop.permute.xlu1 %6940 }
 0x8dd   :  { %v6943_v48 = vunpack.i.h.bf16 %v6941_v6  ;;  %v6942_v20 = vunpack.i.l.bf16 %v6941_v6 }
 0x8df   :  { %v7246_v56 = vpop.eup %7245  ;;  %v6584_v21 = vpack.c.bf16 %v6943_v48, %v6942_v20 }
 0x8e0   :  { %v1803_v18 = vmul.f32 %v7246_v56, %v1791_v27  ;;  %v6946_v59 = vpop.permute.xlu1 %6945 }
 0x8e1   :  { %6586 = vmatprep.subr.msk.bf16.mxu1 %vm8383_vm7, %v6584_v21  ;;  %v6948_v28 = vunpack.i.h.bf16 %v6946_v59  ;;  %v6947_v0 = vunpack.i.l.bf16 %v6946_v59 }
 0x8e2   :  { %v1807_v33 = vsub.f32 2.0, %v1803_v18 }
 0x8e3   :  { %v7248_v11 = vpop.eup %7247  ;;  %v6590_v53 = vpack.c.bf16 %v6948_v28, %v6947_v0 }
 0x8e4   :  { %v1802_v57 = vmul.f32 %v7248_v11, %v1788_v42  ;;  %v1811_v46 = vmul.f32 %v7246_v56, %v1807_v33  ;;  %v2009_v51 = vpop.permute.xlu1 %2008  ;;  %v6951_v54 = vpop.permute.xlu0 %6950 }
 0x8e5   :  { %v6953_v22 = vunpack.i.h.bf16 %v6951_v54  ;;  %v6952_v45 = vunpack.i.l.bf16 %v6951_v54 }
 0x8e6   :  { %v1806_v26 = vsub.f32 2.0, %v1802_v57  ;;  %v1815_v9 = vmul.f32 %v7242_v14, %v1811_v46 }
 0x8e7   :  { %v6596_v58 = vpack.c.bf16 %v6953_v22, %v6952_v45 }
 0x8e8   :  { %v1810_v12 = vmul.f32 %v7248_v11, %v1806_v26  ;;  %v2011_v41 = vpop.permute.xlu1 %2010 }
 0x8ea   :  { %v1814_v23 = vmul.f32 %v7244_v47, %v1810_v12 }
 0x8ec   :  { %6138 = vmatprep.mubr.msk.f32.mxu1 %vm48_vm0, %v1814_v23  ;;  %v6956_v39 = vpop.permute.xlu1 %6955 }
 0x8ed   :  { %6139 = vmatmul.mubr.msk.f32.vlgmr.msra.gmra.mrb[10].mxu1 %vm48_vm0, %v1815_v9  ;;  %v6958_v2 = vunpack.i.h.bf16 %v6956_v39  ;;  %v6957_v40 = vunpack.i.l.bf16 %v6956_v39 }
 0x8ee   :  { %6589 = vmatpush3.bf16.xpose.msk.msra.mxu1 %vm8383_vm7, %v6584_v21  ;;  %6160 = vmatprep.mubr.msk.f32.mxu1 %vm318_vm2, %v2009_v51 }
 0x8ef   :  { %6592 = vmatprep.subr.msk.bf16.mxu1 %vm8383_vm7, %v6590_v53  ;;  %v6602_v15 = vpack.c.bf16 %v6958_v2, %v6957_v40 }
 0x8f0   :  { %v2108_v4 = vpop.permute.xlu1 %2107 }
 0x8f4   :  { %v2110_v5 = vpop.permute.xlu1 %2109 }
 0x8f6   :  { %6595 = vmatpush3.bf16.xpose.msk.msra.mxu1 %vm8383_vm7, %v6590_v53 }
 0x8f7   :  { %6598 = vmatprep.subr.msk.bf16.mxu1 %vm8383_vm7, %v6596_v58 }
 0x8fd   :  { %6161 = vmatmul.mubr.msk.f32.vlgmr.msra.gmra.mrb[12].mxu1 %vm318_vm2, %v2011_v41 }
 0x8fe   :  { %6601 = vmatpush3.bf16.xpose.msk.msra.mxu1 %vm8383_vm7, %v6596_v58  ;;  %6171 = vmatprep.mubr.msk.f32.mxu1 %vm318_vm2, %v2108_v4 }
 0x8ff   :  { %6604 = vmatprep.subr.msk.bf16.mxu1 %vm8383_vm7, %v6602_v15 }
 0x906   :  { %6607 = vmatpush3.bf16.xpose.msk.msra.mxu1 %vm8383_vm7, %v6602_v15 }
 0x90d   :  { %6172 = vmatmul.mubr.msk.f32.vlgmr.msra.gmra.mrb[14].mxu1 %vm318_vm2, %v2110_v5 }
 0x955   :  { %v6129_v16 = vpop.f32.mrb[16].mxu0 }
 0x956   :  { %v1761_v49 = vsel %vm1567_vm8, %v6129_v16, -1e+30  ;;  %v1745_v50 = vpop.f32.mrb[17].mxu0 }
 0x957   :  { %v1771_v7 = vsel %vm48_vm0, %v1761_v49, -inf  ;;  %v1760_v19 = vsel %vm1567_vm8, %v1745_v50, -1e+30 }
 0x958   :  { %v1768_v10 = vsel %vm48_vm0, %v1760_v19, -inf  ;;  %1772 = vmax.xlane.f32.xlu0 %v1771_v7 }
 0x959   :  { %1769 = vmax.xlane.f32.xlu1 %v1768_v10 }
 0x9c0   :  { %v6140_v31 = vpop.f32.mrb[10].mxu1 }
 0x9c1   :  { %2005 = vst.msk [vmem:[#allocation2 + $0x8] sm:$0xff] %vm318_vm2, %v6140_v31  ;;  %v1902_v43 = vpop.f32.mrb[11].mxu1 }
 0x9c2   :  { %2004 = vst.msk [vmem:[#allocation2] sm:$0xff] %vm318_vm2, %v1902_v43 }
 0x9d0   :  { %v6162_v32 = vpop.f32.mrb[12].mxu1 }
 0x9d1   :  { %v2098_v37 = vpop.f32.mrb[13].mxu1  ;;  %v2207_v30 = vsel %vm1566_vm10, %v6162_v32, -1e+30 }
 0x9d2   :  { %v2206_v1 = vsel %vm1566_vm10, %v2098_v37, -1e+30  ;;  %v2213_v47 = vsel %vm48_vm0, %v2207_v30, -inf }
 0x9d3   :  { %v2210_v14 = vsel %vm48_vm0, %v2206_v1, -inf }
 0x9d4   :  { %2211 = vmax.xlane.f32.xlu0 %v2210_v14 }
 0x9d8   :  { %2214 = vmax.xlane.f32.xlu0 %v2213_v47 }
 0x9e0   :  { %v6173_v63 = vpop.f32.mrb[14].mxu1 }
 0x9e1   :  { %v2209_v24 = vsel %vm1567_vm8, %v6173_v63, -1e+30  ;;  %v2197_v52 = vpop.f32.mrb[15].mxu1 }
 0x9e2   :  { %v2219_v3 = vsel %vm48_vm0, %v2209_v24, -inf  ;;  %v2208_v36 = vsel %vm1567_vm8, %v2197_v52, -1e+30 }
 0x9e3   :  { %v2216_v13 = vsel %vm48_vm0, %v2208_v36, -inf  ;;  %2220 = vmax.xlane.f32.xlu0 %v2219_v3 }
 0x9e4   :  { %2217 = vmax.xlane.f32.xlu1 %v2216_v13 }
 0x9e5   :  { %v1773_v38 = vpop.xlane.xlu0 %1772 }
 0x9e6   :  { %v1777_v27 = vsub.f32 %v1761_v49, %v1773_v38  ;;  %v1770_v42 = vpop.xlane.xlu1 %1769 }
 0x9e7   :  { %v1776_v6 = vsub.f32 %v1760_v19, %v1770_v42 }
 0x9e8   :  { %v1784_v48 = vmul.f32 1.442695, %v1777_v27 }
 0x9e9   :  { %v1782_v20 = vmul.f32 1.442695, %v1776_v6 }
 0x9ea   :  { %7249 = vpow2.f32 %v1784_v48 }
 0x9eb   :  { %7251 = vpow2.f32 %v1782_v20 }
 0x9f4   :  { %v8503_v56 = vpop.eup %7249 }
 0x9f5   :  { %v8505_v21 = vpop.eup %7251  ;;  %v1795_v18 = vsel %vm48_vm0, %v8503_v56, 0.0 }
 0x9f6   :  { %1796 = vadd.xlane.f32.xlu0 %v1795_v18  ;;  %v1792_v11 = vsel %vm48_vm0, %v8505_v21, 0.0 }
 0x9f7   :  { %1793 = vadd.xlane.f32.xlu1 %v1792_v11 }
 0xa08   :  { %6960 = vrot.lane.b32.xlu1 %v8439_v8, %s7417_s4 }
 0xa0c   :  { %6965 = vrot.lane.b32.xlu0 %v8446_v25, %s7417_s4  ;;  %6970 = vrot.lane.b32.xlu1 %v8387_v29, %s7419_s21 }
 0xa10   :  { %6985 = vrot.lane.b32.xlu0 %v8446_v25, %s7419_s21  ;;  %6975 = vrot.lane.b32.xlu1 %v8391_v35, %s7419_s21 }
 0xa14   :  { %6980 = vrot.lane.b32.xlu1 %v8439_v8, %s7419_s21  ;;  %s5591_s21 = sshll.u32 %s7436_s20, 4  ;;  %s5592_s21 = int_to_ptr.vmem [resolvable:$true] %s5591_s21 }
 0xa15   :  { %p7394_p1 = scmp.lt.s32.totalorder %s5592_s21, %s5592_s21 }
 0xa18   :  { %6990 = vrot.lane.b32.xlu1 %v8387_v29, %s7420_s22 }
 0xa61   :  { %v2212_v33 = vpop.xlane.xlu0 %2211 }
 0xa62   :  { %v2222_v57 = vsub.f32 %v2206_v1, %v2212_v33 }
 0xa64   :  { %v2226_v59 = vmul.f32 1.442695, %v2222_v57 }
 0xa65   :  { %v2215_v26 = vpop.xlane.xlu0 %2214 }
 0xa66   :  { %7253 = vpow2.f32 %v2226_v59  ;;  %v2223_v46 = vsub.f32 %v2207_v30, %v2215_v26 }
 0xa68   :  { %v2228_v12 = vmul.f32 1.442695, %v2223_v46 }
 0xa6a   :  { %7255 = vpow2.f32 %v2228_v12 }
 0xa70   :  { %v8521_v28 = vpop.eup %7253  ;;  %v2221_v0 = vpop.xlane.xlu0 %2220 }
 0xa71   :  { %v2225_v51 = vsub.f32 %v2209_v24, %v2221_v0  ;;  %v2218_v23 = vpop.xlane.xlu1 %2217  ;;  %v2234_v9 = vsel %vm48_vm0, %v8521_v28, 0.0 }
 0xa72   :  { %v2224_v53 = vsub.f32 %v2208_v36, %v2218_v23  ;;  %2235 = vadd.xlane.f32.xlu1 %v2234_v9 }
 0xa73   :  { %v2232_v54 = vmul.f32 1.442695, %v2225_v51 }
 0xa74   :  { %v8525_v41 = vpop.eup %7255  ;;  %v2230_v22 = vmul.f32 1.442695, %v2224_v53 }
 0xa75   :  { %7257 = vpow2.f32 %v2232_v54  ;;  %v2237_v45 = vsel %vm48_vm0, %v8525_v41, 0.0 }
 0xa76   :  { %7259 = vpow2.f32 %v2230_v22  ;;  %2238 = vadd.xlane.f32.xlu0 %v2237_v45 }
 0xa7f   :  { %v8529_v58 = vpop.eup %7257 }
 0xa80   :  { %v8531_v39 = vpop.eup %7259  ;;  %v2243_v2 = vsel %vm48_vm0, %v8529_v58, 0.0 }
 0xa81   :  { %2244 = vadd.xlane.f32.xlu0 %v2243_v2  ;;  %v2240_v40 = vsel %vm48_vm0, %v8531_v39, 0.0 }
 0xa82   :  { %2241 = vadd.xlane.f32.xlu1 %v2240_v40 }
 0xa83   :  { %v1797_v15 = vpop.xlane.xlu0 %1796 }
 0xa84   :  { %7261 = vrcp.f32 %v1797_v15  ;;  %v1794_v4 = vpop.xlane.xlu1 %1793 }
 0xa85   :  { %7263 = vrcp.f32 %v1794_v4 }
 0xa87   :  { %v6966_v5 = vpop.permute.xlu0 %6965 }
 0xa88   :  { %v6961_v16 = vpop.permute.xlu1 %6960  ;;  %v6968_v49 = vunpack.i.h.bf16 %v6966_v5  ;;  %v6967_v50 = vunpack.i.l.bf16 %v6966_v5 }
 0xa89   :  { %v6963_v7 = vunpack.i.h.bf16 %v6961_v16  ;;  %v6962_v19 = vunpack.i.l.bf16 %v6961_v16 }
 0xa8a   :  { %v6580_v37 = vpack.c.bf16 %v6968_v49, %v6967_v50 }
 0xa8b   :  { %v6576_v10 = vpack.c.bf16 %v6963_v7, %v6962_v19  ;;  %v6986_v27 = vpop.permute.xlu0 %6985 }
 0xa8c   :  { %v6971_v31 = vpop.permute.xlu1 %6970  ;;  %v6988_v11 = vunpack.i.h.bf16 %v6986_v27  ;;  %v6987_v33 = vunpack.i.l.bf16 %v6986_v27 }
 0xa8d   :  { %v6973_v43 = vunpack.i.h.bf16 %v6971_v31  ;;  %v6972_v32 = vunpack.i.l.bf16 %v6971_v31  ;;  %6577 = vmatprep.subr.bf16.mxu0 %v6576_v10 }
 0xa8e   :  { %v7262_v1 = vpop.eup %7261  ;;  %6579 = vmatpush3.bf16.msra.mxu0 %v6576_v10  ;;  %v6620_v51 = vpack.c.bf16 %v6988_v11, %v6987_v33 }
 0xa8f   :  { %v7264_v14 = vpop.eup %7263  ;;  %v1805_v30 = vmul.f32 %v7262_v1, %v1797_v15  ;;  %6581 = vmatprep.subr.bf16.mxu0 %v6580_v37  ;;  %v6608_v47 = vpack.c.bf16 %v6973_v43, %v6972_v32 }
 0xa90   :  { %v1804_v63 = vmul.f32 %v7264_v14, %v1794_v4  ;;  %v6976_v24 = vpop.permute.xlu1 %6975 }
 0xa91   :  { %v1809_v52 = vsub.f32 2.0, %v1805_v30  ;;  %v6978_v3 = vunpack.i.h.bf16 %v6976_v24  ;;  %v6977_v36 = vunpack.i.l.bf16 %v6976_v24  ;;  %6609 = vmatprep.subr.bf16.mxu1 %v6608_v47 }
 0xa92   :  { %v1808_v13 = vsub.f32 2.0, %v1804_v63  ;;  %6583 = vmatpush3.bf16.msra.mxu0 %v6580_v37  ;;  %6611 = vmatpush3.bf16.msra.mxu1 %v6608_v47 }
 0xa93   :  { %v1813_v38 = vmul.f32 %v7262_v1, %v1809_v52  ;;  %7000 = vrot.lane.b32.xlu1 %v8391_v35, %s7420_s22  ;;  %v6612_v42 = vpack.c.bf16 %v6978_v3, %v6977_v36 }
 0xa94   :  { %v1812_v6 = vmul.f32 %v7264_v14, %v1808_v13  ;;  %v6981_v48 = vpop.permute.xlu1 %6980 }
 0xa95   :  { %v6983_v20 = vunpack.i.h.bf16 %v6981_v48  ;;  %v6982_v18 = vunpack.i.l.bf16 %v6981_v48  ;;  %6613 = vmatprep.subr.bf16.mxu1 %v6612_v42  ;;  %v1817_v59 = vmul.f32 %v8503_v56, %v1813_v38 }
 0xa96   :  { %6615 = vmatpush3.bf16.msra.mxu1 %v6612_v42  ;;  %v1816_v57 = vmul.f32 %v8505_v21, %v1812_v6 }
 0xa97   :  { %6995 = vrot.lane.b32.xlu0 %v8439_v8, %s7420_s22  ;;  %2472 = vrot.lane.b32.xlu1 %v8401_v17, %s7420_s22  ;;  %v6616_v26 = vpack.c.bf16 %v6983_v20, %v6982_v18 }
 0xa98   :  { %6149 = vmatprep.mubr.msk.f32.mxu0 %vm48_vm0, %v1816_v57  ;;  %v6991_v46 = vpop.permute.xlu1 %6990 }
 0xa99   :  { %v6993_v12 = vunpack.i.h.bf16 %v6991_v46  ;;  %v6992_v0 = vunpack.i.l.bf16 %v6991_v46  ;;  %6150 = vmatmul.mubr.msk.f32.vlgmr.msra.gmra.mrb[18].mxu0 %vm48_vm0, %v1817_v59  ;;  %6617 = vmatprep.subr.bf16.mxu0 %v6616_v26 }
 0xa9a   :  { %6619 = vmatpush3.bf16.msra.mxu0 %v6616_v26 }
 0xa9b   :  { %v6624_v21 = vpack.c.bf16 %v6993_v12, %v6992_v0  ;;  %7005 = vrot.lane.b32.xlu0 %v8446_v25, %s7420_s22  ;;  %2571 = vrot.lane.b32.xlu1 %v8416_v55, %s7420_s22 }
 0xa9c   :  { %6621 = vmatprep.subr.bf16.mxu0 %v6620_v51 }
 0xa9d   :  { %6626 = vmatprep.subr.msk.bf16.mxu1 %vm8383_vm7, %v6624_v21 }
 0xa9e   :  { %6623 = vmatpush3.bf16.msra.mxu0 %v6620_v51 }
 0xa9f   :  { %2474 = vrot.lane.b32.xlu0 %v8409_v61, %s7420_s22 }
 0xaa3   :  { %2573 = vrot.lane.b32.xlu0 %v8455_v44, %s7420_s22 }
 0xaff   :  { %v2236_v56 = vpop.xlane.xlu1 %2235 }
 0xb00   :  { %7265 = vrcp.f32 %v2236_v56 }
 0xb03   :  { %v2239_v23 = vpop.xlane.xlu0 %2238 }
 0xb04   :  { %7267 = vrcp.f32 %v2239_v23 }
 0xb0a   :  { %v7266_v9 = vpop.eup %7265 }
 0xb0b   :  { %v2250_v53 = vmul.f32 %v7266_v9, %v2236_v56 }
 0xb0d   :  { %v2254_v54 = vsub.f32 2.0, %v2250_v53 }
 0xb0e   :  { %v7268_v22 = vpop.eup %7267  ;;  %v2245_v45 = vpop.xlane.xlu0 %2244 }
 0xb0f   :  { %v2258_v2 = vmul.f32 %v7266_v9, %v2254_v54  ;;  %v2251_v40 = vmul.f32 %v7268_v22, %v2239_v23  ;;  %7269 = vrcp.f32 %v2245_v45  ;;  %v2242_v15 = vpop.xlane.xlu1 %2241 }
 0xb10   :  { %7271 = vrcp.f32 %v2242_v15 }
 0xb11   :  { %v2255_v4 = vsub.f32 2.0, %v2251_v40  ;;  %v2262_v5 = vmul.f32 %v8521_v28, %v2258_v2 }
 0xb12   :  { %v6996_v16 = vpop.permute.xlu0 %6995 }
 0xb13   :  { %v2259_v49 = vmul.f32 %v7268_v22, %v2255_v4  ;;  %v6998_v50 = vunpack.i.h.bf16 %v6996_v16  ;;  %v6997_v7 = vunpack.i.l.bf16 %v6996_v16  ;;  %6182 = vmatprep.mubr.msk.f32.mxu1 %vm48_vm0, %v2262_v5  ;;  %v7001_v19 = vpop.permute.xlu1 %7000 }
 0xb14   :  { %v7003_v10 = vunpack.i.h.bf16 %v7001_v19  ;;  %v7002_v31 = vunpack.i.l.bf16 %v7001_v19 }
 0xb15   :  { %v2263_v43 = vmul.f32 %v8525_v41, %v2259_v49  ;;  %v6636_v32 = vpack.c.bf16 %v6998_v50, %v6997_v7 }
 0xb16   :  { %v6630_v37 = vpack.c.bf16 %v7003_v10, %v7002_v31  ;;  %v7006_v24 = vpop.permute.xlu0 %7005 }
 0xb17   :  { %v2473_v1 = vpop.permute.xlu1 %2472  ;;  %6183 = vmatmul.mubr.msk.f32.vlgmr.msra.gmra.mrb[16].mxu1 %vm48_vm0, %v2263_v43  ;;  %6638 = vmatprep.subr.msk.bf16.mxu0 %vm8383_vm7, %v6636_v32  ;;  %v7008_v36 = vunpack.i.h.bf16 %v7006_v24  ;;  %v7007_v13 = vunpack.i.l.bf16 %v7006_v24 }
 0xb18   :  { %6629 = vmatpush3.bf16.xpose.msk.msra.mxu1 %vm8383_vm7, %v6624_v21  ;;  %6204 = vmatprep.mubr.msk.f32.mxu1 %vm318_vm2, %v2473_v1 }
 0xb19   :  { %v7270_v28 = vpop.eup %7269  ;;  %6632 = vmatprep.subr.msk.bf16.mxu1 %vm8383_vm7, %v6630_v37  ;;  %v6642_v42 = vpack.c.bf16 %v7008_v36, %v7007_v13 }
 0xb1a   :  { %v7272_v14 = vpop.eup %7271  ;;  %v2253_v30 = vmul.f32 %v7270_v28, %v2245_v45  ;;  %v2475_v48 = vpop.permute.xlu0 %2474 }
 0xb1b   :  { %v2252_v41 = vmul.f32 %v7272_v14, %v2242_v15  ;;  %v2572_v6 = vpop.permute.xlu1 %2571 }
 0xb1c   :  { %v2257_v47 = vsub.f32 2.0, %v2253_v30 }
 0xb1d   :  { %v2256_v63 = vsub.f32 2.0, %v2252_v41 }
 0xb1e   :  { %v2261_v52 = vmul.f32 %v7270_v28, %v2257_v47 }
 0xb1f   :  { %v2260_v3 = vmul.f32 %v7272_v14, %v2256_v63 }
 0xb20   :  { %6635 = vmatpush3.bf16.xpose.msk.msra.mxu1 %vm8383_vm7, %v6630_v37  ;;  %v2265_v27 = vmul.f32 %v8529_v58, %v2261_v52  ;;  %v2574_v58 = vpop.permute.xlu0 %2573 }
 0xb21   :  { %v2264_v38 = vmul.f32 %v8531_v39, %v2260_v3 }
 0xb23   :  { %6193 = vmatprep.mubr.msk.f32.mxu0 %vm48_vm0, %v2264_v38 }
 0xb24   :  { %6194 = vmatmul.mubr.msk.f32.vlgmr.msra.gmra.mrb[20].mxu0 %vm48_vm0, %v2265_v27 }
 0xb25   :  { %6641 = vmatpush3.bf16.xpose.msk.msra.mxu0 %vm8383_vm7, %v6636_v32  ;;  %6215 = vmatprep.mubr.msk.f32.mxu0 %vm318_vm2, %v2572_v6 }
 0xb26   :  { %6644 = vmatprep.subr.msk.bf16.mxu0 %vm8383_vm7, %v6642_v42 }
 0xb27   :  { %6205 = vmatmul.mubr.msk.f32.vlgmr.msra.gmra.mrb[18].mxu1 %vm318_vm2, %v2475_v48 }
 0xb2d   :  { %6647 = vmatpush3.bf16.xpose.msk.msra.mxu0 %vm8383_vm7, %v6642_v42 }
 0xb34   :  { %6216 = vmatmul.mubr.msk.f32.vlgmr.msra.gmra.mrb[22].mxu0 %vm318_vm2, %v2574_v58 }
 0xb6c   :  { %v6151_v39 = vpop.f32.mrb[18].mxu0 }
 0xb6d   :  { %2007 = vst.msk [vmem:[#allocation2 + $0x18] sm:$0xff] %vm318_vm2, %v6151_v39  ;;  %v1995_v20 = vpop.f32.mrb[19].mxu0 }
 0xb6e   :  { %2006 = vst.msk [vmem:[#allocation2 + $0x10] sm:$0xff] %vm318_vm2, %v1995_v20 }
 0xbea   :  { %v8585_v18 = vpop.f32.mrb[16].mxu1 }
 0xbeb   :  { %v8587_v11 = vpop.f32.mrb[17].mxu1 }
 0xbf7   :  { %v8589_v33 = vpop.f32.mrb[20].mxu0 }
 0xbf8   :  { %v8591_v57 = vpop.f32.mrb[21].mxu0 }
 0xbfa   :  { %v6206_v59 = vpop.f32.mrb[18].mxu1 }
 0xbfb   :  { %v2671_v26 = vsel %vm1566_vm10, %v6206_v59, -1e+30  ;;  %v2562_v46 = vpop.f32.mrb[19].mxu1 }
 0xbfc   :  { %v2677_v12 = vsel %vm48_vm0, %v2671_v26, -inf  ;;  %v2670_v0 = vsel %vm1566_vm10, %v2562_v46, -1e+30 }
 0xbfd   :  { %v2674_v51 = vsel %vm48_vm0, %v2670_v0, -inf  ;;  %2678 = vmax.xlane.f32.xlu0 %v2677_v12 }
 0xbfe   :  { %2675 = vmax.xlane.f32.xlu1 %v2674_v51 }
 0xc07   :  { %v6217_v21 = vpop.f32.mrb[22].mxu0 }
 0xc08   :  { %v2661_v56 = vpop.f32.mrb[23].mxu0  ;;  %v2673_v53 = vsel %vm1567_vm8, %v6217_v21, -1e+30 }
 0xc09   :  { %v2672_v23 = vsel %vm1567_vm8, %v2661_v56, -1e+30  ;;  %v2683_v54 = vsel %vm48_vm0, %v2673_v53, -inf }
 0xc0a   :  { %v2680_v9 = vsel %vm48_vm0, %v2672_v23, -inf }
 0xc0b   :  { %2681 = vmax.xlane.f32.xlu0 %v2680_v9 }
 0xc0f   :  { %7010 = vrot.lane.b32.xlu1 %v8387_v29, %s7421_s3  ;;  %2684 = vmax.xlane.f32.xlu0 %v2683_v54 }
 0xc13   :  { %7020 = vrot.lane.b32.xlu1 %v8439_v8, %s7421_s3 }
 0xc17   :  { %7025 = vrot.lane.b32.xlu1 %v8446_v25, %s7421_s3 }
 0xc1b   :  { %7030 = vrot.lane.b32.xlu1 %v8387_v29, %s7422_s23 }
 0xc25   :  { %7015 = vrot.lane.b32.xlu0 %v8391_v35, %s7421_s3 }
 0xc8a   :  { %v2679_v22 = vpop.xlane.xlu0 %2678 }
 0xc8b   :  { %v2687_v45 = vsub.f32 %v2671_v26, %v2679_v22  ;;  %v2676_v2 = vpop.xlane.xlu1 %2675 }
 0xc8c   :  { %v2686_v40 = vsub.f32 %v2670_v0, %v2676_v2 }
 0xc8d   :  { %v2692_v15 = vmul.f32 1.442695, %v2687_v45 }
 0xc8e   :  { %v2690_v4 = vmul.f32 1.442695, %v2686_v40 }
 0xc8f   :  { %7273 = vpow2.f32 %v2692_v15  ;;  %v7011_v5 = vpop.permute.xlu1 %7010 }
 0xc90   :  { %7275 = vpow2.f32 %v2690_v4  ;;  %v7013_v16 = vunpack.i.h.bf16 %v7011_v5  ;;  %v7012_v49 = vunpack.i.l.bf16 %v7011_v5 }
 0xc92   :  { %v6648_v50 = vpack.c.bf16 %v7013_v16, %v7012_v49 }
 0xc93   :  { %v7021_v7 = vpop.permute.xlu1 %7020 }
 0xc94   :  { %v7023_v19 = vunpack.i.h.bf16 %v7021_v7  ;;  %v7022_v10 = vunpack.i.l.bf16 %v7021_v7  ;;  %6649 = vmatprep.subr.bf16.mxu1 %v6648_v50 }
 0xc95   :  { %6651 = vmatpush3.bf16.msra.mxu1 %v6648_v50 }
 0xc96   :  { %v6656_v31 = vpack.c.bf16 %v7023_v19, %v7022_v10 }
 0xc97   :  { %v7026_v43 = vpop.permute.xlu1 %7025 }
 0xc98   :  { %v7028_v32 = vunpack.i.h.bf16 %v7026_v43  ;;  %v7027_v37 = vunpack.i.l.bf16 %v7026_v43  ;;  %6657 = vmatprep.subr.bf16.mxu0 %v6656_v31  ;;  %v2682_v1 = vpop.xlane.xlu0 %2681 }
 0xc99   :  { %v7274_v28 = vpop.eup %7273  ;;  %v2688_v14 = vsub.f32 %v2672_v23, %v2682_v1  ;;  %6659 = vmatpush3.bf16.msra.mxu0 %v6656_v31 }
 0xc9a   :  { %v7276_v30 = vpop.eup %7275  ;;  %v2701_v41 = vsel %vm48_vm0, %v7274_v28, 0.0  ;;  %v6660_v47 = vpack.c.bf16 %v7028_v32, %v7027_v37 }
 0xc9b   :  { %v2694_v63 = vmul.f32 1.442695, %v2688_v14  ;;  %2702 = vadd.xlane.f32.xlu0 %v2701_v41  ;;  %v2698_v24 = vsel %vm48_vm0, %v7276_v30, 0.0  ;;  %v7031_v3 = vpop.permute.xlu1 %7030 }
 0xc9c   :  { %2699 = vadd.xlane.f32.xlu1 %v2698_v24  ;;  %6661 = vmatprep.subr.bf16.mxu0 %v6660_v47  ;;  %v2685_v52 = vpop.xlane.xlu0 %2684  ;;  %v7033_v38 = vunpack.i.h.bf16 %v7031_v3  ;;  %v7032_v42 = vunpack.i.l.bf16 %v7031_v3 }
 0xc9d   :  { %7277 = vpow2.f32 %v2694_v63  ;;  %v2689_v36 = vsub.f32 %v2673_v53, %v2685_v52  ;;  %6663 = vmatpush3.bf16.msra.mxu0 %v6660_v47 }
 0xc9e   :  { %v6664_v39 = vpack.c.bf16 %v7033_v38, %v7032_v42 }
 0xc9f   :  { %v2696_v13 = vmul.f32 1.442695, %v2689_v36 }
 0xca0   :  { %v7016_v27 = vpop.permute.xlu0 %7015 }
 0xca1   :  { %7279 = vpow2.f32 %v2696_v13  ;;  %v7018_v6 = vunpack.i.h.bf16 %v7016_v27  ;;  %v7017_v48 = vunpack.i.l.bf16 %v7016_v27 }
 0xca3   :  { %v6652_v58 = vpack.c.bf16 %v7018_v6, %v7017_v48 }
 0xca5   :  { %6653 = vmatprep.subr.bf16.mxu1 %v6652_v58 }
 0xca6   :  { %6655 = vmatpush3.bf16.msra.mxu1 %v6652_v58 }
 0xca7   :  { %v7278_v20 = vpop.eup %7277  ;;  %6666 = vmatprep.subr.msk.bf16.mxu1 %vm8383_vm7, %v6664_v39 }
 0xca8   :  { %v2704_v59 = vsel %vm48_vm0, %v7278_v20, 0.0 }
 0xca9   :  { %2705 = vadd.xlane.f32.xlu1 %v2704_v59 }
 0xcab   :  { %v7280_v26 = vpop.eup %7279 }
 0xcac   :  { %v2707_v46 = vsel %vm48_vm0, %v7280_v26, 0.0 }
 0xcad   :  { %2708 = vadd.xlane.f32.xlu0 %v2707_v46 }
 0xcba   :  { %7040 = vrot.lane.b32.xlu1 %v8391_v35, %s7422_s23 }
 0xcbe   :  { %2936 = vrot.lane.b32.xlu1 %v8401_v17, %s7422_s23 }
 0xcc2   :  { %3035 = vrot.lane.b32.xlu1 %v8416_v55, %s7422_s23 }
 0xcc3   :  { %7035 = vrot.lane.b32.xlu0 %v8439_v8, %s7422_s23 }
 0xcc7   :  { %7045 = vrot.lane.b32.xlu0 %v8446_v25, %s7422_s23 }
 0xccb   :  { %2938 = vrot.lane.b32.xlu0 %v8409_v61, %s7422_s23 }
 0xccf   :  { %3037 = vrot.lane.b32.xlu0 %v8455_v44, %s7422_s23 }
 0xd28   :  { %v2703_v12 = vpop.xlane.xlu0 %2702 }
 0xd29   :  { %7281 = vrcp.f32 %v2703_v12  ;;  %v2700_v0 = vpop.xlane.xlu1 %2699 }
 0xd2a   :  { %7283 = vrcp.f32 %v2700_v0 }
 0xd33   :  { %v7282_v51 = vpop.eup %7281 }
 0xd34   :  { %v7284_v21 = vpop.eup %7283  ;;  %v2715_v56 = vmul.f32 %v7282_v51, %v2703_v12 }
 0xd35   :  { %v2714_v23 = vmul.f32 %v7284_v21, %v2700_v0 }
 0xd36   :  { %v2719_v9 = vsub.f32 2.0, %v2715_v56  ;;  %v2706_v53 = vpop.xlane.xlu1 %2705 }
 0xd37   :  { %v2718_v54 = vsub.f32 2.0, %v2714_v23  ;;  %7285 = vrcp.f32 %v2706_v53 }
 0xd38   :  { %v2723_v22 = vmul.f32 %v7282_v51, %v2719_v9 }
 0xd39   :  { %v2722_v45 = vmul.f32 %v7284_v21, %v2718_v54 }
 0xd3a   :  { %v7041_v2 = vpop.permute.xlu1 %7040  ;;  %v2709_v40 = vpop.xlane.xlu0 %2708  ;;  %v2727_v16 = vmul.f32 %v7274_v28, %v2723_v22 }
 0xd3b   :  { %v7043_v15 = vunpack.i.h.bf16 %v7041_v2  ;;  %v7042_v4 = vunpack.i.l.bf16 %v7041_v2  ;;  %7287 = vrcp.f32 %v2709_v40  ;;  %v2726_v5 = vmul.f32 %v7276_v30, %v2722_v45 }
 0xd3d   :  { %v6670_v49 = vpack.c.bf16 %v7043_v15, %v7042_v4  ;;  %6226 = vmatprep.mubr.msk.f32.mxu1 %vm48_vm0, %v2726_v5 }
 0xd3e   :  { %v2937_v50 = vpop.permute.xlu1 %2936  ;;  %v7036_v7 = vpop.permute.xlu0 %7035  ;;  %6227 = vmatmul.mubr.msk.f32.vlgmr.msra.gmra.mrb[20].mxu1 %vm48_vm0, %v2727_v16 }
 0xd3f   :  { %v7038_v19 = vunpack.i.h.bf16 %v7036_v7  ;;  %v7037_v10 = vunpack.i.l.bf16 %v7036_v7  ;;  %6669 = vmatpush3.bf16.xpose.msk.msra.mxu1 %vm8383_vm7, %v6664_v39  ;;  %6248 = vmatprep.mubr.msk.f32.mxu1 %vm318_vm2, %v2937_v50 }
 0xd40   :  { %6672 = vmatprep.subr.msk.bf16.mxu1 %vm8383_vm7, %v6670_v49 }
 0xd41   :  { %v7286_v31 = vpop.eup %7285  ;;  %v6676_v43 = vpack.c.bf16 %v7038_v19, %v7037_v10 }
 0xd42   :  { %v2716_v32 = vmul.f32 %v7286_v31, %v2706_v53  ;;  %v7046_v30 = vpop.permute.xlu0 %7045  ;;  %v3036_v13 = vpop.permute.xlu1 %3035 }
 0xd43   :  { %6678 = vmatprep.subr.msk.bf16.mxu0 %vm8383_vm7, %v6676_v43  ;;  %v7048_v24 = vunpack.i.h.bf16 %v7046_v30  ;;  %v7047_v52 = vunpack.i.l.bf16 %v7046_v30 }
 0xd44   :  { %v2720_v37 = vsub.f32 2.0, %v2716_v32 }
 0xd45   :  { %v7288_v1 = vpop.eup %7287  ;;  %v6682_v38 = vpack.c.bf16 %v7048_v24, %v7047_v52 }
 0xd46   :  { %v2724_v28 = vmul.f32 %v7286_v31, %v2720_v37  ;;  %v2717_v14 = vmul.f32 %v7288_v1, %v2709_v40  ;;  %v2939_v36 = vpop.permute.xlu0 %2938 }
 0xd47   :  { %6675 = vmatpush3.bf16.xpose.msk.msra.mxu1 %vm8383_vm7, %v6670_v49 }
 0xd48   :  { %v2721_v41 = vsub.f32 2.0, %v2717_v14  ;;  %v2728_v47 = vmul.f32 %v7278_v20, %v2724_v28 }
 0xd4a   :  { %v2725_v63 = vmul.f32 %v7288_v1, %v2721_v41  ;;  %6237 = vmatprep.mubr.msk.f32.mxu0 %vm48_vm0, %v2728_v47  ;;  %v3038_v27 = vpop.permute.xlu0 %3037 }
 0xd4c   :  { %v2729_v3 = vmul.f32 %v7280_v26, %v2725_v63 }
 0xd4e   :  { %6249 = vmatmul.mubr.msk.f32.vlgmr.msra.gmra.mrb[22].mxu1 %vm318_vm2, %v2939_v36  ;;  %6238 = vmatmul.mubr.msk.f32.vlgmr.msra.gmra.mrb[24].mxu0 %vm48_vm0, %v2729_v3 }
 0xd4f   :  { %6681 = vmatpush3.bf16.xpose.msk.msra.mxu0 %vm8383_vm7, %v6676_v43  ;;  %6259 = vmatprep.mubr.msk.f32.mxu0 %vm318_vm2, %v3036_v13 }
 0xd50   :  { %6684 = vmatprep.subr.msk.bf16.mxu0 %vm8383_vm7, %v6682_v38 }
 0xd57   :  { %6687 = vmatpush3.bf16.xpose.msk.msra.mxu0 %vm8383_vm7, %v6682_v38 }
 0xd5e   :  { %6260 = vmatmul.mubr.msk.f32.vlgmr.msra.gmra.mrb[26].mxu0 %vm318_vm2, %v3038_v27 }
 0xe11   :  { %v8653_v42 = vpop.f32.mrb[20].mxu1 }
 0xe12   :  { %v8655_v6 = vpop.f32.mrb[21].mxu1 }
 0xe21   :  { %v6250_v48 = vpop.f32.mrb[22].mxu1  ;;  %v8657_v58 = vpop.f32.mrb[24].mxu0 }
 0xe22   :  { %v3135_v39 = vsel %vm1566_vm10, %v6250_v48, -1e+30  ;;  %v3026_v20 = vpop.f32.mrb[23].mxu1  ;;  %v8661_v59 = vpop.f32.mrb[25].mxu0 }
 0xe23   :  { %v3141_v26 = vsel %vm48_vm0, %v3135_v39, -inf  ;;  %v3134_v46 = vsel %vm1566_vm10, %v3026_v20, -1e+30 }
 0xe24   :  { %v3138_v12 = vsel %vm48_vm0, %v3134_v46, -inf  ;;  %3142 = vmax.xlane.f32.xlu0 %v3141_v26 }
 0xe25   :  { %3139 = vmax.xlane.f32.xlu1 %v3138_v12 }
 0xe31   :  { %v6261_v0 = vpop.f32.mrb[26].mxu0 }
 0xe32   :  { %v3125_v51 = vpop.f32.mrb[27].mxu0  ;;  %v3137_v23 = vsel %vm1567_vm8, %v6261_v0, -1e+30 }
 0xe33   :  { %v3136_v21 = vsel %vm1567_vm8, %v3125_v51, -1e+30  ;;  %v3147_v9 = vsel %vm48_vm0, %v3137_v23, -inf }
 0xe34   :  { %v3144_v56 = vsel %vm48_vm0, %v3136_v21, -inf }
 0xe35   :  { %3145 = vmax.xlane.f32.xlu0 %v3144_v56 }
 0xe36   :  { %7050 = vrot.lane.b32.xlu1 %v8387_v29, %s7423_s24 }
 0xe39   :  { %3148 = vmax.xlane.f32.xlu0 %v3147_v9 }
 0xe3a   :  { %7060 = vrot.lane.b32.xlu1 %v8439_v8, %s7423_s24 }
 0xe3e   :  { %7065 = vrot.lane.b32.xlu1 %v8446_v25, %s7423_s24 }
 0xe42   :  { %7070 = vrot.lane.b32.xlu1 %v8387_v29, %s7424_s25 }
 0xe4f   :  { %7055 = vrot.lane.b32.xlu0 %v8391_v35, %s7423_s24 }
 0xeb1   :  { %v3143_v53 = vpop.xlane.xlu0 %3142 }
 0xeb2   :  { %v3151_v54 = vsub.f32 %v3135_v39, %v3143_v53  ;;  %v3140_v22 = vpop.xlane.xlu1 %3139 }
 0xeb3   :  { %v3150_v45 = vsub.f32 %v3134_v46, %v3140_v22 }
 0xeb4   :  { %v3156_v2 = vmul.f32 1.442695, %v3151_v54 }
 0xeb5   :  { %v3154_v40 = vmul.f32 1.442695, %v3150_v45 }
 0xeb6   :  { %7289 = vpow2.f32 %v3156_v2  ;;  %v7051_v15 = vpop.permute.xlu1 %7050 }
 0xeb7   :  { %7291 = vpow2.f32 %v3154_v40  ;;  %v7053_v4 = vunpack.i.h.bf16 %v7051_v15  ;;  %v7052_v5 = vunpack.i.l.bf16 %v7051_v15 }
 0xeb9   :  { %v6688_v16 = vpack.c.bf16 %v7053_v4, %v7052_v5 }
 0xeba   :  { %v7061_v49 = vpop.permute.xlu1 %7060 }
 0xebb   :  { %v7063_v50 = vunpack.i.h.bf16 %v7061_v49  ;;  %v7062_v7 = vunpack.i.l.bf16 %v7061_v49  ;;  %6689 = vmatprep.subr.bf16.mxu1 %v6688_v16 }
 0xebc   :  { %6691 = vmatpush3.bf16.msra.mxu1 %v6688_v16 }
 0xebd   :  { %v6696_v19 = vpack.c.bf16 %v7063_v50, %v7062_v7 }
 0xebe   :  { %v7066_v10 = vpop.permute.xlu1 %7065 }
 0xebf   :  { %v7068_v31 = vunpack.i.h.bf16 %v7066_v10  ;;  %v7067_v43 = vunpack.i.l.bf16 %v7066_v10  ;;  %6697 = vmatprep.subr.bf16.mxu0 %v6696_v19 }
 0xec0   :  { %v7290_v32 = vpop.eup %7289  ;;  %6699 = vmatpush3.bf16.msra.mxu0 %v6696_v19 }
 0xec1   :  { %v7292_v37 = vpop.eup %7291  ;;  %v3165_v1 = vsel %vm48_vm0, %v7290_v32, 0.0  ;;  %v6700_v28 = vpack.c.bf16 %v7068_v31, %v7067_v43 }
 0xec2   :  { %3166 = vadd.xlane.f32.xlu0 %v3165_v1  ;;  %v3146_v14 = vpop.xlane.xlu0 %3145  ;;  %v3162_v30 = vsel %vm48_vm0, %v7292_v37, 0.0  ;;  %v7071_v24 = vpop.permute.xlu1 %7070 }
 0xec3   :  { %v3152_v41 = vsub.f32 %v3136_v21, %v3146_v14  ;;  %3163 = vadd.xlane.f32.xlu1 %v3162_v30  ;;  %6701 = vmatprep.subr.bf16.mxu0 %v6700_v28  ;;  %v7073_v36 = vunpack.i.h.bf16 %v7071_v24  ;;  %v7072_v38 = vunpack.i.l.bf16 %v7071_v24 }
 0xec4   :  { %6703 = vmatpush3.bf16.msra.mxu0 %v6700_v28 }
 0xec5   :  { %v3158_v47 = vmul.f32 1.442695, %v3152_v41  ;;  %v6704_v20 = vpack.c.bf16 %v7073_v36, %v7072_v38 }
 0xec6   :  { %v3149_v63 = vpop.xlane.xlu0 %3148 }
 0xec7   :  { %7293 = vpow2.f32 %v3158_v47  ;;  %v3153_v52 = vsub.f32 %v3137_v23, %v3149_v63 }
 0xec9   :  { %v3160_v3 = vmul.f32 1.442695, %v3153_v52 }
 0xeca   :  { %v7056_v13 = vpop.permute.xlu0 %7055 }
 0xecb   :  { %7295 = vpow2.f32 %v3160_v3  ;;  %v7058_v27 = vunpack.i.h.bf16 %v7056_v13  ;;  %v7057_v48 = vunpack.i.l.bf16 %v7056_v13 }
 0xecd   :  { %v6692_v39 = vpack.c.bf16 %v7058_v27, %v7057_v48 }
 0xecf   :  { %6693 = vmatprep.subr.bf16.mxu1 %v6692_v39 }
 0xed0   :  { %6695 = vmatpush3.bf16.msra.mxu1 %v6692_v39 }
 0xed1   :  { %v7294_v26 = vpop.eup %7293  ;;  %6706 = vmatprep.subr.msk.bf16.mxu1 %vm8383_vm7, %v6704_v20 }
 0xed2   :  { %v3168_v46 = vsel %vm48_vm0, %v7294_v26, 0.0 }
 0xed3   :  { %3169 = vadd.xlane.f32.xlu1 %v3168_v46 }
 0xed5   :  { %v7296_v12 = vpop.eup %7295 }
 0xed6   :  { %v3171_v0 = vsel %vm48_vm0, %v7296_v12, 0.0 }
 0xed7   :  { %3172 = vadd.xlane.f32.xlu0 %v3171_v0 }
 0xee4   :  { %7080 = vrot.lane.b32.xlu1 %v8391_v35, %s7424_s25 }
 0xee8   :  { %3400 = vrot.lane.b32.xlu1 %v8401_v17, %s7424_s25 }
 0xeec   :  { %3499 = vrot.lane.b32.xlu1 %v8416_v55, %s7424_s25 }
 0xeed   :  { %7075 = vrot.lane.b32.xlu0 %v8439_v8, %s7424_s25 }
 0xef1   :  { %7085 = vrot.lane.b32.xlu0 %v8446_v25, %s7424_s25 }
 0xef5   :  { %3402 = vrot.lane.b32.xlu0 %v8409_v61, %s7424_s25 }
 0xef9   :  { %3501 = vrot.lane.b32.xlu0 %v8455_v44, %s7424_s25 }
 0xf4f   :  { %v3167_v51 = vpop.xlane.xlu0 %3166 }
 0xf50   :  { %7297 = vrcp.f32 %v3167_v51  ;;  %v3164_v21 = vpop.xlane.xlu1 %3163 }
 0xf51   :  { %7299 = vrcp.f32 %v3164_v21 }
 0xf5a   :  { %v7298_v56 = vpop.eup %7297 }
 0xf5b   :  { %v7300_v23 = vpop.eup %7299  ;;  %v3179_v9 = vmul.f32 %v7298_v56, %v3167_v51 }
 0xf5c   :  { %v3178_v53 = vmul.f32 %v7300_v23, %v3164_v21 }
 0xf5d   :  { %v3183_v54 = vsub.f32 2.0, %v3179_v9 }
 0xf5e   :  { %v3182_v22 = vsub.f32 2.0, %v3178_v53 }
 0xf5f   :  { %v3187_v45 = vmul.f32 %v7298_v56, %v3183_v54 }
 0xf60   :  { %v3186_v2 = vmul.f32 %v7300_v23, %v3182_v22  ;;  %v3170_v40 = vpop.xlane.xlu1 %3169 }
 0xf61   :  { %7301 = vrcp.f32 %v3170_v40  ;;  %v3191_v4 = vmul.f32 %v7290_v32, %v3187_v45 }
 0xf62   :  { %v3190_v15 = vmul.f32 %v7292_v37, %v3186_v2 }
 0xf64   :  { %v3173_v5 = vpop.xlane.xlu0 %3172  ;;  %6270 = vmatprep.mubr.msk.f32.mxu1 %vm48_vm0, %v3190_v15  ;;  %v7081_v16 = vpop.permute.xlu1 %7080 }
 0xf65   :  { %7303 = vrcp.f32 %v3173_v5  ;;  %v7083_v49 = vunpack.i.h.bf16 %v7081_v16  ;;  %v7082_v50 = vunpack.i.l.bf16 %v7081_v16  ;;  %6271 = vmatmul.mubr.msk.f32.vlgmr.msra.gmra.mrb[24].mxu1 %vm48_vm0, %v3191_v4 }
 0xf66   :  { %6709 = vmatpush3.bf16.xpose.msk.msra.mxu1 %vm8383_vm7, %v6704_v20 }
 0xf67   :  { %v6710_v7 = vpack.c.bf16 %v7083_v49, %v7082_v50 }
 0xf68   :  { %v7076_v19 = vpop.permute.xlu0 %7075  ;;  %v3401_v10 = vpop.permute.xlu1 %3400 }
 0xf69   :  { %v7078_v31 = vunpack.i.h.bf16 %v7076_v19  ;;  %v7077_v43 = vunpack.i.l.bf16 %v7076_v19  ;;  %6712 = vmatprep.subr.msk.bf16.mxu1 %vm8383_vm7, %v6710_v7  ;;  %6292 = vmatprep.mubr.msk.f32.mxu1 %vm318_vm2, %v3401_v10 }
 0xf6b   :  { %v7302_v32 = vpop.eup %7301  ;;  %v6716_v37 = vpack.c.bf16 %v7078_v31, %v7077_v43 }
 0xf6c   :  { %v3180_v1 = vmul.f32 %v7302_v32, %v3170_v40  ;;  %v7086_v14 = vpop.permute.xlu0 %7085  ;;  %v3500_v48 = vpop.permute.xlu1 %3499 }
 0xf6d   :  { %6718 = vmatprep.subr.msk.bf16.mxu0 %vm8383_vm7, %v6716_v37  ;;  %v7088_v3 = vunpack.i.h.bf16 %v7086_v14  ;;  %v7087_v36 = vunpack.i.l.bf16 %v7086_v14 }
 0xf6e   :  { %v3184_v28 = vsub.f32 2.0, %v3180_v1  ;;  %6715 = vmatpush3.bf16.xpose.msk.msra.mxu1 %vm8383_vm7, %v6710_v7 }
 0xf6f   :  { %v7304_v30 = vpop.eup %7303  ;;  %v6722_v27 = vpack.c.bf16 %v7088_v3, %v7087_v36 }
 0xf70   :  { %v3188_v41 = vmul.f32 %v7302_v32, %v3184_v28  ;;  %v3181_v47 = vmul.f32 %v7304_v30, %v3173_v5  ;;  %v3403_v13 = vpop.permute.xlu0 %3402 }
 0xf72   :  { %v3185_v63 = vsub.f32 2.0, %v3181_v47  ;;  %v3192_v24 = vmul.f32 %v7294_v26, %v3188_v41 }
 0xf74   :  { %v3189_v52 = vmul.f32 %v7304_v30, %v3185_v63  ;;  %6281 = vmatprep.mubr.msk.f32.mxu0 %vm48_vm0, %v3192_v24  ;;  %v3502_v39 = vpop.permute.xlu0 %3501 }
 0xf75   :  { %6293 = vmatmul.mubr.msk.f32.vlgmr.msra.gmra.mrb[26].mxu1 %vm318_vm2, %v3403_v13 }
 0xf76   :  { %v3193_v38 = vmul.f32 %v7296_v12, %v3189_v52 }
 0xf78   :  { %6282 = vmatmul.mubr.msk.f32.vlgmr.msra.gmra.mrb[28].mxu0 %vm48_vm0, %v3193_v38 }
 0xf79   :  { %6721 = vmatpush3.bf16.xpose.msk.msra.mxu0 %vm8383_vm7, %v6716_v37  ;;  %6303 = vmatprep.mubr.msk.f32.mxu0 %vm318_vm2, %v3500_v48 }
 0xf7a   :  { %6724 = vmatprep.subr.msk.bf16.mxu0 %vm8383_vm7, %v6722_v27 }
 0xf81   :  { %6727 = vmatpush3.bf16.xpose.msk.msra.mxu0 %vm8383_vm7, %v6722_v27 }
 0xf88   :  { %6304 = vmatmul.mubr.msk.f32.vlgmr.msra.gmra.mrb[30].mxu0 %vm318_vm2, %v3502_v39 }
0x1038   :  { %v8721_v20 = vpop.f32.mrb[24].mxu1 }
0x1039   :  { %v8723_v26 = vpop.f32.mrb[25].mxu1 }
0x1048   :  { %v6294_v46 = vpop.f32.mrb[26].mxu1 }
0x1049   :  { %v3599_v12 = vsel %vm1566_vm10, %v6294_v46, -1e+30  ;;  %v3490_v0 = vpop.f32.mrb[27].mxu1 }
0x104a   :  { %v3605_v51 = vsel %vm48_vm0, %v3599_v12, -inf  ;;  %v3598_v21 = vsel %vm1566_vm10, %v3490_v0, -1e+30 }
0x104b   :  { %v3602_v56 = vsel %vm48_vm0, %v3598_v21, -inf  ;;  %3606 = vmax.xlane.f32.xlu0 %v3605_v51  ;;  %v8731_v23 = vpop.f32.mrb[28].mxu0 }
0x104c   :  { %3603 = vmax.xlane.f32.xlu1 %v3602_v56  ;;  %v8733_v9 = vpop.f32.mrb[29].mxu0 }
0x105b   :  { %v6305_v53 = vpop.f32.mrb[30].mxu0 }
0x105c   :  { %v3589_v54 = vpop.f32.mrb[31].mxu0  ;;  %v3601_v2 = vsel %vm1567_vm8, %v6305_v53, -1e+30 }
0x105d   :  { %v3600_v22 = vsel %vm1567_vm8, %v3589_v54, -1e+30  ;;  %7090 = vrot.lane.b32.xlu1 %v8387_v29, %s7425_s5  ;;  %v3611_v40 = vsel %vm48_vm0, %v3601_v2, -inf }
0x105e   :  { %v3608_v45 = vsel %vm48_vm0, %v3600_v22, -inf }
0x105f   :  { %3609 = vmax.xlane.f32.xlu0 %v3608_v45 }
0x1061   :  { %7100 = vrot.lane.b32.xlu1 %v8439_v8, %s7425_s5 }
0x1063   :  { %3612 = vmax.xlane.f32.xlu0 %v3611_v40 }
0x1065   :  { %7105 = vrot.lane.b32.xlu1 %v8446_v25, %s7425_s5 }
0x1069   :  { %7110 = vrot.lane.b32.xlu1 %v8387_v29, %s7426_s26 }
0x1079   :  { %7095 = vrot.lane.b32.xlu0 %v8391_v35, %s7425_s5 }
0x10d8   :  { %v3607_v15 = vpop.xlane.xlu0 %3606 }
0x10d9   :  { %v3615_v4 = vsub.f32 %v3599_v12, %v3607_v15  ;;  %v3604_v5 = vpop.xlane.xlu1 %3603 }
0x10da   :  { %v3614_v16 = vsub.f32 %v3598_v21, %v3604_v5 }
0x10db   :  { %v3620_v49 = vmul.f32 1.442695, %v3615_v4 }
0x10dc   :  { %v3618_v50 = vmul.f32 1.442695, %v3614_v16 }
0x10dd   :  { %7305 = vpow2.f32 %v3620_v49  ;;  %v7091_v7 = vpop.permute.xlu1 %7090 }
0x10de   :  { %7307 = vpow2.f32 %v3618_v50  ;;  %v7093_v19 = vunpack.i.h.bf16 %v7091_v7  ;;  %v7092_v10 = vunpack.i.l.bf16 %v7091_v7 }
0x10e0   :  { %v6728_v31 = vpack.c.bf16 %v7093_v19, %v7092_v10 }
0x10e1   :  { %v7101_v43 = vpop.permute.xlu1 %7100 }
0x10e2   :  { %v7103_v32 = vunpack.i.h.bf16 %v7101_v43  ;;  %v7102_v37 = vunpack.i.l.bf16 %v7101_v43  ;;  %6729 = vmatprep.subr.bf16.mxu1 %v6728_v31 }
0x10e3   :  { %6731 = vmatpush3.bf16.msra.mxu1 %v6728_v31 }
0x10e4   :  { %v6736_v1 = vpack.c.bf16 %v7103_v32, %v7102_v37 }
0x10e5   :  { %v7106_v28 = vpop.permute.xlu1 %7105 }
0x10e6   :  { %v7108_v14 = vunpack.i.h.bf16 %v7106_v28  ;;  %v7107_v30 = vunpack.i.l.bf16 %v7106_v28  ;;  %6737 = vmatprep.subr.bf16.mxu0 %v6736_v1 }
0x10e7   :  { %v7306_v41 = vpop.eup %7305  ;;  %6739 = vmatpush3.bf16.msra.mxu0 %v6736_v1 }
0x10e8   :  { %v7308_v47 = vpop.eup %7307  ;;  %v3629_v63 = vsel %vm48_vm0, %v7306_v41, 0.0  ;;  %v6740_v24 = vpack.c.bf16 %v7108_v14, %v7107_v30 }
0x10e9   :  { %3630 = vadd.xlane.f32.xlu0 %v3629_v63  ;;  %v3626_v52 = vsel %vm48_vm0, %v7308_v47, 0.0  ;;  %v7111_v27 = vpop.permute.xlu1 %7110 }
0x10ea   :  { %3627 = vadd.xlane.f32.xlu1 %v3626_v52  ;;  %6741 = vmatprep.subr.bf16.mxu0 %v6740_v24  ;;  %v7113_v46 = vunpack.i.h.bf16 %v7111_v27  ;;  %v7112_v0 = vunpack.i.l.bf16 %v7111_v27 }
0x10eb   :  { %6743 = vmatpush3.bf16.msra.mxu0 %v6740_v24 }
0x10ec   :  { %v3610_v3 = vpop.xlane.xlu0 %3609  ;;  %v6744_v53 = vpack.c.bf16 %v7113_v46, %v7112_v0 }
0x10ed   :  { %v3616_v36 = vsub.f32 %v3600_v22, %v3610_v3 }
0x10ef   :  { %v3622_v13 = vmul.f32 1.442695, %v3616_v36 }
0x10f0   :  { %v3613_v38 = vpop.xlane.xlu0 %3612 }
0x10f1   :  { %7309 = vpow2.f32 %v3622_v13  ;;  %v3617_v48 = vsub.f32 %v3601_v2, %v3613_v38 }
0x10f3   :  { %v3624_v39 = vmul.f32 1.442695, %v3617_v48 }
0x10f4   :  { %v7096_v12 = vpop.permute.xlu0 %7095 }
0x10f5   :  { %7311 = vpow2.f32 %v3624_v39  ;;  %v7098_v51 = vunpack.i.h.bf16 %v7096_v12  ;;  %v7097_v21 = vunpack.i.l.bf16 %v7096_v12 }
0x10f7   :  { %v6732_v56 = vpack.c.bf16 %v7098_v51, %v7097_v21 }
0x10f9   :  { %6733 = vmatprep.subr.bf16.mxu1 %v6732_v56 }
0x10fa   :  { %6735 = vmatpush3.bf16.msra.mxu1 %v6732_v56 }
0x10fb   :  { %v7310_v54 = vpop.eup %7309  ;;  %6746 = vmatprep.subr.msk.bf16.mxu1 %vm8383_vm7, %v6744_v53 }
0x10fc   :  { %v3632_v22 = vsel %vm48_vm0, %v7310_v54, 0.0 }
0x10fd   :  { %3633 = vadd.xlane.f32.xlu1 %v3632_v22 }
0x10ff   :  { %v7312_v45 = vpop.eup %7311 }
0x1100   :  { %v3635_v2 = vsel %vm48_vm0, %v7312_v45, 0.0 }
0x1101   :  { %3636 = vadd.xlane.f32.xlu0 %v3635_v2 }
0x110e   :  { %7120 = vrot.lane.b32.xlu1 %v8391_v35, %s7426_s26 }
0x1112   :  { %3865 = vrot.lane.b32.xlu1 %v8401_v17, %s7426_s26 }
0x1116   :  { %3964 = vrot.lane.b32.xlu1 %v8416_v55, %s7426_s26 }
0x1117   :  { %7115 = vrot.lane.b32.xlu0 %v8439_v8, %s7426_s26 }
0x111b   :  { %7125 = vrot.lane.b32.xlu0 %v8446_v25, %s7426_s26 }
0x111f   :  { %3867 = vrot.lane.b32.xlu0 %v8409_v61, %s7426_s26 }
0x1123   :  { %3966 = vrot.lane.b32.xlu0 %v8455_v44, %s7426_s26 }
0x1176   :  { %v3631_v40 = vpop.xlane.xlu0 %3630 }
0x1177   :  { %7313 = vrcp.f32 %v3631_v40  ;;  %v3628_v15 = vpop.xlane.xlu1 %3627 }
0x1178   :  { %7315 = vrcp.f32 %v3628_v15 }
0x1181   :  { %v7314_v4 = vpop.eup %7313 }
0x1182   :  { %v7316_v5 = vpop.eup %7315  ;;  %v3643_v16 = vmul.f32 %v7314_v4, %v3631_v40 }
0x1183   :  { %v3642_v49 = vmul.f32 %v7316_v5, %v3628_v15 }
0x1184   :  { %v3647_v50 = vsub.f32 2.0, %v3643_v16 }
0x1185   :  { %v3646_v7 = vsub.f32 2.0, %v3642_v49 }
0x1186   :  { %v3651_v19 = vmul.f32 %v7314_v4, %v3647_v50 }
0x1187   :  { %v3650_v10 = vmul.f32 %v7316_v5, %v3646_v7 }
0x1188   :  { %v3655_v43 = vmul.f32 %v7306_v41, %v3651_v19 }
0x1189   :  { %v3654_v31 = vmul.f32 %v7308_v47, %v3650_v10 }
0x118a   :  { %v3634_v32 = vpop.xlane.xlu1 %3633 }
0x118b   :  { %7317 = vrcp.f32 %v3634_v32  ;;  %6314 = vmatprep.mubr.msk.f32.mxu1 %vm48_vm0, %v3654_v31 }
0x118c   :  { %6315 = vmatmul.mubr.msk.f32.vlgmr.msra.gmra.mrb[28].mxu1 %vm48_vm0, %v3655_v43 }
0x118d   :  { %6749 = vmatpush3.bf16.xpose.msk.msra.mxu1 %vm8383_vm7, %v6744_v53 }
0x118e   :  { %v3637_v37 = vpop.xlane.xlu0 %3636  ;;  %v7121_v1 = vpop.permute.xlu1 %7120 }
0x118f   :  { %7319 = vrcp.f32 %v3637_v37  ;;  %v7123_v28 = vunpack.i.h.bf16 %v7121_v1  ;;  %v7122_v14 = vunpack.i.l.bf16 %v7121_v1 }
0x1191   :  { %v6750_v30 = vpack.c.bf16 %v7123_v28, %v7122_v14 }
0x1192   :  { %v7116_v63 = vpop.permute.xlu0 %7115  ;;  %v3866_v24 = vpop.permute.xlu1 %3865 }
0x1193   :  { %v7118_v52 = vunpack.i.h.bf16 %v7116_v63  ;;  %v7117_v47 = vunpack.i.l.bf16 %v7116_v63  ;;  %6752 = vmatprep.subr.msk.bf16.mxu1 %vm8383_vm7, %v6750_v30  ;;  %6336 = vmatprep.mubr.msk.f32.mxu1 %vm318_vm2, %v3866_v24 }
0x1195   :  { %v7318_v41 = vpop.eup %7317  ;;  %v6756_v3 = vpack.c.bf16 %v7118_v52, %v7117_v47  ;;  %6755 = vmatpush3.bf16.xpose.msk.msra.mxu1 %vm8383_vm7, %v6750_v30 }
0x1196   :  { %v3644_v36 = vmul.f32 %v7318_v41, %v3634_v32  ;;  %v7126_v13 = vpop.permute.xlu0 %7125  ;;  %v3965_v2 = vpop.permute.xlu1 %3964 }
0x1197   :  { %6758 = vmatprep.subr.msk.bf16.mxu0 %vm8383_vm7, %v6756_v3  ;;  %v7128_v21 = vunpack.i.h.bf16 %v7126_v13  ;;  %v7127_v56 = vunpack.i.l.bf16 %v7126_v13 }
0x1198   :  { %v3648_v38 = vsub.f32 2.0, %v3644_v36 }
0x1199   :  { %v7320_v27 = vpop.eup %7319  ;;  %v6762_v22 = vpack.c.bf16 %v7128_v21, %v7127_v56 }
0x119a   :  { %v3652_v48 = vmul.f32 %v7318_v41, %v3648_v38  ;;  %v3645_v39 = vmul.f32 %v7320_v27, %v3637_v37  ;;  %v3868_v46 = vpop.permute.xlu0 %3867 }
0x119c   :  { %v3656_v12 = vmul.f32 %v7310_v54, %v3652_v48  ;;  %v3649_v0 = vsub.f32 2.0, %v3645_v39  ;;  %6337 = vmatmul.mubr.msk.f32.vlgmr.msra.gmra.mrb[30].mxu1 %vm318_vm2, %v3868_v46 }
0x119e   :  { %v3653_v51 = vmul.f32 %v7320_v27, %v3649_v0  ;;  %6325 = vmatprep.mubr.msk.f32.mxu0 %vm48_vm0, %v3656_v12  ;;  %v3967_v54 = vpop.permute.xlu0 %3966 }
0x11a0   :  { %v3657_v53 = vmul.f32 %v7312_v45, %v3653_v51 }
0x11a2   :  { %6326 = vmatmul.mubr.msk.f32.vlgmr.msra.gmra.mrb[32].mxu0 %vm48_vm0, %v3657_v53 }
0x11a3   :  { %6761 = vmatpush3.bf16.xpose.msk.msra.mxu0 %vm8383_vm7, %v6756_v3  ;;  %6347 = vmatprep.mubr.msk.f32.mxu0 %vm318_vm2, %v3965_v2 }
0x11a4   :  { %6764 = vmatprep.subr.msk.bf16.mxu0 %vm8383_vm7, %v6762_v22 }
0x11ab   :  { %6767 = vmatpush3.bf16.xpose.msk.msra.mxu0 %vm8383_vm7, %v6762_v22 }
0x11b2   :  { %6348 = vmatmul.mubr.msk.f32.vlgmr.msra.gmra.mrb[34].mxu0 %vm318_vm2, %v3967_v54 }
0x125f   :  { %v8789_v40 = vpop.f32.mrb[28].mxu1 }
0x1260   :  { %v8791_v45 = vpop.f32.mrb[29].mxu1 }
0x126f   :  { %v6338_v15 = vpop.f32.mrb[30].mxu1 }
0x1270   :  { %v4064_v4 = vsel %vm1566_vm10, %v6338_v15, -1e+30  ;;  %v3955_v5 = vpop.f32.mrb[31].mxu1 }
0x1271   :  { %v4070_v16 = vsel %vm48_vm0, %v4064_v4, -inf  ;;  %v4063_v49 = vsel %vm1566_vm10, %v3955_v5, -1e+30 }
0x1272   :  { %v4067_v50 = vsel %vm48_vm0, %v4063_v49, -inf  ;;  %4071 = vmax.xlane.f32.xlu0 %v4070_v16 }
0x1273   :  { %4068 = vmax.xlane.f32.xlu1 %v4067_v50 }
0x1275   :  { %v8799_v7 = vpop.f32.mrb[32].mxu0 }
0x1276   :  { %v8801_v19 = vpop.f32.mrb[33].mxu0 }
0x1284   :  { %7130 = vrot.lane.b32.xlu1 %v8387_v29, %s7427_s27 }
0x1285   :  { %v6349_v10 = vpop.f32.mrb[34].mxu0 }
0x1286   :  { %v4054_v31 = vpop.f32.mrb[35].mxu0  ;;  %v4066_v37 = vsel %vm1567_vm8, %v6349_v10, -1e+30 }
0x1287   :  { %v4065_v43 = vsel %vm1567_vm8, %v4054_v31, -1e+30  ;;  %v4076_v1 = vsel %vm48_vm0, %v4066_v37, -inf }
0x1288   :  { %v4073_v32 = vsel %vm48_vm0, %v4065_v43, -inf  ;;  %7140 = vrot.lane.b32.xlu1 %v8439_v8, %s7427_s27 }
0x1289   :  { %4074 = vmax.xlane.f32.xlu0 %v4073_v32 }
0x128c   :  { %7145 = vrot.lane.b32.xlu1 %v8446_v25, %s7427_s27 }
0x128d   :  { %4077 = vmax.xlane.f32.xlu0 %v4076_v1 }
0x1290   :  { %7150 = vrot.lane.b32.xlu1 %v8387_v29, %s7428_s28 }
0x12a3   :  { %7135 = vrot.lane.b32.xlu0 %v8391_v35, %s7427_s27 }
0x12ff   :  { %v4072_v28 = vpop.xlane.xlu0 %4071 }
0x1300   :  { %v4080_v14 = vsub.f32 %v4064_v4, %v4072_v28  ;;  %v4069_v30 = vpop.xlane.xlu1 %4068 }
0x1301   :  { %v4079_v63 = vsub.f32 %v4063_v49, %v4069_v30 }
0x1302   :  { %v4085_v24 = vmul.f32 1.442695, %v4080_v14 }
0x1303   :  { %v4083_v52 = vmul.f32 1.442695, %v4079_v63 }
0x1304   :  { %7321 = vpow2.f32 %v4085_v24  ;;  %v7131_v47 = vpop.permute.xlu1 %7130 }
0x1305   :  { %7323 = vpow2.f32 %v4083_v52  ;;  %v7133_v41 = vunpack.i.h.bf16 %v7131_v47  ;;  %v7132_v3 = vunpack.i.l.bf16 %v7131_v47 }
0x1307   :  { %v6768_v36 = vpack.c.bf16 %v7133_v41, %v7132_v3 }
0x1308   :  { %v7141_v13 = vpop.permute.xlu1 %7140 }
0x1309   :  { %v7143_v38 = vunpack.i.h.bf16 %v7141_v13  ;;  %v7142_v27 = vunpack.i.l.bf16 %v7141_v13  ;;  %6769 = vmatprep.subr.bf16.mxu1 %v6768_v36 }
0x130a   :  { %6771 = vmatpush3.bf16.msra.mxu1 %v6768_v36 }
0x130b   :  { %v6776_v48 = vpack.c.bf16 %v7143_v38, %v7142_v27 }
0x130c   :  { %v7146_v39 = vpop.permute.xlu1 %7145 }
0x130d   :  { %v7148_v46 = vunpack.i.h.bf16 %v7146_v39  ;;  %v7147_v12 = vunpack.i.l.bf16 %v7146_v39  ;;  %6777 = vmatprep.subr.bf16.mxu0 %v6776_v48 }
0x130e   :  { %v7322_v0 = vpop.eup %7321  ;;  %6779 = vmatpush3.bf16.msra.mxu0 %v6776_v48 }
0x130f   :  { %v7324_v51 = vpop.eup %7323  ;;  %v6780_v21 = vpack.c.bf16 %v7148_v46, %v7147_v12  ;;  %v4094_v56 = vsel %vm48_vm0, %v7322_v0, 0.0 }
0x1310   :  { %4095 = vadd.xlane.f32.xlu0 %v4094_v56  ;;  %v4091_v53 = vsel %vm48_vm0, %v7324_v51, 0.0  ;;  %v7151_v4 = vpop.permute.xlu1 %7150 }
0x1311   :  { %4092 = vadd.xlane.f32.xlu1 %v4091_v53  ;;  %6781 = vmatprep.subr.bf16.mxu0 %v6780_v21  ;;  %v7153_v49 = vunpack.i.h.bf16 %v7151_v4  ;;  %v7152_v10 = vunpack.i.l.bf16 %v7151_v4 }
0x1312   :  { %6783 = vmatpush3.bf16.msra.mxu0 %v6780_v21 }
0x1313   :  { %v6784_v28 = vpack.c.bf16 %v7153_v49, %v7152_v10 }
0x1316   :  { %v4075_v22 = vpop.xlane.xlu0 %4074 }
0x1317   :  { %v4081_v2 = vsub.f32 %v4065_v43, %v4075_v22 }
0x1319   :  { %v4087_v54 = vmul.f32 1.442695, %v4081_v2 }
0x131a   :  { %v4078_v15 = vpop.xlane.xlu0 %4077 }
0x131b   :  { %7325 = vpow2.f32 %v4087_v54  ;;  %v4082_v5 = vsub.f32 %v4066_v37, %v4078_v15 }
0x131d   :  { %v4089_v16 = vmul.f32 1.442695, %v4082_v5 }
0x131e   :  { %v7136_v50 = vpop.permute.xlu0 %7135 }
0x131f   :  { %7327 = vpow2.f32 %v4089_v16  ;;  %v7138_v31 = vunpack.i.h.bf16 %v7136_v50  ;;  %v7137_v32 = vunpack.i.l.bf16 %v7136_v50 }
0x1321   :  { %v6772_v1 = vpack.c.bf16 %v7138_v31, %v7137_v32 }
0x1323   :  { %6773 = vmatprep.subr.bf16.mxu1 %v6772_v1 }
0x1324   :  { %6775 = vmatpush3.bf16.msra.mxu1 %v6772_v1 }
0x1325   :  { %v7326_v14 = vpop.eup %7325  ;;  %6786 = vmatprep.subr.msk.bf16.mxu1 %vm8383_vm7, %v6784_v28 }
0x1326   :  { %v4097_v43 = vsel %vm48_vm0, %v7326_v14, 0.0 }
0x1327   :  { %4098 = vadd.xlane.f32.xlu1 %v4097_v43 }
0x1329   :  { %v7328_v30 = vpop.eup %7327 }
0x132a   :  { %v4100_v37 = vsel %vm48_vm0, %v7328_v30, 0.0 }
0x132b   :  { %4101 = vadd.xlane.f32.xlu0 %v4100_v37 }
0x1338   :  { %7160 = vrot.lane.b32.xlu1 %v8391_v35, %s7428_s28 }
0x133c   :  { %4330 = vrot.lane.b32.xlu1 %v8401_v17, %s7428_s28 }
0x1340   :  { %4429 = vrot.lane.b32.xlu1 %v8416_v55, %s7428_s28 }
0x1341   :  { %7155 = vrot.lane.b32.xlu0 %v8439_v8, %s7428_s28 }
0x1345   :  { %7165 = vrot.lane.b32.xlu0 %v8446_v25, %s7428_s28 }
0x1349   :  { %4332 = vrot.lane.b32.xlu0 %v8409_v61, %s7428_s28 }
0x134d   :  { %4431 = vrot.lane.b32.xlu0 %v8455_v44, %s7428_s28 }
0x139d   :  { %v4096_v63 = vpop.xlane.xlu0 %4095 }
0x139e   :  { %7329 = vrcp.f32 %v4096_v63  ;;  %v4093_v24 = vpop.xlane.xlu1 %4092 }
0x139f   :  { %7331 = vrcp.f32 %v4093_v24 }
0x13a8   :  { %v7330_v52 = vpop.eup %7329 }
0x13a9   :  { %v7332_v47 = vpop.eup %7331  ;;  %v4108_v41 = vmul.f32 %v7330_v52, %v4096_v63 }
0x13aa   :  { %v4107_v3 = vmul.f32 %v7332_v47, %v4093_v24 }
0x13ab   :  { %v4112_v36 = vsub.f32 2.0, %v4108_v41 }
0x13ac   :  { %v4111_v13 = vsub.f32 2.0, %v4107_v3 }
0x13ad   :  { %v4116_v38 = vmul.f32 %v7330_v52, %v4112_v36 }
0x13ae   :  { %v4115_v27 = vmul.f32 %v7332_v47, %v4111_v13 }
0x13af   :  { %v4120_v39 = vmul.f32 %v7322_v0, %v4116_v38 }
0x13b0   :  { %v4119_v48 = vmul.f32 %v7324_v51, %v4115_v27 }
0x13b2   :  { %6358 = vmatprep.mubr.msk.f32.mxu1 %vm48_vm0, %v4119_v48 }
0x13b3   :  { %6359 = vmatmul.mubr.msk.f32.vlgmr.msra.gmra.mrb[32].mxu1 %vm48_vm0, %v4120_v39 }
0x13b4   :  { %6789 = vmatpush3.bf16.xpose.msk.msra.mxu1 %vm8383_vm7, %v6784_v28  ;;  %v4099_v46 = vpop.xlane.xlu1 %4098 }
0x13b5   :  { %7333 = vrcp.f32 %v4099_v46 }
0x13b8   :  { %v4102_v12 = vpop.xlane.xlu0 %4101  ;;  %v7161_v21 = vpop.permute.xlu1 %7160 }
0x13b9   :  { %7335 = vrcp.f32 %v4102_v12  ;;  %v7163_v56 = vunpack.i.h.bf16 %v7161_v21  ;;  %v7162_v53 = vunpack.i.l.bf16 %v7161_v21 }
0x13bb   :  { %v6790_v22 = vpack.c.bf16 %v7163_v56, %v7162_v53 }
0x13bc   :  { %v7156_v2 = vpop.permute.xlu0 %7155  ;;  %v4331_v54 = vpop.permute.xlu1 %4330 }
0x13bd   :  { %v7158_v15 = vunpack.i.h.bf16 %v7156_v2  ;;  %v7157_v51 = vunpack.i.l.bf16 %v7156_v2  ;;  %6792 = vmatprep.subr.msk.bf16.mxu1 %vm8383_vm7, %v6790_v22  ;;  %6380 = vmatprep.mubr.msk.f32.mxu1 %vm318_vm2, %v4331_v54 }
0x13be   :  { %6795 = vmatpush3.bf16.xpose.msk.msra.mxu1 %vm8383_vm7, %v6790_v22 }
0x13bf   :  { %v7334_v0 = vpop.eup %7333  ;;  %v6796_v4 = vpack.c.bf16 %v7158_v15, %v7157_v51 }
0x13c0   :  { %v4109_v5 = vmul.f32 %v7334_v0, %v4099_v46  ;;  %v7166_v16 = vpop.permute.xlu0 %7165  ;;  %v4430_v47 = vpop.permute.xlu1 %4429 }
0x13c1   :  { %6798 = vmatprep.subr.msk.bf16.mxu0 %vm8383_vm7, %v6796_v4  ;;  %v7168_v37 = vunpack.i.h.bf16 %v7166_v16  ;;  %v7167_v63 = vunpack.i.l.bf16 %v7166_v16 }
0x13c2   :  { %v4113_v49 = vsub.f32 2.0, %v4109_v5 }
0x13c3   :  { %v7336_v50 = vpop.eup %7335  ;;  %v6802_v52 = vpack.c.bf16 %v7168_v37, %v7167_v63 }
0x13c4   :  { %v4117_v10 = vmul.f32 %v7334_v0, %v4113_v49  ;;  %v4110_v31 = vmul.f32 %v7336_v50, %v4102_v12  ;;  %v4333_v32 = vpop.permute.xlu0 %4332 }
0x13c5   :  { %6381 = vmatmul.mubr.msk.f32.vlgmr.msra.gmra.mrb[34].mxu1 %vm318_vm2, %v4333_v32 }
0x13c6   :  { %v4121_v1 = vmul.f32 %v7326_v14, %v4117_v10  ;;  %v4114_v28 = vsub.f32 2.0, %v4110_v31 }
0x13c8   :  { %v4118_v43 = vmul.f32 %v7336_v50, %v4114_v28  ;;  %6369 = vmatprep.mubr.msk.f32.mxu0 %vm48_vm0, %v4121_v1  ;;  %v4432_v14 = vpop.permute.xlu0 %4431 }
0x13ca   :  { %v4122_v24 = vmul.f32 %v7328_v30, %v4118_v43 }
0x13cc   :  { %6370 = vmatmul.mubr.msk.f32.vlgmr.msra.gmra.mrb[36].mxu0 %vm48_vm0, %v4122_v24 }
0x13cd   :  { %6801 = vmatpush3.bf16.xpose.msk.msra.mxu0 %vm8383_vm7, %v6796_v4  ;;  %6391 = vmatprep.mubr.msk.f32.mxu0 %vm318_vm2, %v4430_v47 }
0x13ce   :  { %6804 = vmatprep.subr.msk.bf16.mxu0 %vm8383_vm7, %v6802_v52 }
0x13d5   :  { %6807 = vmatpush3.bf16.xpose.msk.msra.mxu0 %vm8383_vm7, %v6802_v52 }
0x13dc   :  { %6392 = vmatmul.mubr.msk.f32.vlgmr.msra.gmra.mrb[38].mxu0 %vm318_vm2, %v4432_v14 }
0x1486   :  { %v8857_v41 = vpop.f32.mrb[32].mxu1 }
0x1487   :  { %v8859_v30 = vpop.f32.mrb[33].mxu1 }
0x1498   :  { %v6382_v3 = vpop.f32.mrb[34].mxu1 }
0x1499   :  { %v4529_v36 = vsel %vm1566_vm10, %v6382_v3, -1e+30  ;;  %v4420_v13 = vpop.f32.mrb[35].mxu1 }
0x149a   :  { %v4535_v38 = vsel %vm48_vm0, %v4529_v36, -inf  ;;  %v4528_v27 = vsel %vm1566_vm10, %v4420_v13, -1e+30 }
0x149b   :  { %v4532_v48 = vsel %vm48_vm0, %v4528_v27, -inf  ;;  %4536 = vmax.xlane.f32.xlu0 %v4535_v38 }
0x149c   :  { %4533 = vmax.xlane.f32.xlu1 %v4532_v48 }
0x149f   :  { %v8867_v39 = vpop.f32.mrb[36].mxu0 }
0x14a0   :  { %v8869_v46 = vpop.f32.mrb[37].mxu0 }
0x14ad   :  { %7170 = vrot.lane.b32.xlu1 %v8387_v29, %s7429_s30 }
0x14af   :  { %v6393_v12 = vpop.f32.mrb[38].mxu0 }
0x14b0   :  { %v4519_v21 = vpop.f32.mrb[39].mxu0  ;;  %v4531_v22 = vsel %vm1567_vm8, %v6393_v12, -1e+30 }
0x14b1   :  { %v4530_v56 = vsel %vm1567_vm8, %v4519_v21, -1e+30  ;;  %7180 = vrot.lane.b32.xlu1 %v8439_v8, %s7429_s30  ;;  %v4541_v2 = vsel %vm48_vm0, %v4531_v22, -inf }
0x14b2   :  { %v4538_v53 = vsel %vm48_vm0, %v4530_v56, -inf }
0x14b3   :  { %4539 = vmax.xlane.f32.xlu0 %v4538_v53 }
0x14b5   :  { %7185 = vrot.lane.b32.xlu1 %v8446_v25, %s7429_s30 }
0x14b7   :  { %4542 = vmax.xlane.f32.xlu0 %v4541_v2 }
0x14b9   :  { %7190 = vrot.lane.b32.xlu1 %v8387_v29, %s7430_s13 }
0x14cd   :  { %7175 = vrot.lane.b32.xlu0 %v8391_v35, %s7429_s30 }
0x1528   :  { %v4537_v54 = vpop.xlane.xlu0 %4536 }
0x1529   :  { %v4545_v15 = vsub.f32 %v4529_v36, %v4537_v54  ;;  %v4534_v51 = vpop.xlane.xlu1 %4533 }
0x152a   :  { %v4544_v0 = vsub.f32 %v4528_v27, %v4534_v51 }
0x152b   :  { %v4550_v4 = vmul.f32 1.442695, %v4545_v15 }
0x152c   :  { %v4548_v5 = vmul.f32 1.442695, %v4544_v0 }
0x152d   :  { %7337 = vpow2.f32 %v4550_v4  ;;  %v7171_v16 = vpop.permute.xlu1 %7170 }
0x152e   :  { %7339 = vpow2.f32 %v4548_v5  ;;  %v7173_v49 = vunpack.i.h.bf16 %v7171_v16  ;;  %v7172_v50 = vunpack.i.l.bf16 %v7171_v16 }
0x1530   :  { %v6808_v10 = vpack.c.bf16 %v7173_v49, %v7172_v50 }
0x1531   :  { %v7181_v31 = vpop.permute.xlu1 %7180 }
0x1532   :  { %v7183_v32 = vunpack.i.h.bf16 %v7181_v31  ;;  %v7182_v1 = vunpack.i.l.bf16 %v7181_v31  ;;  %6809 = vmatprep.subr.bf16.mxu1 %v6808_v10 }
0x1533   :  { %6811 = vmatpush3.bf16.msra.mxu1 %v6808_v10 }
0x1534   :  { %v6816_v28 = vpack.c.bf16 %v7183_v32, %v7182_v1 }
0x1535   :  { %v7186_v43 = vpop.permute.xlu1 %7185 }
0x1536   :  { %v7188_v37 = vunpack.i.h.bf16 %v7186_v43  ;;  %v7187_v63 = vunpack.i.l.bf16 %v7186_v43  ;;  %6817 = vmatprep.subr.bf16.mxu0 %v6816_v28 }
0x1537   :  { %v7338_v24 = vpop.eup %7337  ;;  %6819 = vmatpush3.bf16.msra.mxu0 %v6816_v28 }
0x1538   :  { %v7340_v52 = vpop.eup %7339  ;;  %v6820_v47 = vpack.c.bf16 %v7188_v37, %v7187_v63  ;;  %v4559_v14 = vsel %vm48_vm0, %v7338_v24, 0.0 }
0x1539   :  { %4560 = vadd.xlane.f32.xlu0 %v4559_v14  ;;  %v4556_v3 = vsel %vm48_vm0, %v7340_v52, 0.0  ;;  %v7191_v48 = vpop.permute.xlu1 %7190 }
0x153a   :  { %4557 = vadd.xlane.f32.xlu1 %v4556_v3  ;;  %6821 = vmatprep.subr.bf16.mxu0 %v6820_v47  ;;  %v7193_v53 = vunpack.i.h.bf16 %v7191_v48  ;;  %v7192_v54 = vunpack.i.l.bf16 %v7191_v48 }
0x153b   :  { %6823 = vmatpush3.bf16.msra.mxu0 %v6820_v47 }
0x153c   :  { %v6824_v4 = vpack.c.bf16 %v7193_v53, %v7192_v54 }
0x1540   :  { %v4540_v36 = vpop.xlane.xlu0 %4539 }
0x1541   :  { %v4546_v13 = vsub.f32 %v4530_v56, %v4540_v36 }
0x1543   :  { %v4552_v38 = vmul.f32 1.442695, %v4546_v13 }
0x1544   :  { %v4543_v27 = vpop.xlane.xlu0 %4542 }
0x1545   :  { %7341 = vpow2.f32 %v4552_v38  ;;  %v4547_v12 = vsub.f32 %v4531_v22, %v4543_v27 }
0x1547   :  { %v4554_v21 = vmul.f32 1.442695, %v4547_v12 }
0x1548   :  { %v7176_v2 = vpop.permute.xlu0 %7175 }
0x1549   :  { %7343 = vpow2.f32 %v4554_v21  ;;  %v7178_v15 = vunpack.i.h.bf16 %v7176_v2  ;;  %v7177_v51 = vunpack.i.l.bf16 %v7176_v2 }
0x154b   :  { %v6812_v0 = vpack.c.bf16 %v7178_v15, %v7177_v51 }
0x154d   :  { %6813 = vmatprep.subr.bf16.mxu1 %v6812_v0 }
0x154e   :  { %6815 = vmatpush3.bf16.msra.mxu1 %v6812_v0 }
0x154f   :  { %v7342_v5 = vpop.eup %7341  ;;  %6826 = vmatprep.subr.msk.bf16.mxu1 %vm8383_vm7, %v6824_v4 }
0x1550   :  { %v4562_v56 = vsel %vm48_vm0, %v7342_v5, 0.0 }
0x1551   :  { %4563 = vadd.xlane.f32.xlu1 %v4562_v56 }
0x1553   :  { %v7344_v16 = vpop.eup %7343 }
0x1554   :  { %v4565_v22 = vsel %vm48_vm0, %v7344_v16, 0.0 }
0x1555   :  { %4566 = vadd.xlane.f32.xlu0 %v4565_v22 }
0x1562   :  { %7200 = vrot.lane.b32.xlu1 %v8391_v35, %s7430_s13 }
0x1566   :  { %4795 = vrot.lane.b32.xlu1 %v8401_v17, %s7430_s13 }
0x156a   :  { %4894 = vrot.lane.b32.xlu1 %v8416_v55, %s7430_s13 }
0x156b   :  { %7195 = vrot.lane.b32.xlu0 %v8439_v8, %s7430_s13 }
0x156f   :  { %7205 = vrot.lane.b32.xlu0 %v8446_v25, %s7430_s13 }
0x1573   :  { %4797 = vrot.lane.b32.xlu0 %v8409_v61, %s7430_s13 }
0x1577   :  { %4896 = vrot.lane.b32.xlu0 %v8455_v44, %s7430_s13 }
0x15c6   :  { %v4561_v49 = vpop.xlane.xlu0 %4560 }
0x15c7   :  { %7345 = vrcp.f32 %v4561_v49  ;;  %v4558_v50 = vpop.xlane.xlu1 %4557 }
0x15c8   :  { %7347 = vrcp.f32 %v4558_v50 }
0x15d1   :  { %v7346_v17 = vpop.eup %7345 }
0x15d2   :  { %v7348_v10 = vpop.eup %7347  ;;  %v4573_v31 = vmul.f32 %v7346_v17, %v4561_v49 }
0x15d3   :  { %v4572_v55 = vmul.f32 %v7348_v10, %v4558_v50 }
0x15d4   :  { %v4577_v32 = vsub.f32 2.0, %v4573_v31 }
0x15d5   :  { %v4576_v1 = vsub.f32 2.0, %v4572_v55 }
0x15d6   :  { %v4581_v28 = vmul.f32 %v7346_v17, %v4577_v32 }
0x15d7   :  { %v4580_v43 = vmul.f32 %v7348_v10, %v4576_v1 }
0x15d8   :  { %v4585_v63 = vmul.f32 %v7338_v24, %v4581_v28 }
0x15d9   :  { %v4584_v37 = vmul.f32 %v7340_v52, %v4580_v43 }
0x15db   :  { %6402 = vmatprep.mubr.msk.f32.mxu1 %vm48_vm0, %v4584_v37 }
0x15dc   :  { %6403 = vmatmul.mubr.msk.f32.vlgmr.msra.gmra.mrb[36].mxu1 %vm48_vm0, %v4585_v63 }
0x15dd   :  { %6829 = vmatpush3.bf16.xpose.msk.msra.mxu1 %vm8383_vm7, %v6824_v4 }
0x15de   :  { %v4564_v61 = vpop.xlane.xlu1 %4563 }
0x15df   :  { %7349 = vrcp.f32 %v4564_v61 }
0x15e2   :  { %v4567_v44 = vpop.xlane.xlu0 %4566  ;;  %v7201_v47 = vpop.permute.xlu1 %7200 }
0x15e3   :  { %7351 = vrcp.f32 %v4567_v44  ;;  %v7203_v14 = vunpack.i.h.bf16 %v7201_v47  ;;  %v7202_v3 = vunpack.i.l.bf16 %v7201_v47 }
0x15e5   :  { %v6830_v36 = vpack.c.bf16 %v7203_v14, %v7202_v3 }
0x15e6   :  { %v7196_v13 = vpop.permute.xlu0 %7195  ;;  %v4796_v38 = vpop.permute.xlu1 %4795 }
0x15e7   :  { %v7198_v27 = vunpack.i.h.bf16 %v7196_v13  ;;  %v7197_v52 = vunpack.i.l.bf16 %v7196_v13  ;;  %6832 = vmatprep.subr.msk.bf16.mxu1 %vm8383_vm7, %v6830_v36  ;;  %6424 = vmatprep.mubr.msk.f32.mxu1 %vm318_vm2, %v4796_v38 }
0x15e8   :  { %6835 = vmatpush3.bf16.xpose.msk.msra.mxu1 %vm8383_vm7, %v6830_v36 }
0x15e9   :  { %v7350_v24 = vpop.eup %7349  ;;  %v6836_v48 = vpack.c.bf16 %v7198_v27, %v7197_v52 }
0x15ea   :  { %v4574_v12 = vmul.f32 %v7350_v24, %v4564_v61  ;;  %v7206_v21 = vpop.permute.xlu0 %7205  ;;  %v4895_v10 = vpop.permute.xlu1 %4894 }
0x15eb   :  { %6838 = vmatprep.subr.msk.bf16.mxu0 %vm8383_vm7, %v6836_v48  ;;  %v7208_v22 = vunpack.i.h.bf16 %v7206_v21  ;;  %v7207_v49 = vunpack.i.l.bf16 %v7206_v21 }
0x15ec   :  { %v4578_v53 = vsub.f32 2.0, %v4574_v12 }
0x15ed   :  { %v7352_v2 = vpop.eup %7351  ;;  %v6842_v17 = vpack.c.bf16 %v7208_v22, %v7207_v49 }
0x15ee   :  { %v4582_v54 = vmul.f32 %v7350_v24, %v4578_v53  ;;  %v4575_v15 = vmul.f32 %v7352_v2, %v4567_v44  ;;  %v4798_v51 = vpop.permute.xlu0 %4797 }
0x15ef   :  { %6425 = vmatmul.mubr.msk.f32.vlgmr.msra.gmra.mrb[38].mxu1 %vm318_vm2, %v4798_v51 }
0x15f0   :  { %v4586_v0 = vmul.f32 %v7342_v5, %v4582_v54  ;;  %v4579_v4 = vsub.f32 2.0, %v4575_v15 }
0x15f2   :  { %v4583_v56 = vmul.f32 %v7352_v2, %v4579_v4  ;;  %6413 = vmatprep.mubr.msk.f32.mxu0 %vm48_vm0, %v4586_v0  ;;  %v4897_v5 = vpop.permute.xlu0 %4896 }
0x15f4   :  { %v4587_v50 = vmul.f32 %v7344_v16, %v4583_v56 }
0x15f6   :  { %6414 = vmatmul.mubr.msk.f32.vlgmr.msra.gmra.mrb[40].mxu0 %vm48_vm0, %v4587_v50 }
0x15f7   :  { %6841 = vmatpush3.bf16.xpose.msk.msra.mxu0 %vm8383_vm7, %v6836_v48  ;;  %6435 = vmatprep.mubr.msk.f32.mxu0 %vm318_vm2, %v4895_v10 }
0x15f8   :  { %6844 = vmatprep.subr.msk.bf16.mxu0 %vm8383_vm7, %v6842_v17 }
0x15ff   :  { %6847 = vmatpush3.bf16.xpose.msk.msra.mxu0 %vm8383_vm7, %v6842_v17 }
0x1606   :  { %6436 = vmatmul.mubr.msk.f32.vlgmr.msra.gmra.mrb[42].mxu0 %vm318_vm2, %v4897_v5  ;;  %vm3860_vm2 = vcmask 162944  }
0x16af   :  { %v8925_v31 = vpop.f32.mrb[36].mxu1 }
0x16b0   :  { %v8927_v16 = vpop.f32.mrb[37].mxu1 }
0x16c2   :  { %v6426_v55 = vpop.f32.mrb[38].mxu1 }
0x16c3   :  { %v4994_v32 = vsel %vm1566_vm10, %v6426_v55, -1e+30  ;;  %v4885_v1 = vpop.f32.mrb[39].mxu1 }
0x16c4   :  { %v5000_v28 = vsel %vm48_vm0, %v4994_v32, -inf  ;;  %v4993_v43 = vsel %vm1566_vm10, %v4885_v1, -1e+30 }
0x16c5   :  { %v4997_v62 = vsel %vm48_vm0, %v4993_v43, -inf  ;;  %5001 = vmax.xlane.f32.xlu0 %v5000_v28 }
0x16c6   :  { %4998 = vmax.xlane.f32.xlu1 %v4997_v62 }
0x16c9   :  { %v8935_v37 = vpop.f32.mrb[40].mxu0 }
0x16ca   :  { %v8937_v63 = vpop.f32.mrb[41].mxu0 }
0x16d7   :  { %7210 = vrot.lane.b32.xlu1 %v8387_v29, %s7431_s14 }
0x16d9   :  { %v6437_v61 = vpop.f32.mrb[42].mxu0 }
0x16da   :  { %v4984_v44 = vpop.f32.mrb[43].mxu0  ;;  %v4996_v14 = vsel %vm1567_vm8, %v6437_v61, -1e+30 }
0x16db   :  { %v4995_v47 = vsel %vm1567_vm8, %v4984_v44, -1e+30  ;;  %v5006_v3 = vsel %vm48_vm0, %v4996_v14, -inf }
0x16dc   :  { %v5003_v60 = vsel %vm48_vm0, %v4995_v47, -inf }
0x16dd   :  { %5004 = vmax.xlane.f32.xlu0 %v5003_v60 }
0x16e1   :  { %5007 = vmax.xlane.f32.xlu0 %v5006_v3 }
0x1752   :  { %v5002_v36 = vpop.xlane.xlu0 %5001 }
0x1753   :  { %v5010_v13 = vsub.f32 %v4994_v32, %v5002_v36  ;;  %v4999_v38 = vpop.xlane.xlu1 %4998 }
0x1754   :  { %v5009_v27 = vsub.f32 %v4993_v43, %v4999_v38 }
0x1755   :  { %v5015_v52 = vmul.f32 1.442695, %v5010_v13 }
0x1756   :  { %v5013_v29 = vmul.f32 1.442695, %v5009_v27 }
0x1757   :  { %7353 = vpow2.f32 %v5015_v52  ;;  %v7211_v24 = vpop.permute.xlu1 %7210 }
0x1758   :  { %7355 = vpow2.f32 %v5013_v29  ;;  %v7213_v48 = vunpack.i.h.bf16 %v7211_v24  ;;  %v7212_v12 = vunpack.i.l.bf16 %v7211_v24 }
0x175a   :  { %v6848_v21 = vpack.c.bf16 %v7213_v48, %v7212_v12 }
0x175c   :  { %6849 = vmatprep.subr.bf16.mxu1 %v6848_v21 }
0x175d   :  { %6851 = vmatpush3.bf16.msra.mxu1 %v6848_v21 }
0x1761   :  { %v8947_v34 = vpop.eup %7353 }
0x1762   :  { %v7356_v53 = vpop.eup %7355  ;;  %v5024_v2 = vsel %vm48_vm0, %v8947_v34, 0.0 }
0x1763   :  { %5025 = vadd.xlane.f32.xlu0 %v5024_v2  ;;  %v5021_v54 = vsel %vm48_vm0, %v7356_v53, 0.0 }
0x1764   :  { %5022 = vadd.xlane.f32.xlu1 %v5021_v54 }
0x176a   :  { %v5005_v15 = vpop.xlane.xlu0 %5004 }
0x176b   :  { %v5011_v49 = vsub.f32 %v4995_v47, %v5005_v15 }
0x176d   :  { %v5017_v50 = vmul.f32 1.442695, %v5011_v49 }
0x176e   :  { %v5008_v51 = vpop.xlane.xlu0 %5007 }
0x176f   :  { %v5012_v0 = vsub.f32 %v4996_v14, %v5008_v51 }
0x1771   :  { %v5019_v4 = vmul.f32 1.442695, %v5012_v0 }
0x1773   :  { %7357 = vpow2.f32 %v5019_v4 }
0x1774   :  { %7359 = vpow2.f32 %v5017_v50 }
0x1775   :  { %7220 = vrot.lane.b32.xlu1 %v8439_v8, %s7431_s14 }
0x177d   :  { %v8954_v56 = vpop.eup %7357 }
0x177e   :  { %v5030_v22 = vsel %vm48_vm0, %v8954_v56, 0.0  ;;  %v8958_v17 = vpop.eup %7359 }
0x177f   :  { %5031 = vadd.xlane.f32.xlu0 %v5030_v22  ;;  %v5027_v10 = vsel %vm48_vm0, %v8958_v17, 0.0 }
0x1795   :  { %7215 = vrot.lane.b32.xlu0 %v8391_v35, %s7431_s14 }
0x1799   :  { %2458 = vrot.lane.b32.xlu0 %v8585_v18, %s7414_s2  ;;  %5028 = vadd.xlane.f32.xlu1 %v5027_v10 }
0x179d   :  { %2922 = vrot.lane.b32.xlu0 %v8653_v42, %s7413_s1 }
0x17a1   :  { %3386 = vrot.lane.b32.xlu0 %v8721_v20, %s7415_s29 }
0x17a5   :  { %2460 = vrot.lane.b32.xlu0 %v8591_v57, %s7414_s2 }
0x17a9   :  { %4313 = vrot.lane.b32.xlu0 %v8859_v30, %s7432_s15 }
0x17aa   :  { %7225 = vrot.lane.b32.xlu1 %v8446_v25, %s7431_s14 }
0x17ad   :  { %2924 = vrot.lane.b32.xlu0 %v8661_v59, %s7413_s1 }
0x17ae   :  { %2456 = vrot.lane.b32.xlu1 %v8587_v11, %s7414_s2 }
0x17b1   :  { %4778 = vrot.lane.b32.xlu0 %v8927_v16, %s7433_s16 }
0x17b2   :  { %2920 = vrot.lane.b32.xlu1 %v8655_v6, %s7413_s1 }
0x17b5   :  { %3388 = vrot.lane.b32.xlu0 %v8733_v9, %s7415_s29 }
0x17b6   :  { %3384 = vrot.lane.b32.xlu1 %v8723_v26, %s7415_s29 }
0x17b9   :  { %3852 = vrot.lane.b32.xlu0 %v8801_v19, %s7434_s17 }
0x17ba   :  { %3848 = vrot.lane.b32.xlu1 %v8791_v45, %s7434_s17 }
0x17bd   :  { %3854 = vrot.lane.b32.xlu0 %v8799_v7, %s7434_s17 }
0x17be   :  { %3850 = vrot.lane.b32.xlu1 %v8789_v40, %s7434_s17 }
0x17c1   :  { %4319 = vrot.lane.b32.xlu0 %v8867_v39, %s7432_s15 }
0x17c2   :  { %2462 = vrot.lane.b32.xlu1 %v8589_v33, %s7414_s2  ;;  %s7435_s2 = smov 28  }
0x17c6   :  { %4315 = vrot.lane.b32.xlu1 %v8857_v41, %s7432_s15 }
0x17ca   :  { %2926 = vrot.lane.b32.xlu1 %v8657_v58, %s7413_s1 }
0x17ce   :  { %4780 = vrot.lane.b32.xlu1 %v8925_v31, %s7433_s16 }
0x17d2   :  { %3390 = vrot.lane.b32.xlu1 %v8731_v23, %s7415_s29 }
0x17d6   :  { %4317 = vrot.lane.b32.xlu1 %v8869_v46, %s7432_s15 }
0x17da   :  { %4782 = vrot.lane.b32.xlu1 %v8937_v63, %s7433_s16 }
0x17f0   :  { %v5026_v33 = vpop.xlane.xlu0 %5025 }
0x17f1   :  { %v5023_v35 = vpop.xlane.xlu1 %5022 }
0x17f2   :  { %7361 = vrcp.f32 %v5023_v35 }
0x17f3   :  { %7363 = vrcp.f32 %v5026_v33 }
0x17f5   :  { %v7221_v8 = vpop.permute.xlu1 %7220 }
0x17f6   :  { %v7223_v25 = vunpack.i.h.bf16 %v7221_v8  ;;  %v7222_v18 = vunpack.i.l.bf16 %v7221_v8 }
0x17f8   :  { %v6856_v11 = vpack.c.bf16 %v7223_v25, %v7222_v18 }
0x17fa   :  { %6857 = vmatprep.subr.bf16.mxu0 %v6856_v11 }
0x17fb   :  { %6859 = vmatpush3.bf16.msra.mxu0 %v6856_v11  ;;  %v7385_v11 = vld [vmem:[%s9174_s0 + $0x8] sm:$0xff] }
0x17fc   :  { %v7362_v57 = vpop.eup %7361 }
0x17fd   :  { %v5037_v42 = vmul.f32 %v7362_v57, %v5023_v35  ;;  %v7364_v20 = vpop.eup %7363 }
0x17fe   :  { %v5038_v26 = vmul.f32 %v7364_v20, %v5026_v33 }
0x17ff   :  { %v5041_v6 = vsub.f32 2.0, %v5037_v42 }
0x1800   :  { %v5042_v9 = vsub.f32 2.0, %v5038_v26 }
0x1801   :  { %v5045_v58 = vmul.f32 %v7362_v57, %v5041_v6  ;;  %v7386_v57 = vld [vmem:[%s9174_s0] sm:$0xff] }
0x1802   :  { %v5046_v19 = vmul.f32 %v7364_v20, %v5042_v9  ;;  %v7387_v9 = vld [vmem:[%s9174_s0 + $0x10] sm:$0xff] }
0x1803   :  { %v5049_v59 = vmul.f32 %v7356_v53, %v5045_v58 }
0x1804   :  { %v5050_v39 = vmul.f32 %v8947_v34, %v5046_v19 }
0x1805   :  { %6446 = vmatprep.mubr.msk.f32.mxu1 %vm48_vm0, %v5049_v59 }
0x180c   :  { %v5032_v23 = vpop.xlane.xlu0 %5031 }
0x180d   :  { %7365 = vrcp.f32 %v5032_v23 }
0x1810   :  { %v7216_v40 = vpop.permute.xlu0 %7215 }
0x1811   :  { %v7218_v45 = vunpack.i.h.bf16 %v7216_v40  ;;  %v7217_v7 = vunpack.i.l.bf16 %v7216_v40 }
0x1813   :  { %v6852_v41 = vpack.c.bf16 %v7218_v45, %v7217_v7  ;;  %v7388_v7 = vld [vmem:[%s9174_s0 + $0x18] sm:$0xff] }
0x1814   :  { %v2459_v30 = vpop.permute.xlu0 %2458 }
0x1815   :  { %2469 = vst.msk [vmem:[#allocation2 + $0x8] sm:$0xff] %vm511_vm1, %v2459_v30  ;;  %6853 = vmatprep.subr.bf16.mxu1 %v6852_v41 }
0x1816   :  { %6855 = vmatpush3.bf16.msra.mxu1 %v6852_v41 }
0x1817   :  { %v7366_v1 = vpop.eup %7365 }
0x1818   :  { %v2923_v46 = vpop.permute.xlu0 %2922  ;;  %v5040_v61 = vmul.f32 %v7366_v1, %v5032_v23 }
0x1819   :  { %2933 = vst.msk [vmem:[#allocation2 + $0x8] sm:$0xff] %vm710_vm3, %v2923_v46  ;;  %6447 = vmatmul.mubr.msk.f32.vlgmr.msra.gmra.mrb[40].mxu1 %vm48_vm0, %v5050_v39 }
0x181a   :  { %v5044_v3 = vsub.f32 2.0, %v5040_v61 }
0x181c   :  { %v3387_v5 = vpop.permute.xlu0 %3386  ;;  %v5048_v52 = vmul.f32 %v7366_v1, %v5044_v3 }
0x181d   :  { %3397 = vst.msk [vmem:[#allocation2 + $0x8] sm:$0xff] %vm909_vm4, %v3387_v5 }
0x181e   :  { %v5052_v12 = vmul.f32 %v8954_v56, %v5048_v52 }
0x1820   :  { %v2461_v31 = vpop.permute.xlu0 %2460 }
0x1821   :  { %2470 = vst.msk [vmem:[#allocation2 + $0x10] sm:$0xff] %vm511_vm1, %v2461_v31 }
0x1824   :  { %v4314_v16 = vpop.permute.xlu0 %4313 }
0x1826   :  { %v5029_v55 = vpop.xlane.xlu1 %5028 }
0x1827   :  { %7367 = vrcp.f32 %v5029_v55 }
0x1828   :  { %v2925_v32 = vpop.permute.xlu0 %2924 }
0x1829   :  { %2934 = vst.msk [vmem:[#allocation2 + $0x10] sm:$0xff] %vm710_vm3, %v2925_v32 }
0x182a   :  { %v7226_v28 = vpop.permute.xlu1 %7225 }
0x182b   :  { %v7228_v43 = vunpack.i.h.bf16 %v7226_v28  ;;  %v7227_v62 = vunpack.i.l.bf16 %v7226_v28 }
0x182c   :  { %v4779_v63 = vpop.permute.xlu0 %4778 }
0x182d   :  { %v6860_v44 = vpack.c.bf16 %v7228_v43, %v7227_v62  ;;  %v5342_v43 = vld [vmem:[%s9182_s8] sm:$0xff]  ;;  %v5343_v62 = vld [vmem:[%s9182_s8 + $0x8] sm:$0xff] }
0x182e   :  { %v2457_v47 = vpop.permute.xlu1 %2456  ;;  %v6864_v61 = vpack.c.bf16 %v5343_v62, %v5342_v43  ;;  %v5480_v62 = vld [vmem:[%s9184_s10 + $0x50] sm:$0xff] }
0x182f   :  { %2468 = vst.msk [vmem:[#allocation2] sm:$0xff] %vm511_vm1, %v2457_v47  ;;  %6861 = vmatprep.subr.bf16.mxu0 %v6860_v44  ;;  %v5344_v47 = vld [vmem:[%s9182_s8 + $0x10] sm:$0xff] }
0x1830   :  { %v3389_v60 = vpop.permute.xlu0 %3388  ;;  %6863 = vmatpush3.bf16.msra.mxu0 %v6860_v44  ;;  %6865 = vmatprep.subr.bf16.mxu1 %v6864_v61 }
0x1831   :  { %v7368_v14 = vpop.eup %7367  ;;  %3398 = vst.msk [vmem:[#allocation2 + $0x10] sm:$0xff] %vm909_vm4, %v3389_v60  ;;  %v5345_v60 = vld [vmem:[%s9182_s8 + $0x18] sm:$0xff]  ;;  %6867 = vmatpush3.bf16.msra.mxu1 %v6864_v61 }
0x1832   :  { %v5039_v36 = vmul.f32 %v7368_v14, %v5029_v55  ;;  %v2921_v13 = vpop.permute.xlu1 %2920  ;;  %v6868_v3 = vpack.c.bf16 %v5345_v60, %v5344_v47  ;;  %v5483_v47 = vld [vmem:[%s9184_s10 + $0x68] sm:$0xff] }
0x1833   :  { %2932 = vst.msk [vmem:[#allocation2] sm:$0xff] %vm710_vm3, %v2921_v13 }
0x1834   :  { %v5043_v38 = vsub.f32 2.0, %v5039_v36  ;;  %v3853_v27 = vpop.permute.xlu0 %3852  ;;  %6869 = vmatprep.subr.bf16.mxu1 %v6868_v3 }
0x1835   :  { %3863 = vst.msk [vmem:[#allocation2 + $0x10] sm:$0xff] %vm3860_vm2, %v3853_v27  ;;  %6871 = vmatpush3.bf16.msra.mxu1 %v6868_v3  ;;  %v5485_v3 = vld [vmem:[%s9184_s10 + $0x78] sm:$0xff] }
0x1836   :  { %v5047_v29 = vmul.f32 %v7368_v14, %v5043_v38  ;;  %v3385_v24 = vpop.permute.xlu1 %3384 }
0x1837   :  { %3396 = vst.msk [vmem:[#allocation2] sm:$0xff] %vm909_vm4, %v3385_v24 }
0x1838   :  { %v5051_v48 = vmul.f32 %v8958_v17, %v5047_v29  ;;  %v3855_v15 = vpop.permute.xlu0 %3854 }
0x183a   :  { %6457 = vmatprep.mubr.msk.f32.mxu0 %vm48_vm0, %v5051_v48  ;;  %v3849_v21 = vpop.permute.xlu1 %3848  ;;  %v5470_v48 = vld [vmem:[%s9184_s10] sm:$0xff] }
0x183b   :  { %3861 = vst.msk [vmem:[#allocation2] sm:$0xff] %vm3860_vm2, %v3849_v21  ;;  %6458 = vmatmul.mubr.msk.f32.vlgmr.msra.gmra.mrb[44].mxu0 %vm48_vm0, %v5052_v12  ;;  %v5471_v12 = vld [vmem:[%s9184_s10 + $0x8] sm:$0xff]  ;;  %v5472_v21 = vld [vmem:[%s9184_s10 + $0x10] sm:$0xff] }
0x183c   :  { %4326 = vst.msk [vmem:[#allocation2] sm:$0xff] %vm4325_vm9, %v4314_v16  ;;  %v4320_v4 = vpop.permute.xlu0 %4319 }
0x183d   :  { %4791 = vst.msk [vmem:[#allocation2] sm:$0xff] %vm4790_vm11, %v4779_v63 }
0x183e   :  { %v3851_v34 = vpop.permute.xlu1 %3850 }
0x183f   :  { %3862 = vst.msk [vmem:[#allocation2 + $0x8] sm:$0xff] %vm3860_vm2, %v3851_v34  ;;  %v6872_v34 = vpack.c.bf16 %v5471_v12, %v5470_v48 }
0x1841   :  { %6873 = vmatprep.subr.bf16.mxu0 %v6872_v34 }
0x1842   :  { %v2463_v53 = vpop.permute.xlu1 %2462  ;;  %6875 = vmatpush3.bf16.msra.mxu0 %v6872_v34 }
0x1843   :  { %2471 = vst.msk [vmem:[#allocation2 + $0x18] sm:$0xff] %vm511_vm1, %v2463_v53  ;;  %vm5255_vm1 = vcmask 261344   ;;  %v5473_v53 = vld [vmem:[%s9184_s10 + $0x18] sm:$0xff] }
0x1846   :  { %v4316_v2 = vpop.permute.xlu1 %4315 }
0x1847   :  { %4327 = vst.msk [vmem:[#allocation2 + $0x8] sm:$0xff] %vm4325_vm9, %v4316_v2  ;;  %v6876_v2 = vpack.c.bf16 %v5473_v53, %v5472_v21 }
0x1849   :  { %6877 = vmatprep.subr.bf16.mxu0 %v6876_v2 }
0x184a   :  { %v2927_v54 = vpop.permute.xlu1 %2926  ;;  %6879 = vmatpush3.bf16.msra.mxu0 %v6876_v2 }
0x184b   :  { %2935 = vst.msk [vmem:[#allocation2 + $0x18] sm:$0xff] %vm710_vm3, %v2927_v54  ;;  %v5474_v54 = vld [vmem:[%s9184_s10 + $0x20] sm:$0xff] }
0x184e   :  { %v4781_v51 = vpop.permute.xlu1 %4780 }
0x184f   :  { %4792 = vst.msk [vmem:[#allocation2 + $0x8] sm:$0xff] %vm4790_vm11, %v4781_v51 }
0x1852   :  { %v3391_v0 = vpop.permute.xlu1 %3390 }
0x1853   :  { %3399 = vst.msk [vmem:[#allocation2 + $0x18] sm:$0xff] %vm909_vm4, %v3391_v0 }
0x1854   :  { %3864 = vst.msk [vmem:[#allocation2 + $0x18] sm:$0xff] %vm3860_vm2, %v3855_v15  ;;  %v5475_v15 = vld [vmem:[%s9184_s10 + $0x28] sm:$0xff] }
0x1855   :  { %4329 = vst.msk [vmem:[#allocation2 + $0x18] sm:$0xff] %vm4325_vm9, %v4320_v4  ;;  %v6880_v51 = vpack.c.bf16 %v5475_v15, %v5474_v54 }
0x1856   :  { %v4318_v56 = vpop.permute.xlu1 %4317 }
0x1857   :  { %4328 = vst.msk [vmem:[#allocation2 + $0x10] sm:$0xff] %vm4325_vm9, %v4318_v56  ;;  %6881 = vmatprep.subr.bf16.mxu0 %v6880_v51 }
0x1858   :  { %6883 = vmatpush3.bf16.msra.mxu0 %v6880_v51 }
0x185a   :  { %v4783_v22 = vpop.permute.xlu1 %4782 }
0x185b   :  { %4793 = vst.msk [vmem:[#allocation2 + $0x10] sm:$0xff] %vm4790_vm11, %v4783_v22 }
0x18ec   :  { %v6448_v49 = vpop.f32.mrb[40].mxu1 }
0x18ed   :  { %5245 = vrot.lane.b32.xlu1 %v6448_v49, %s7435_s2  ;;  %v5137_v50 = vpop.f32.mrb[41].mxu1 }
0x18ee   :  { %5243 = vrot.lane.b32.xlu0 %v5137_v50, %s7435_s2 }
0x18f2   :  { %4784 = vrot.lane.b32.xlu0 %v8935_v37, %s7433_s16 }
0x190e   :  { %v6459_v17 = vpop.f32.mrb[44].mxu0 }
0x190f   :  { %v5230_v10 = vpop.f32.mrb[45].mxu0  ;;  %5249 = vrot.lane.b32.xlu0 %v6459_v17, %s7435_s2 }
0x1910   :  { %5247 = vrot.lane.b32.xlu1 %v5230_v10, %s7435_s2  ;;  %v5772_v10 = vld [vmem:[%s9180_s6] ss:$0 sm:$0xff] }
0x195f   :  { %v5246_v35 = vpop.permute.xlu1 %5245 }
0x1960   :  { %5257 = vst.msk [vmem:[#allocation2 + $0x8] sm:$0xff] %vm5255_vm1, %v5246_v35  ;;  %v5244_v8 = vpop.permute.xlu0 %5243 }
0x1961   :  { %5256 = vst.msk [vmem:[#allocation2] sm:$0xff] %vm5255_vm1, %v5244_v8 }
0x1964   :  { %v4785_v25 = vpop.permute.xlu0 %4784 }
0x1965   :  { %4794 = vst.msk [vmem:[#allocation2 + $0x18] sm:$0xff] %vm4790_vm11, %v4785_v25 }
0x1967   :  { %v5261_v18 = vld [vmem:[#allocation2 + $0x8] sm:$0xff] }
0x1968   :  { %v9042_v37 = vadd.f32 %v7385_v11, %v5261_v18  ;;  %v5260_v33 = vld [vmem:[#allocation2] sm:$0xff] }
0x1969   :  { %v9047_v42 = vadd.f32 %v7386_v57, %v5260_v33  ;;  %v5773_v18 = vld [vmem:[%s9181_s7] ss:$0 sm:$0xff] }
0x196a   :  { %v5273_v6 = vsel %vm48_vm0, %v9042_v37, 0.0 }
0x196b   :  { %5274 = vadd.xlane.f32.xlu0 %v5273_v6  ;;  %v5270_v58 = vsel %vm48_vm0, %v9047_v42, 0.0 }
0x196c   :  { %5271 = vadd.xlane.f32.xlu1 %v5270_v58 }
0x1981   :  { %v5250_v59 = vpop.permute.xlu0 %5249 }
0x1982   :  { %5259 = vst.msk [vmem:[#allocation2 + $0x18] sm:$0xff] %vm5255_vm1, %v5250_v59  ;;  %v5248_v20 = vpop.permute.xlu1 %5247 }
0x1983   :  { %5258 = vst.msk [vmem:[#allocation2 + $0x10] sm:$0xff] %vm5255_vm1, %v5248_v20 }
0x1989   :  { %v5263_v23 = vld [vmem:[#allocation2 + $0x18] sm:$0xff] }
0x198a   :  { %v5262_v26 = vld [vmem:[#allocation2 + $0x10] sm:$0xff]  ;;  %v9065_v19 = vadd.f32 %v7388_v7, %v5263_v23 }
0x198b   :  { %v9058_v40 = vadd.f32 %v7387_v9, %v5262_v26 }
0x198c   :  { %v5279_v41 = vsel %vm48_vm0, %v9065_v19, 0.0 }
0x198d   :  { %v5276_v45 = vsel %vm48_vm0, %v9058_v40, 0.0 }
0x198e   :  { %5277 = vadd.xlane.f32.xlu0 %v5276_v45 }
0x1992   :  { %5280 = vadd.xlane.f32.xlu0 %v5279_v41 }
0x19f8   :  { %v5275_v30 = vpop.xlane.xlu0 %5274 }
0x19f9   :  { %v5283_v39 = vmul.f32 0.03125, %v5275_v30  ;;  %v5272_v46 = vpop.xlane.xlu1 %5271 }
0x19fa   :  { %v5282_v5 = vmul.f32 0.03125, %v5272_v46 }
0x19fb   :  { %v5287_v31 = vsub.f32 %v9042_v37, %v5283_v39 }
0x19fc   :  { %v5286_v16 = vsub.f32 %v9047_v42, %v5282_v5 }
0x19fd   :  { %v5291_v55 = vmul.f32 %v5287_v31, %v5287_v31 }
0x19fe   :  { %v5290_v32 = vmul.f32 %v5286_v16, %v5286_v16 }
0x19ff   :  { %v5297_v1 = vsel %vm48_vm0, %v5291_v55, 0.0  ;;  %v5477_v55 = vld [vmem:[%s9184_s10 + $0x38] sm:$0xff] }
0x1a00   :  { %5298 = vadd.xlane.f32.xlu0 %v5297_v1  ;;  %v5294_v28 = vsel %vm48_vm0, %v5290_v32, 0.0  ;;  %v5478_v1 = vld [vmem:[%s9184_s10 + $0x40] sm:$0xff] }
0x1a01   :  { %5295 = vadd.xlane.f32.xlu1 %v5294_v28  ;;  %v5479_v28 = vld [vmem:[%s9184_s10 + $0x48] sm:$0xff] }
0x1a02   :  { %v6888_v43 = vpack.c.bf16 %v5479_v28, %v5478_v1 }
0x1a1b   :  { %v5278_v63 = vpop.xlane.xlu0 %5277 }
0x1a1c   :  { %v5284_v44 = vmul.f32 0.03125, %v5278_v63  ;;  %v5481_v63 = vld [vmem:[%s9184_s10 + $0x58] sm:$0xff] }
0x1a1d   :  { %v6892_v61 = vpack.c.bf16 %v5481_v63, %v5480_v62 }
0x1a1e   :  { %v5288_v14 = vsub.f32 %v9058_v40, %v5284_v44  ;;  %v5482_v44 = vld [vmem:[%s9184_s10 + $0x60] sm:$0xff] }
0x1a1f   :  { %v5281_v36 = vpop.xlane.xlu0 %5280  ;;  %v6896_v60 = vpack.c.bf16 %v5483_v47, %v5482_v44 }
0x1a20   :  { %v5285_v13 = vmul.f32 0.03125, %v5281_v36  ;;  %v5292_v38 = vmul.f32 %v5288_v14, %v5288_v14 }
0x1a22   :  { %v5289_v27 = vsub.f32 %v9065_v19, %v5285_v13  ;;  %v5300_v52 = vsel %vm48_vm0, %v5292_v38, 0.0  ;;  %v5774_v13 = vld [vmem:[%s9183_s9] ss:$0 sm:$0xff] }
0x1a23   :  { %5301 = vadd.xlane.f32.xlu1 %v5300_v52 }
0x1a24   :  { %v5293_v29 = vmul.f32 %v5289_v27, %v5289_v27 }
0x1a26   :  { %v5303_v24 = vsel %vm48_vm0, %v5293_v29, 0.0 }
0x1a27   :  { %5304 = vadd.xlane.f32.xlu0 %v5303_v24 }
0x1a8d   :  { %v5299_v0 = vpop.xlane.xlu0 %5298 }
0x1a8e   :  { %v5307_v4 = vmul.f32 0.03125, %v5299_v0  ;;  %v5296_v56 = vpop.xlane.xlu1 %5295 }
0x1a8f   :  { %v5306_v22 = vmul.f32 0.03125, %v5296_v56 }
0x1a90   :  { %v5311_v49 = vadd.f32 1e-05, %v5307_v4 }
0x1a91   :  { %v5310_v50 = vadd.f32 1e-05, %v5306_v22 }
0x1a92   :  { %7369 = vrsqrt.f32 %v5311_v49 }
0x1a93   :  { %7371 = vrsqrt.f32 %v5310_v50 }
0x1a9c   :  { %v7370_v17 = vpop.eup %7369 }
0x1a9d   :  { %v7372_v35 = vpop.eup %7371  ;;  %v5319_v8 = vmul.f32 %v7370_v17, %v5287_v31 }
0x1a9e   :  { %v5318_v25 = vmul.f32 %v7372_v35, %v5286_v16  ;;  %v5476_v16 = vld [vmem:[%s9184_s10 + $0x30] sm:$0xff] }
0x1a9f   :  { %v5329_v11 = vmul.f32 %v5772_v10, %v5319_v8  ;;  %v6884_v32 = vpack.c.bf16 %v5477_v55, %v5476_v16 }
0x1aa0   :  { %v5328_v33 = vmul.f32 %v5772_v10, %v5318_v25 }
0x1aa1   :  { %v5339_v6 = vadd.f32 %v5773_v18, %v5329_v11  ;;  %6885 = vmatprep.subr.bf16.mxu0 %v6884_v32 }
0x1aa2   :  { %v5338_v57 = vadd.f32 %v5773_v18, %v5328_v33  ;;  %6887 = vmatpush3.bf16.msra.mxu0 %v6884_v32 }
0x1aa3   :  { %6889 = vmatprep.subr.bf16.mxu0 %v6888_v43 }
0x1aa4   :  { %6468 = vmatprep.mubr.msk.f32.mxu1 %vm48_vm0, %v5338_v57  ;;  %v5779_v57 = vld [vmem:[%s9185_s11] ss:$0 sm:$0xff]  ;;  %s7389_s11 = scalar_lea.vmem %s5592_s21, 512 }
0x1aa5   :  { %6469 = vmatmul.mubr.msk.f32.vlgmr.msra.gmra.mrb[42].mxu1 %vm48_vm0, %v5339_v6  ;;  %p7390_p0 = scmp.ne.s32.totalorder %s5592_s21, %s7389_s11  ;;  %p7395_p2 = scmp.lt.s32.totalorder %s7389_s11, %s7389_s11 }
0x1aa6   :  { %6891 = vmatpush3.bf16.msra.mxu0 %v6888_v43 }
0x1aa7   :  { %6893 = vmatprep.subr.bf16.mxu0 %v6892_v61  ;;  %p7396_p3 = por %p7395_p2, %p7394_p1 }
0x1aa9   :  { %p7397_p4 = pnand %p7396_p3, %p7390_p0 }
0x1aaa   :  { %6895 = vmatpush3.bf16.msra.mxu0 %v6892_v61 }
0x1aab   :  { %6897 = vmatprep.subr.bf16.mxu0 %v6896_v60 }
0x1aae   :  { %6899 = vmatpush3.bf16.msra.mxu0 %v6896_v60 }
0x1ab0   :  { %v5302_v58 = vpop.xlane.xlu1 %5301 }
0x1ab1   :  { %v5308_v59 = vmul.f32 0.03125, %v5302_v58 }
0x1ab3   :  { %v5312_v20 = vadd.f32 1e-05, %v5308_v59 }
0x1ab4   :  { %v5305_v26 = vpop.xlane.xlu0 %5304 }
0x1ab5   :  { %7373 = vrsqrt.f32 %v5312_v20  ;;  %v5309_v23 = vmul.f32 0.03125, %v5305_v26 }
0x1ab7   :  { %v5313_v9 = vadd.f32 1e-05, %v5309_v23 }
0x1ab9   :  { %7375 = vrsqrt.f32 %v5313_v9 }
0x1abf   :  { %v7374_v45 = vpop.eup %7373 }
0x1ac0   :  { %v5320_v7 = vmul.f32 %v7374_v45, %v5288_v14  ;;  %v5484_v14 = vld [vmem:[%s9184_s10 + $0x70] sm:$0xff] }
0x1ac1   :  { %v6900_v36 = vpack.c.bf16 %v5485_v3, %v5484_v14 }
0x1ac2   :  { %v5330_v41 = vmul.f32 %v5772_v10, %v5320_v7 }
0x1ac3   :  { %v7376_v30 = vpop.eup %7375  ;;  %6901 = vmatprep.subr.bf16.mxu0 %v6900_v36 }
0x1ac4   :  { %v5340_v39 = vadd.f32 %v5773_v18, %v5330_v41  ;;  %v5321_v46 = vmul.f32 %v7376_v30, %v5289_v27  ;;  %6903 = vmatpush3.bf16.msra.mxu0 %v6900_v36 }
0x1ac6   :  { %6471 = vmatprep.mubr.msk.f32.mxu1 %vm48_vm0, %v5340_v39  ;;  %v5331_v5 = vmul.f32 %v5772_v10, %v5321_v46 }
0x1ac8   :  { %v5341_v31 = vadd.f32 %v5773_v18, %v5331_v5 }
0x1aca   :  { %6472 = vmatmul.mubr.msk.f32.gmra.mrb[44].mxu1 %vm48_vm0, %v5341_v31 }
0x1b78   :  { %v6470_v38 = vpop.f32.mrb[42].mxu1 }
0x1b79   :  { %v5437_v27 = vadd.f32 %v6470_v38, %v5774_v13  ;;  %v5431_v52 = vpop.f32.mrb[43].mxu1 }
0x1b7a   :  { %v5432_v29 = vadd.f32 %v5774_v13, %v5431_v52 }
0x1b7b   :  { %v5455_v24 = vmul.f32 0.70710677, %v5437_v27  ;;  %v5451_v54 = vmul.f32 0.5, %v5437_v27 }
0x1b7c   :  { %v5454_v48 = vmul.f32 0.70710677, %v5432_v29  ;;  %v5450_v53 = vmul.f32 0.5, %v5432_v29 }
0x1b7d   :  { %7377 = verf.f32 %v5455_v24 }
0x1b7e   :  { %7379 = verf.f32 %v5454_v48 }
0x1b87   :  { %v7378_v12 = vpop.eup %7377 }
0x1b88   :  { %v7380_v21 = vpop.eup %7379  ;;  %v5463_v34 = vadd.f32 1.0, %v7378_v12 }
0x1b89   :  { %v5462_v2 = vadd.f32 1.0, %v7380_v21 }
0x1b8a   :  { %v5467_v51 = vmul.f32 %v5463_v34, %v5451_v54 }
0x1b8b   :  { %v5466_v15 = vmul.f32 %v5462_v2, %v5450_v53 }
0x1b8d   :  { %6506 = vmatprep.mubr.f32.mxu0 %v5466_v15 }
0x1b8e   :  { %6507 = vmatmul.mubr.f32.vlgmr.msra.gmra.mrb[46].mxu0 %v5467_v51 }
0x1b9d   :  { %v6473_v0 = vpop.f32.mrb[44].mxu1 }
0x1b9e   :  { %v5447_v4 = vadd.f32 %v6473_v0, %v5774_v13  ;;  %v5441_v56 = vpop.f32.mrb[45].mxu1 }
0x1b9f   :  { %v5442_v22 = vadd.f32 %v5774_v13, %v5441_v56 }
0x1ba0   :  { %v5457_v49 = vmul.f32 0.70710677, %v5447_v4  ;;  %v5453_v18 = vmul.f32 0.5, %v5447_v4 }
0x1ba1   :  { %v5456_v50 = vmul.f32 0.70710677, %v5442_v22  ;;  %v5452_v8 = vmul.f32 0.5, %v5442_v22 }
0x1ba2   :  { %7381 = verf.f32 %v5457_v49 }
0x1ba3   :  { %7383 = verf.f32 %v5456_v50 }
0x1bac   :  { %v7382_v17 = vpop.eup %7381 }
0x1bad   :  { %v7384_v10 = vpop.eup %7383  ;;  %v5465_v35 = vadd.f32 1.0, %v7382_v17 }
0x1bae   :  { %v5464_v25 = vadd.f32 1.0, %v7384_v10 }
0x1baf   :  { %v5469_v33 = vmul.f32 %v5465_v35, %v5453_v18 }
0x1bb0   :  { %v5468_v11 = vmul.f32 %v5464_v25, %v5452_v8 }
0x1bb2   :  { %6509 = vmatprep.mubr.f32.mxu0 %v5468_v11 }
0x1bb3   :  { %6510 = vmatmul.mubr.f32.gmra.mrb[48].mxu0 %v5469_v33 }
0x1c61   :  { %v6508_v6 = vpop.f32.mrb[46].mxu0 }
0x1c62   :  { %v5565_v58 = vadd.f32 %v6508_v6, %v5779_v57  ;;  %v5559_v59 = vpop.f32.mrb[47].mxu0 }
0x1c63   :  { %v5560_v20 = vadd.f32 %v5779_v57, %v5559_v59 }
0x1c64   :  { %v5579_v26 = vadd.f32 %v5565_v58, %v9042_v37 }
0x1c65   :  { %v5578_v23 = vadd.f32 %v5560_v20, %v9047_v42 }
0x1c66   :  { %5583 = vst.msk [vmem:[#allocation3 + $0x8] sm:$0xff] %vm48_vm0, %v5579_v26 }
0x1c67   :  { %5582 = vst.msk [vmem:[#allocation3] sm:$0xff] %vm48_vm0, %v5578_v23 }
0x1c86   :  { %v6511_v9 = vpop.f32.mrb[48].mxu0 }
0x1c87   :  { %v5575_v45 = vadd.f32 %v6511_v9, %v5779_v57  ;;  %v5569_v7 = vpop.f32.mrb[49].mxu0 }
0x1c88   :  { %v5570_v41 = vadd.f32 %v5779_v57, %v5569_v7 }
0x1c89   :  { %v5581_v30 = vadd.f32 %v5575_v45, %v9065_v19 }
0x1c8a   :  { %v5580_v39 = vadd.f32 %v5570_v41, %v9058_v40 }
0x1c8b   :  { %5585 = vst.msk [vmem:[#allocation3 + $0x18] sm:$0xff] %vm48_vm0, %v5581_v30 }
0x1c8c   :  { %5584 = vst.msk [vmem:[#allocation3 + $0x10] sm:$0xff] %vm48_vm0, %v5580_v39 }
0x1c8d   :  { %7400 = shalt.err (!%p7397_p4)
}
0x1c8e   :  { %s7401_s6 = scalar_lea.hbm %s9186_s12, 512 }
0x1c8f   :  { %p7402_p5 = scmp.ne.s32.totalorder %s9186_s12, %s7401_s6  ;;  %p7405_p6 = scmp.lt.u32.totalorder %s7401_s6, %s9186_s12 }
0x1c91   :  { %p7407_p7 = pnand %p7405_p6, %p7402_p5 }
0x1c93   :  { %7410 = shalt.err (!%p7407_p7)
}
0x1c94   :  { %s7437_s25 = smov 128  }
0x1c95   :  { %5597 = dma.vmem_to_hbm [thread:$0]  %s5592_s21, 512, %s9186_s12, [#allocation4], %s7437_s25, %s7437_s25, %s7413_s1  }
0x1c96   :  { %7411 = dma.done.wait [#allocation4], 512  }
0x1c97   :  { %7412 = vsyncadd [#allocation4], 4294966784 }
0x1c98   :  { %5601 = vsyncpa [#allocation4], 1 }

</bundles_post_ra>
